<compile_context>
chip_gen: v6e
topology: v6e:2x2x1
jax: 0.10.0
libtpu: 0.0.40
codegen_flags: <defaults>
</compile_context>

<pallas_src>
import functools

import jax
import jax.numpy as jnp
from jax.experimental import pallas as pl

# ----------------------------- model config -----------------------------
V, D, DFF, H, DH = 128, 32, 64, 4, 8   # vocab, d_model, d_ff, heads, head_dim
NEG_INF = -1e9                          # finite: fully-masked rows stay NaN-free


# ------------------------- in-kernel helper math -------------------------
def _rmsnorm(x, w):
    # T5 LayerNorm: RMS only, no mean subtraction, no bias.  x:(N,D), w:(1,D).
    var = jnp.mean(x * x, axis=-1, keepdims=True)
    return x * jax.lax.rsqrt(var + 1e-6) * w


def _embed_onehot(ids, embed):
    # ids:(N,1) int32, embed:(V,D) f32 -> (N,D) f32 via one-hot matmul (MXU).
    n = ids.shape[0]
    onehot = (jax.lax.broadcasted_iota(jnp.int32, (n, embed.shape[0]), 1) == ids)
    return jnp.dot(onehot.astype(jnp.float32), embed,
                   preferred_element_type=jnp.float32)


def _attention(x_q, x_kv, wq, wk, wv, wo, bias, head_masks):
    """Batched multi-head attention over VMEM-resident values.

    x_q:(B*Sq,D), x_kv:(B*Sk,D).  `bias` is a precomputed additive score bias
    broadcastable to (B*Sq, B*Sk) that already encodes the block-diagonal
    cross-batch mask (and padding / causal masks where needed), so all batches
    are handled by a single set of dots per head.  Heads are separated with
    disjoint lane masks over the D axis (no reshape/transpose), and the masked
    per-head contexts sum back into the concatenated context for free before a
    single (D,D) output projection.  T5 attention: no 1/sqrt(d) scaling.
    """
    q = jnp.dot(x_q, wq, preferred_element_type=jnp.float32)
    k = jnp.dot(x_kv, wk, preferred_element_type=jnp.float32)
    v = jnp.dot(x_kv, wv, preferred_element_type=jnp.float32)

    ctx = jnp.zeros((x_q.shape[0], D), jnp.float32)
    for hm in head_masks:
        # scores for this head: masked lanes contribute 0 to the contraction.
        s = jax.lax.dot_general(q * hm, k * hm,
                                (((1,), (1,)), ((), ())),
                                preferred_element_type=jnp.float32)  # (BSq,BSk)
        s = s + bias
        m = jnp.max(s, axis=-1, keepdims=True)
        p = jnp.exp(s - m)
        denom = jnp.sum(p, axis=-1, keepdims=True)
        p = p * pl.reciprocal(denom, approx=True)          # divide -> EUP slot
        # masked V keeps only this head's lanes -> summing heads == concat.
        ctx = ctx + jnp.dot(p, v * hm, preferred_element_type=jnp.float32)
    return jnp.dot(ctx, wo, preferred_element_type=jnp.float32)


def _ffn(x, wi, wo):
    h = jnp.maximum(jnp.dot(x, wi, preferred_element_type=jnp.float32), 0.0)
    return jnp.dot(h, wo, preferred_element_type=jnp.float32)   # T5 DenseReluDense


def _div_const(x, d):
    # Compile-time-constant divide; power-of-two uses a shift (always lowered).
    if d & (d - 1) == 0:
        return jnp.right_shift(x, d.bit_length() - 1)
    return x // d


def _mod_const(x, d):
    if d & (d - 1) == 0:
        return jnp.bitwise_and(x, d - 1)
    return x % d


# ----------------------------- fused kernel -----------------------------
def _fused_t5_kernel(B, S,
                     enc_ids_ref, dec_ids_ref, labels_ref, mask_ref, embed_ref,
                     eq_ref, ek_ref, ev_ref, eo_ref,
                     eln1_ref, eln2_ref, elnf_ref, ewi_ref, ewo_ref,
                     sq_ref, sk_ref, sv_ref, so_ref,
                     cq_ref, ck_ref, cv_ref, co_ref,
                     dln1_ref, dln2_ref, dln3_ref, dlnf_ref, dwi_ref, dwo_ref,
                     logits_ref, loss_ref):
    N = B * S
    embed = embed_ref[...]                          # read once, reused 3x

    # ---- hoisted masks / biases (built once, shared by all attention calls) ----
    col = jax.lax.broadcasted_iota(jnp.int32, (1, D), 1)
    head_masks = [((col >= h * DH) & (col < (h + 1) * DH)).astype(jnp.float32)
                  for h in range(H)]

    rows = jax.lax.broadcasted_iota(jnp.int32, (N, N), 0)
    cols = jax.lax.broadcasted_iota(jnp.int32, (N, N), 1)
    same_batch = _div_const(rows, S) == _div_const(cols, S)
    block_bias = jnp.where(same_batch, 0.0, NEG_INF)                    # cross-batch
    causal_bias = jnp.where(
        same_batch & (_mod_const(cols, S) <= _mod_const(rows, S)), 0.0, NEG_INF)
    pad_bias = (1.0 - mask_ref[...]) * NEG_INF                          # (1, N)
    enc_key_bias = block_bias + pad_bias            # encoder self-attn & cross-attn

    # ---- encoder block ----
    h = _embed_onehot(enc_ids_ref[...], embed)
    y = _rmsnorm(h, eln1_ref[...])
    h = h + _attention(y, y, eq_ref[...], ek_ref[...], ev_ref[...], eo_ref[...],
                       enc_key_bias, head_masks)
    y = _rmsnorm(h, eln2_ref[...])
    h = h + _ffn(y, ewi_ref[...], ewo_ref[...])
    enc_out = _rmsnorm(h, elnf_ref[...])            # stays on-chip (VMEM/vregs)

    # ---- decoder block ----
    h = _embed_onehot(dec_ids_ref[...], embed)
    y = _rmsnorm(h, dln1_ref[...])
    h = h + _attention(y, y, sq_ref[...], sk_ref[...], sv_ref[...], so_ref[...],
                       causal_bias, head_masks)
    y = _rmsnorm(h, dln2_ref[...])
    h = h + _attention(y, enc_out, cq_ref[...], ck_ref[...], cv_ref[...], co_ref[...],
                       enc_key_bias, head_masks)
    y = _rmsnorm(h, dln3_ref[...])
    h = h + _ffn(y, dwi_ref[...], dwo_ref[...])
    dec_out = _rmsnorm(h, dlnf_ref[...])

    # ---- tied LM head (T5 d_model**-0.5 rescale) + cross-entropy ----
    x = dec_out * (D ** -0.5)
    # embed consumed in native (V,D) layout: logits[n,v] = sum_d x[n,d]*embed[v,d]
    logits = jax.lax.dot_general(x, embed, (((1,), (1,)), ((), ())),
                                 preferred_element_type=jnp.float32)    # (N, V)
    logits_ref[...] = logits.astype(logits_ref.dtype)

    labels = labels_ref[...]                                            # (N,1) int32
    m = jnp.max(logits, axis=-1, keepdims=True)
    lse = m + jnp.log(jnp.sum(jnp.exp(logits - m), axis=-1, keepdims=True))
    vocab_ids = jax.lax.broadcasted_iota(jnp.int32, logits.shape, 1)
    picked = jnp.sum(jnp.where(vocab_ids == labels, logits, 0.0),
                     axis=-1, keepdims=True)
    valid = (labels != -100).astype(jnp.float32)        # ignore_index = -100
    nll = (lse - picked) * valid
    loss_sum = jnp.sum(nll, axis=0, keepdims=True)      # (1,1)
    cnt = jnp.sum(valid, axis=0, keepdims=True)         # (1,1)
    loss_ref[...] = loss_sum / jnp.maximum(cnt, 1.0)    # final scalar in-kernel


# ----------------------------- call wrapper -------------------------------
def _full_block_call(kernel, out_shape, *args):
    """Single pallas_call with grid=(1,) and whole-array VMEM blocks everywhere."""
    def spec(x):
        nd = len(x.shape)
        return pl.BlockSpec(x.shape, lambda i, _nd=nd: (0,) * _nd)
    out_specs = (tuple(spec(o) for o in out_shape)
                 if isinstance(out_shape, (tuple, list)) else spec(out_shape))
    return pl.pallas_call(
        kernel,
        out_shape=out_shape,
        grid=(1,),
        in_specs=[spec(a) for a in args],
        out_specs=out_specs,
    )(*args)


# ----------------------------- params / forward ---------------------------
def init_params(key):
    def nrm(k, shape, scale=0.05):
        return scale * jax.random.normal(k, shape, dtype=jnp.float32)
    keys = iter(jax.random.split(key, 32))

    def attn_params():
        return {"q": nrm(next(keys), (D, D)), "k": nrm(next(keys), (D, D)),
                "v": nrm(next(keys), (D, D)), "o": nrm(next(keys), (D, D))}

    return {
        "embed": nrm(next(keys), (V, D), scale=1.0),
        "enc": {"ln1": jnp.ones((D,), jnp.float32), "attn": attn_params(),
                "ln2": jnp.ones((D,), jnp.float32),
                "wi": nrm(next(keys), (D, DFF)), "wo": nrm(next(keys), (DFF, D)),
                "ln_f": jnp.ones((D,), jnp.float32)},
        "dec": {"ln1": jnp.ones((D,), jnp.float32), "self_attn": attn_params(),
                "ln2": jnp.ones((D,), jnp.float32), "cross_attn": attn_params(),
                "ln3": jnp.ones((D,), jnp.float32),
                "wi": nrm(next(keys), (D, DFF)), "wo": nrm(next(keys), (DFF, D)),
                "ln_f": jnp.ones((D,), jnp.float32)},
    }


def filling_model_forward(params, input_ids, attention_mask, labels):
    # FillingModel.forward: labels.squeeze(1), then seq2seq LM with labels.
    labels = labels.squeeze(1)                              # (B,1,S) -> (B,S)
    B, S = labels.shape
    # T5 _shift_right: prepend decoder_start_token_id (0), drop last, -100 -> pad(0)
    dec_in = jnp.concatenate([jnp.zeros((B, 1), labels.dtype), labels[:, :-1]], axis=1)
    dec_in = jnp.where(dec_in == -100, 0, dec_in)
    mask_row = attention_mask.astype(jnp.float32).reshape(1, B * S)
    ep, dp, emb = params["enc"], params["dec"], params["embed"]

    kernel = functools.partial(_fused_t5_kernel, B, S)
    logits, loss = _full_block_call(
        kernel,
        (jax.ShapeDtypeStruct((B * S, V), jnp.float32),
         jax.ShapeDtypeStruct((1, 1), jnp.float32)),
        input_ids.reshape(B * S, 1).astype(jnp.int32),
        dec_in.reshape(B * S, 1).astype(jnp.int32),
        labels.reshape(B * S, 1).astype(jnp.int32),
        mask_row, emb,
        ep["attn"]["q"], ep["attn"]["k"], ep["attn"]["v"], ep["attn"]["o"],
        ep["ln1"].reshape(1, D), ep["ln2"].reshape(1, D), ep["ln_f"].reshape(1, D),
        ep["wi"], ep["wo"],
        dp["self_attn"]["q"], dp["self_attn"]["k"],
        dp["self_attn"]["v"], dp["self_attn"]["o"],
        dp["cross_attn"]["q"], dp["cross_attn"]["k"],
        dp["cross_attn"]["v"], dp["cross_attn"]["o"],
        dp["ln1"].reshape(1, D), dp["ln2"].reshape(1, D),
        dp["ln3"].reshape(1, D), dp["ln_f"].reshape(1, D),
        dp["wi"], dp["wo"])

    return {"loss": loss[0, 0], "logits": logits.reshape(B, S, V)}


# ----------------------------- demo --------------------------------------
if __name__ == "__main__":
    key = jax.random.PRNGKey(0)
    pkey, ikey, lkey = jax.random.split(key, 3)
    B, S = 2, 8
    params = init_params(pkey)
    input_ids = jax.random.randint(ikey, (B, S), 0, V, dtype=jnp.int32)
    attention_mask = jnp.ones((B, S), dtype=jnp.int32).at[:, -2:].set(0)  # pad tail
    labels = jax.random.randint(lkey, (B, 1, S), 0, V, dtype=jnp.int32)
    labels = labels.at[:, :, -1].set(-100)                  # ignored position

    fwd = jax.jit(functools.partial(filling_model_forward, params))
    out = fwd(input_ids, attention_mask, labels)
    jax.block_until_ready(out)

    assert out["logits"].shape == (B, S, V)
    assert bool(jnp.isfinite(out["loss"]))
    print("KERNEL_OK")
</pallas_src>

<mosaic_0001>
module attributes {stable_mosaic.version = 11 : i64} {
  func.func @_fused_t5_kernel(%arg0: i32, %arg1: memref<16x1xi32, #tpu.memory_space<vmem>>, %arg2: memref<16x1xi32, #tpu.memory_space<vmem>>, %arg3: memref<16x1xi32, #tpu.memory_space<vmem>>, %arg4: memref<1x16xf32, #tpu.memory_space<vmem>>, %arg5: memref<128x32xf32, #tpu.memory_space<vmem>>, %arg6: memref<32x32xf32, #tpu.memory_space<vmem>>, %arg7: memref<32x32xf32, #tpu.memory_space<vmem>>, %arg8: memref<32x32xf32, #tpu.memory_space<vmem>>, %arg9: memref<32x32xf32, #tpu.memory_space<vmem>>, %arg10: memref<1x32xf32, #tpu.memory_space<vmem>>, %arg11: memref<1x32xf32, #tpu.memory_space<vmem>>, %arg12: memref<1x32xf32, #tpu.memory_space<vmem>>, %arg13: memref<32x64xf32, #tpu.memory_space<vmem>>, %arg14: memref<64x32xf32, #tpu.memory_space<vmem>>, %arg15: memref<32x32xf32, #tpu.memory_space<vmem>>, %arg16: memref<32x32xf32, #tpu.memory_space<vmem>>, %arg17: memref<32x32xf32, #tpu.memory_space<vmem>>, %arg18: memref<32x32xf32, #tpu.memory_space<vmem>>, %arg19: memref<32x32xf32, #tpu.memory_space<vmem>>, %arg20: memref<32x32xf32, #tpu.memory_space<vmem>>, %arg21: memref<32x32xf32, #tpu.memory_space<vmem>>, %arg22: memref<32x32xf32, #tpu.memory_space<vmem>>, %arg23: memref<1x32xf32, #tpu.memory_space<vmem>>, %arg24: memref<1x32xf32, #tpu.memory_space<vmem>>, %arg25: memref<1x32xf32, #tpu.memory_space<vmem>>, %arg26: memref<1x32xf32, #tpu.memory_space<vmem>>, %arg27: memref<32x64xf32, #tpu.memory_space<vmem>>, %arg28: memref<64x32xf32, #tpu.memory_space<vmem>>, %arg29: memref<16x128xf32, #tpu.memory_space<vmem>>, %arg30: memref<1x1xf32, #tpu.memory_space<vmem>>) attributes {dimension_semantics = [#tpu.dimension_semantics<arbitrary>], iteration_bounds = array<i64: 1>, scalar_prefetch = 0 : i64, scratch_operands = 0 : i64, tpu.core_type = #tpu.core_type<tc>, window_params = [{pipeline_mode = #tpu.pipeline_mode<synchronous>, transform_indices = @transform_0, window_bounds = array<i64: 16, 1>}, {pipeline_mode = #tpu.pipeline_mode<synchronous>, transform_indices = @transform_1, window_bounds = array<i64: 16, 1>}, {pipeline_mode = #tpu.pipeline_mode<synchronous>, transform_indices = @transform_2, window_bounds = array<i64: 16, 1>}, {pipeline_mode = #tpu.pipeline_mode<synchronous>, transform_indices = @transform_3, window_bounds = array<i64: 1, 16>}, {pipeline_mode = #tpu.pipeline_mode<synchronous>, transform_indices = @transform_4, window_bounds = array<i64: 128, 32>}, {pipeline_mode = #tpu.pipeline_mode<synchronous>, transform_indices = @transform_5, window_bounds = array<i64: 32, 32>}, {pipeline_mode = #tpu.pipeline_mode<synchronous>, transform_indices = @transform_6, window_bounds = array<i64: 32, 32>}, {pipeline_mode = #tpu.pipeline_mode<synchronous>, transform_indices = @transform_7, window_bounds = array<i64: 32, 32>}, {pipeline_mode = #tpu.pipeline_mode<synchronous>, transform_indices = @transform_8, window_bounds = array<i64: 32, 32>}, {pipeline_mode = #tpu.pipeline_mode<synchronous>, transform_indices = @transform_9, window_bounds = array<i64: 1, 32>}, {pipeline_mode = #tpu.pipeline_mode<synchronous>, transform_indices = @transform_10, window_bounds = array<i64: 1, 32>}, {pipeline_mode = #tpu.pipeline_mode<synchronous>, transform_indices = @transform_11, window_bounds = array<i64: 1, 32>}, {pipeline_mode = #tpu.pipeline_mode<synchronous>, transform_indices = @transform_12, window_bounds = array<i64: 32, 64>}, {pipeline_mode = #tpu.pipeline_mode<synchronous>, transform_indices = @transform_13, window_bounds = array<i64: 64, 32>}, {pipeline_mode = #tpu.pipeline_mode<synchronous>, transform_indices = @transform_14, window_bounds = array<i64: 32, 32>}, {pipeline_mode = #tpu.pipeline_mode<synchronous>, transform_indices = @transform_15, window_bounds = array<i64: 32, 32>}, {pipeline_mode = #tpu.pipeline_mode<synchronous>, transform_indices = @transform_16, window_bounds = array<i64: 32, 32>}, {pipeline_mode = #tpu.pipeline_mode<synchronous>, transform_indices = @transform_17, window_bounds = array<i64: 32, 32>}, {pipeline_mode = #tpu.pipeline_mode<synchronous>, transform_indices = @transform_18, window_bounds = array<i64: 32, 32>}, {pipeline_mode = #tpu.pipeline_mode<synchronous>, transform_indices = @transform_19, window_bounds = array<i64: 32, 32>}, {pipeline_mode = #tpu.pipeline_mode<synchronous>, transform_indices = @transform_20, window_bounds = array<i64: 32, 32>}, {pipeline_mode = #tpu.pipeline_mode<synchronous>, transform_indices = @transform_21, window_bounds = array<i64: 32, 32>}, {pipeline_mode = #tpu.pipeline_mode<synchronous>, transform_indices = @transform_22, window_bounds = array<i64: 1, 32>}, {pipeline_mode = #tpu.pipeline_mode<synchronous>, transform_indices = @transform_23, window_bounds = array<i64: 1, 32>}, {pipeline_mode = #tpu.pipeline_mode<synchronous>, transform_indices = @transform_24, window_bounds = array<i64: 1, 32>}, {pipeline_mode = #tpu.pipeline_mode<synchronous>, transform_indices = @transform_25, window_bounds = array<i64: 1, 32>}, {pipeline_mode = #tpu.pipeline_mode<synchronous>, transform_indices = @transform_26, window_bounds = array<i64: 32, 64>}, {pipeline_mode = #tpu.pipeline_mode<synchronous>, transform_indices = @transform_27, window_bounds = array<i64: 64, 32>}, {pipeline_mode = #tpu.pipeline_mode<synchronous>, transform_indices = @transform_28, window_bounds = array<i64: 16, 128>}, {pipeline_mode = #tpu.pipeline_mode<synchronous>, transform_indices = @transform_29, window_bounds = array<i64: 1, 1>}]} {
    %c0 = arith.constant 0 : index
    %c0_0 = arith.constant 0 : index
    %0 = vector.load %arg5[%c0, %c0_0] : memref<128x32xf32, #tpu.memory_space<vmem>>, vector<128x32xf32>
    %1 = tpu.iota {dimensions = array<i32: 1>} : vector<1x32xi32>
    %c0_i32 = arith.constant 0 : i32
    %2 = vector.broadcast %c0_i32 : i32 to vector<1x32xi32>
    %3 = arith.cmpi sge, %1, %2 : vector<1x32xi32>
    %c8_i32 = arith.constant 8 : i32
    %4 = vector.broadcast %c8_i32 : i32 to vector<1x32xi32>
    %5 = arith.cmpi slt, %1, %4 : vector<1x32xi32>
    %6 = arith.andi %3, %5 : vector<1x32xi1>
    %7 = arith.extui %6 : vector<1x32xi1> to vector<1x32xi32>
    %8 = arith.sitofp %7 : vector<1x32xi32> to vector<1x32xf32>
    %c8_i32_1 = arith.constant 8 : i32
    %9 = vector.broadcast %c8_i32_1 : i32 to vector<1x32xi32>
    %10 = arith.cmpi sge, %1, %9 : vector<1x32xi32>
    %c16_i32 = arith.constant 16 : i32
    %11 = vector.broadcast %c16_i32 : i32 to vector<1x32xi32>
    %12 = arith.cmpi slt, %1, %11 : vector<1x32xi32>
    %13 = arith.andi %10, %12 : vector<1x32xi1>
    %14 = arith.extui %13 : vector<1x32xi1> to vector<1x32xi32>
    %15 = arith.sitofp %14 : vector<1x32xi32> to vector<1x32xf32>
    %c16_i32_2 = arith.constant 16 : i32
    %16 = vector.broadcast %c16_i32_2 : i32 to vector<1x32xi32>
    %17 = arith.cmpi sge, %1, %16 : vector<1x32xi32>
    %c24_i32 = arith.constant 24 : i32
    %18 = vector.broadcast %c24_i32 : i32 to vector<1x32xi32>
    %19 = arith.cmpi slt, %1, %18 : vector<1x32xi32>
    %20 = arith.andi %17, %19 : vector<1x32xi1>
    %21 = arith.extui %20 : vector<1x32xi1> to vector<1x32xi32>
    %22 = arith.sitofp %21 : vector<1x32xi32> to vector<1x32xf32>
    %c24_i32_3 = arith.constant 24 : i32
    %23 = vector.broadcast %c24_i32_3 : i32 to vector<1x32xi32>
    %24 = arith.cmpi sge, %1, %23 : vector<1x32xi32>
    %c32_i32 = arith.constant 32 : i32
    %25 = vector.broadcast %c32_i32 : i32 to vector<1x32xi32>
    %26 = arith.cmpi slt, %1, %25 : vector<1x32xi32>
    %27 = arith.andi %24, %26 : vector<1x32xi1>
    %28 = arith.extui %27 : vector<1x32xi1> to vector<1x32xi32>
    %29 = arith.sitofp %28 : vector<1x32xi32> to vector<1x32xf32>
    %30 = tpu.iota {dimensions = array<i32: 0>} : vector<16x16xi32>
    %31 = tpu.iota {dimensions = array<i32: 1>} : vector<16x16xi32>
    %c3_i32 = arith.constant 3 : i32
    %32 = vector.broadcast %c3_i32 : i32 to vector<16x16xi32>
    %33 = arith.shrsi %30, %32 : vector<16x16xi32>
    %c3_i32_4 = arith.constant 3 : i32
    %34 = vector.broadcast %c3_i32_4 : i32 to vector<16x16xi32>
    %35 = arith.shrsi %31, %34 : vector<16x16xi32>
    %36 = arith.cmpi eq, %33, %35 : vector<16x16xi32>
    %cst = arith.constant 0.000000e+00 : f32
    %cst_5 = arith.constant -1.000000e+09 : f32
    %37 = vector.broadcast %cst : f32 to vector<16x16xf32>
    %38 = vector.broadcast %cst_5 : f32 to vector<16x16xf32>
    %39 = arith.select %36, %37, %38 : vector<16x16xi1>, vector<16x16xf32>
    %c7_i32 = arith.constant 7 : i32
    %40 = vector.broadcast %c7_i32 : i32 to vector<16x16xi32>
    %41 = arith.andi %31, %40 : vector<16x16xi32>
    %c7_i32_6 = arith.constant 7 : i32
    %42 = vector.broadcast %c7_i32_6 : i32 to vector<16x16xi32>
    %43 = arith.andi %30, %42 : vector<16x16xi32>
    %44 = arith.cmpi sle, %41, %43 : vector<16x16xi32>
    %45 = arith.andi %36, %44 : vector<16x16xi1>
    %cst_7 = arith.constant 0.000000e+00 : f32
    %cst_8 = arith.constant -1.000000e+09 : f32
    %46 = vector.broadcast %cst_7 : f32 to vector<16x16xf32>
    %47 = vector.broadcast %cst_8 : f32 to vector<16x16xf32>
    %48 = arith.select %45, %46, %47 : vector<16x16xi1>, vector<16x16xf32>
    %c0_9 = arith.constant 0 : index
    %c0_10 = arith.constant 0 : index
    %49 = vector.load %arg4[%c0_9, %c0_10] : memref<1x16xf32, #tpu.memory_space<vmem>>, vector<1x16xf32>
    %cst_11 = arith.constant 1.000000e+00 : f32
    %50 = vector.broadcast %cst_11 : f32 to vector<1x16xf32>
    %51 = arith.subf %50, %49 : vector<1x16xf32>
    %cst_12 = arith.constant -1.000000e+09 : f32
    %52 = vector.broadcast %cst_12 : f32 to vector<1x16xf32>
    %53 = arith.mulf %51, %52 : vector<1x16xf32>
    %54 = vector.broadcast %53 : vector<1x16xf32> to vector<16x16xf32>
    %55 = arith.addf %39, %54 : vector<16x16xf32>
    %c0_13 = arith.constant 0 : index
    %c0_14 = arith.constant 0 : index
    %56 = vector.load %arg1[%c0_13, %c0_14] : memref<16x1xi32, #tpu.memory_space<vmem>>, vector<16x1xi32>
    %57 = tpu.iota {dimensions = array<i32: 1>} : vector<16x128xi32>
    %58 = vector.broadcast %56 : vector<16x1xi32> to vector<16x128xi32>
    %59 = arith.cmpi eq, %57, %58 : vector<16x128xi32>
    %60 = arith.extui %59 : vector<16x128xi1> to vector<16x128xi32>
    %61 = arith.sitofp %60 : vector<16x128xi32> to vector<16x128xf32>
    %cst_15 = arith.constant dense<0.000000e+00> : vector<16x32xf32>
    %62 = tpu.matmul %61, %0, %cst_15 {dimension_numbers = #tpu.dot_dimension_numbers<[1], [0], [0], [1], [0, 0, 1, 1], [], []>} : vector<16x128xf32>, vector<128x32xf32>, vector<16x32xf32> -> vector<16x32xf32>
    %c0_16 = arith.constant 0 : index
    %c0_17 = arith.constant 0 : index
    %63 = vector.load %arg10[%c0_16, %c0_17] : memref<1x32xf32, #tpu.memory_space<vmem>>, vector<1x32xf32>
    %64 = arith.mulf %62, %62 : vector<16x32xf32>
    %cst_18 = arith.constant dense<0.000000e+00> : vector<16xf32>
    %65 = vector.multi_reduction <add>, %64, %cst_18 [1] : vector<16x32xf32> to vector<16xf32>
    %66 = vector.shape_cast %65 : vector<16xf32> to vector<16x1xf32>
    %cst_19 = arith.constant 3.200000e+01 : f32
    %67 = vector.broadcast %cst_19 : f32 to vector<16x1xf32>
    %68 = arith.divf %66, %67 : vector<16x1xf32>
    %cst_20 = arith.constant 9.99999997E-7 : f32
    %69 = vector.broadcast %cst_20 : f32 to vector<16x1xf32>
    %70 = arith.addf %68, %69 : vector<16x1xf32>
    %71 = math.rsqrt %70 : vector<16x1xf32>
    %72 = vector.broadcast %71 : vector<16x1xf32> to vector<16x32xf32>
    %73 = arith.mulf %62, %72 : vector<16x32xf32>
    %74 = vector.broadcast %63 : vector<1x32xf32> to vector<16x32xf32>
    %75 = arith.mulf %73, %74 : vector<16x32xf32>
    %c0_21 = arith.constant 0 : index
    %c0_22 = arith.constant 0 : index
    %76 = vector.load %arg6[%c0_21, %c0_22] : memref<32x32xf32, #tpu.memory_space<vmem>>, vector<32x32xf32>
    %c0_23 = arith.constant 0 : index
    %c0_24 = arith.constant 0 : index
    %77 = vector.load %arg7[%c0_23, %c0_24] : memref<32x32xf32, #tpu.memory_space<vmem>>, vector<32x32xf32>
    %c0_25 = arith.constant 0 : index
    %c0_26 = arith.constant 0 : index
    %78 = vector.load %arg8[%c0_25, %c0_26] : memref<32x32xf32, #tpu.memory_space<vmem>>, vector<32x32xf32>
    %c0_27 = arith.constant 0 : index
    %c0_28 = arith.constant 0 : index
    %79 = vector.load %arg9[%c0_27, %c0_28] : memref<32x32xf32, #tpu.memory_space<vmem>>, vector<32x32xf32>
    %cst_29 = arith.constant dense<0.000000e+00> : vector<16x32xf32>
    %80 = tpu.matmul %75, %76, %cst_29 {dimension_numbers = #tpu.dot_dimension_numbers<[1], [0], [0], [1], [0, 0, 1, 1], [], []>} : vector<16x32xf32>, vector<32x32xf32>, vector<16x32xf32> -> vector<16x32xf32>
    %cst_30 = arith.constant dense<0.000000e+00> : vector<16x32xf32>
    %81 = tpu.matmul %75, %77, %cst_30 {dimension_numbers = #tpu.dot_dimension_numbers<[1], [0], [0], [1], [0, 0, 1, 1], [], []>} : vector<16x32xf32>, vector<32x32xf32>, vector<16x32xf32> -> vector<16x32xf32>
    %cst_31 = arith.constant dense<0.000000e+00> : vector<16x32xf32>
    %82 = tpu.matmul %75, %78, %cst_31 {dimension_numbers = #tpu.dot_dimension_numbers<[1], [0], [0], [1], [0, 0, 1, 1], [], []>} : vector<16x32xf32>, vector<32x32xf32>, vector<16x32xf32> -> vector<16x32xf32>
    %cst_32 = arith.constant 0.000000e+00 : f32
    %83 = vector.broadcast %cst_32 : f32 to vector<16x32xf32>
    %84 = vector.broadcast %8 : vector<1x32xf32> to vector<16x32xf32>
    %85 = arith.mulf %80, %84 : vector<16x32xf32>
    %86 = vector.broadcast %8 : vector<1x32xf32> to vector<16x32xf32>
    %87 = arith.mulf %81, %86 : vector<16x32xf32>
    %cst_33 = arith.constant dense<0.000000e+00> : vector<16x16xf32>
    %88 = tpu.matmul %85, %87, %cst_33 {dimension_numbers = #tpu.dot_dimension_numbers<[1], [1], [0], [0], [0, 0, 1, 0], [], []>} : vector<16x32xf32>, vector<16x32xf32>, vector<16x16xf32> -> vector<16x16xf32>
    %89 = arith.addf %88, %55 : vector<16x16xf32>
    %cst_34 = arith.constant dense<0xFF800000> : vector<16xf32>
    %90 = vector.multi_reduction <maximumf>, %89, %cst_34 [1] : vector<16x16xf32> to vector<16xf32>
    %91 = vector.shape_cast %90 : vector<16xf32> to vector<16x1xf32>
    %92 = vector.broadcast %91 : vector<16x1xf32> to vector<16x16xf32>
    %93 = arith.subf %89, %92 : vector<16x16xf32>
    %94 = math.exp %93 : vector<16x16xf32>
    %cst_35 = arith.constant dense<0.000000e+00> : vector<16xf32>
    %95 = vector.multi_reduction <add>, %94, %cst_35 [1] : vector<16x16xf32> to vector<16xf32>
    %96 = vector.shape_cast %95 : vector<16xf32> to vector<16x1xf32>
    %97 = tpu.reciprocal %96 {approx = true} : vector<16x1xf32> -> vector<16x1xf32>
    %98 = vector.broadcast %97 : vector<16x1xf32> to vector<16x16xf32>
    %99 = arith.mulf %94, %98 : vector<16x16xf32>
    %100 = vector.broadcast %8 : vector<1x32xf32> to vector<16x32xf32>
    %101 = arith.mulf %82, %100 : vector<16x32xf32>
    %cst_36 = arith.constant dense<0.000000e+00> : vector<16x32xf32>
    %102 = tpu.matmul %99, %101, %cst_36 {dimension_numbers = #tpu.dot_dimension_numbers<[1], [0], [0], [1], [0, 0, 1, 1], [], []>} : vector<16x16xf32>, vector<16x32xf32>, vector<16x32xf32> -> vector<16x32xf32>
    %103 = arith.addf %83, %102 : vector<16x32xf32>
    %104 = vector.broadcast %15 : vector<1x32xf32> to vector<16x32xf32>
    %105 = arith.mulf %80, %104 : vector<16x32xf32>
    %106 = vector.broadcast %15 : vector<1x32xf32> to vector<16x32xf32>
    %107 = arith.mulf %81, %106 : vector<16x32xf32>
    %cst_37 = arith.constant dense<0.000000e+00> : vector<16x16xf32>
    %108 = tpu.matmul %105, %107, %cst_37 {dimension_numbers = #tpu.dot_dimension_numbers<[1], [1], [0], [0], [0, 0, 1, 0], [], []>} : vector<16x32xf32>, vector<16x32xf32>, vector<16x16xf32> -> vector<16x16xf32>
    %109 = arith.addf %108, %55 : vector<16x16xf32>
    %cst_38 = arith.constant dense<0xFF800000> : vector<16xf32>
    %110 = vector.multi_reduction <maximumf>, %109, %cst_38 [1] : vector<16x16xf32> to vector<16xf32>
    %111 = vector.shape_cast %110 : vector<16xf32> to vector<16x1xf32>
    %112 = vector.broadcast %111 : vector<16x1xf32> to vector<16x16xf32>
    %113 = arith.subf %109, %112 : vector<16x16xf32>
    %114 = math.exp %113 : vector<16x16xf32>
    %cst_39 = arith.constant dense<0.000000e+00> : vector<16xf32>
    %115 = vector.multi_reduction <add>, %114, %cst_39 [1] : vector<16x16xf32> to vector<16xf32>
    %116 = vector.shape_cast %115 : vector<16xf32> to vector<16x1xf32>
    %117 = tpu.reciprocal %116 {approx = true} : vector<16x1xf32> -> vector<16x1xf32>
    %118 = vector.broadcast %117 : vector<16x1xf32> to vector<16x16xf32>
    %119 = arith.mulf %114, %118 : vector<16x16xf32>
    %120 = vector.broadcast %15 : vector<1x32xf32> to vector<16x32xf32>
    %121 = arith.mulf %82, %120 : vector<16x32xf32>
    %cst_40 = arith.constant dense<0.000000e+00> : vector<16x32xf32>
    %122 = tpu.matmul %119, %121, %cst_40 {dimension_numbers = #tpu.dot_dimension_numbers<[1], [0], [0], [1], [0, 0, 1, 1], [], []>} : vector<16x16xf32>, vector<16x32xf32>, vector<16x32xf32> -> vector<16x32xf32>
    %123 = arith.addf %103, %122 : vector<16x32xf32>
    %124 = vector.broadcast %22 : vector<1x32xf32> to vector<16x32xf32>
    %125 = arith.mulf %80, %124 : vector<16x32xf32>
    %126 = vector.broadcast %22 : vector<1x32xf32> to vector<16x32xf32>
    %127 = arith.mulf %81, %126 : vector<16x32xf32>
    %cst_41 = arith.constant dense<0.000000e+00> : vector<16x16xf32>
    %128 = tpu.matmul %125, %127, %cst_41 {dimension_numbers = #tpu.dot_dimension_numbers<[1], [1], [0], [0], [0, 0, 1, 0], [], []>} : vector<16x32xf32>, vector<16x32xf32>, vector<16x16xf32> -> vector<16x16xf32>
    %129 = arith.addf %128, %55 : vector<16x16xf32>
    %cst_42 = arith.constant dense<0xFF800000> : vector<16xf32>
    %130 = vector.multi_reduction <maximumf>, %129, %cst_42 [1] : vector<16x16xf32> to vector<16xf32>
    %131 = vector.shape_cast %130 : vector<16xf32> to vector<16x1xf32>
    %132 = vector.broadcast %131 : vector<16x1xf32> to vector<16x16xf32>
    %133 = arith.subf %129, %132 : vector<16x16xf32>
    %134 = math.exp %133 : vector<16x16xf32>
    %cst_43 = arith.constant dense<0.000000e+00> : vector<16xf32>
    %135 = vector.multi_reduction <add>, %134, %cst_43 [1] : vector<16x16xf32> to vector<16xf32>
    %136 = vector.shape_cast %135 : vector<16xf32> to vector<16x1xf32>
    %137 = tpu.reciprocal %136 {approx = true} : vector<16x1xf32> -> vector<16x1xf32>
    %138 = vector.broadcast %137 : vector<16x1xf32> to vector<16x16xf32>
    %139 = arith.mulf %134, %138 : vector<16x16xf32>
    %140 = vector.broadcast %22 : vector<1x32xf32> to vector<16x32xf32>
    %141 = arith.mulf %82, %140 : vector<16x32xf32>
    %cst_44 = arith.constant dense<0.000000e+00> : vector<16x32xf32>
    %142 = tpu.matmul %139, %141, %cst_44 {dimension_numbers = #tpu.dot_dimension_numbers<[1], [0], [0], [1], [0, 0, 1, 1], [], []>} : vector<16x16xf32>, vector<16x32xf32>, vector<16x32xf32> -> vector<16x32xf32>
    %143 = arith.addf %123, %142 : vector<16x32xf32>
    %144 = vector.broadcast %29 : vector<1x32xf32> to vector<16x32xf32>
    %145 = arith.mulf %80, %144 : vector<16x32xf32>
    %146 = vector.broadcast %29 : vector<1x32xf32> to vector<16x32xf32>
    %147 = arith.mulf %81, %146 : vector<16x32xf32>
    %cst_45 = arith.constant dense<0.000000e+00> : vector<16x16xf32>
    %148 = tpu.matmul %145, %147, %cst_45 {dimension_numbers = #tpu.dot_dimension_numbers<[1], [1], [0], [0], [0, 0, 1, 0], [], []>} : vector<16x32xf32>, vector<16x32xf32>, vector<16x16xf32> -> vector<16x16xf32>
    %149 = arith.addf %148, %55 : vector<16x16xf32>
    %cst_46 = arith.constant dense<0xFF800000> : vector<16xf32>
    %150 = vector.multi_reduction <maximumf>, %149, %cst_46 [1] : vector<16x16xf32> to vector<16xf32>
    %151 = vector.shape_cast %150 : vector<16xf32> to vector<16x1xf32>
    %152 = vector.broadcast %151 : vector<16x1xf32> to vector<16x16xf32>
    %153 = arith.subf %149, %152 : vector<16x16xf32>
    %154 = math.exp %153 : vector<16x16xf32>
    %cst_47 = arith.constant dense<0.000000e+00> : vector<16xf32>
    %155 = vector.multi_reduction <add>, %154, %cst_47 [1] : vector<16x16xf32> to vector<16xf32>
    %156 = vector.shape_cast %155 : vector<16xf32> to vector<16x1xf32>
    %157 = tpu.reciprocal %156 {approx = true} : vector<16x1xf32> -> vector<16x1xf32>
    %158 = vector.broadcast %157 : vector<16x1xf32> to vector<16x16xf32>
    %159 = arith.mulf %154, %158 : vector<16x16xf32>
    %160 = vector.broadcast %29 : vector<1x32xf32> to vector<16x32xf32>
    %161 = arith.mulf %82, %160 : vector<16x32xf32>
    %cst_48 = arith.constant dense<0.000000e+00> : vector<16x32xf32>
    %162 = tpu.matmul %159, %161, %cst_48 {dimension_numbers = #tpu.dot_dimension_numbers<[1], [0], [0], [1], [0, 0, 1, 1], [], []>} : vector<16x16xf32>, vector<16x32xf32>, vector<16x32xf32> -> vector<16x32xf32>
    %163 = arith.addf %143, %162 : vector<16x32xf32>
    %cst_49 = arith.constant dense<0.000000e+00> : vector<16x32xf32>
    %164 = tpu.matmul %163, %79, %cst_49 {dimension_numbers = #tpu.dot_dimension_numbers<[1], [0], [0], [1], [0, 0, 1, 1], [], []>} : vector<16x32xf32>, vector<32x32xf32>, vector<16x32xf32> -> vector<16x32xf32>
    %165 = arith.addf %62, %164 : vector<16x32xf32>
    %c0_50 = arith.constant 0 : index
    %c0_51 = arith.constant 0 : index
    %166 = vector.load %arg11[%c0_50, %c0_51] : memref<1x32xf32, #tpu.memory_space<vmem>>, vector<1x32xf32>
    %167 = arith.mulf %165, %165 : vector<16x32xf32>
    %cst_52 = arith.constant dense<0.000000e+00> : vector<16xf32>
    %168 = vector.multi_reduction <add>, %167, %cst_52 [1] : vector<16x32xf32> to vector<16xf32>
    %169 = vector.shape_cast %168 : vector<16xf32> to vector<16x1xf32>
    %cst_53 = arith.constant 3.200000e+01 : f32
    %170 = vector.broadcast %cst_53 : f32 to vector<16x1xf32>
    %171 = arith.divf %169, %170 : vector<16x1xf32>
    %cst_54 = arith.constant 9.99999997E-7 : f32
    %172 = vector.broadcast %cst_54 : f32 to vector<16x1xf32>
    %173 = arith.addf %171, %172 : vector<16x1xf32>
    %174 = math.rsqrt %173 : vector<16x1xf32>
    %175 = vector.broadcast %174 : vector<16x1xf32> to vector<16x32xf32>
    %176 = arith.mulf %165, %175 : vector<16x32xf32>
    %177 = vector.broadcast %166 : vector<1x32xf32> to vector<16x32xf32>
    %178 = arith.mulf %176, %177 : vector<16x32xf32>
    %c0_55 = arith.constant 0 : index
    %c0_56 = arith.constant 0 : index
    %179 = vector.load %arg13[%c0_55, %c0_56] : memref<32x64xf32, #tpu.memory_space<vmem>>, vector<32x64xf32>
    %c0_57 = arith.constant 0 : index
    %c0_58 = arith.constant 0 : index
    %180 = vector.load %arg14[%c0_57, %c0_58] : memref<64x32xf32, #tpu.memory_space<vmem>>, vector<64x32xf32>
    %cst_59 = arith.constant dense<0.000000e+00> : vector<16x64xf32>
    %181 = tpu.matmul %178, %179, %cst_59 {dimension_numbers = #tpu.dot_dimension_numbers<[1], [0], [0], [1], [0, 0, 1, 1], [], []>} : vector<16x32xf32>, vector<32x64xf32>, vector<16x64xf32> -> vector<16x64xf32>
    %cst_60 = arith.constant 0.000000e+00 : f32
    %182 = vector.broadcast %cst_60 : f32 to vector<16x64xf32>
    %183 = arith.maximumf %181, %182 : vector<16x64xf32>
    %cst_61 = arith.constant dense<0.000000e+00> : vector<16x32xf32>
    %184 = tpu.matmul %183, %180, %cst_61 {dimension_numbers = #tpu.dot_dimension_numbers<[1], [0], [0], [1], [0, 0, 1, 1], [], []>} : vector<16x64xf32>, vector<64x32xf32>, vector<16x32xf32> -> vector<16x32xf32>
    %185 = arith.addf %165, %184 : vector<16x32xf32>
    %c0_62 = arith.constant 0 : index
    %c0_63 = arith.constant 0 : index
    %186 = vector.load %arg12[%c0_62, %c0_63] : memref<1x32xf32, #tpu.memory_space<vmem>>, vector<1x32xf32>
    %187 = arith.mulf %185, %185 : vector<16x32xf32>
    %cst_64 = arith.constant dense<0.000000e+00> : vector<16xf32>
    %188 = vector.multi_reduction <add>, %187, %cst_64 [1] : vector<16x32xf32> to vector<16xf32>
    %189 = vector.shape_cast %188 : vector<16xf32> to vector<16x1xf32>
    %cst_65 = arith.constant 3.200000e+01 : f32
    %190 = vector.broadcast %cst_65 : f32 to vector<16x1xf32>
    %191 = arith.divf %189, %190 : vector<16x1xf32>
    %cst_66 = arith.constant 9.99999997E-7 : f32
    %192 = vector.broadcast %cst_66 : f32 to vector<16x1xf32>
    %193 = arith.addf %191, %192 : vector<16x1xf32>
    %194 = math.rsqrt %193 : vector<16x1xf32>
    %195 = vector.broadcast %194 : vector<16x1xf32> to vector<16x32xf32>
    %196 = arith.mulf %185, %195 : vector<16x32xf32>
    %197 = vector.broadcast %186 : vector<1x32xf32> to vector<16x32xf32>
    %198 = arith.mulf %196, %197 : vector<16x32xf32>
    %c0_67 = arith.constant 0 : index
    %c0_68 = arith.constant 0 : index
    %199 = vector.load %arg2[%c0_67, %c0_68] : memref<16x1xi32, #tpu.memory_space<vmem>>, vector<16x1xi32>
    %200 = tpu.iota {dimensions = array<i32: 1>} : vector<16x128xi32>
    %201 = vector.broadcast %199 : vector<16x1xi32> to vector<16x128xi32>
    %202 = arith.cmpi eq, %200, %201 : vector<16x128xi32>
    %203 = arith.extui %202 : vector<16x128xi1> to vector<16x128xi32>
    %204 = arith.sitofp %203 : vector<16x128xi32> to vector<16x128xf32>
    %cst_69 = arith.constant dense<0.000000e+00> : vector<16x32xf32>
    %205 = tpu.matmul %204, %0, %cst_69 {dimension_numbers = #tpu.dot_dimension_numbers<[1], [0], [0], [1], [0, 0, 1, 1], [], []>} : vector<16x128xf32>, vector<128x32xf32>, vector<16x32xf32> -> vector<16x32xf32>
    %c0_70 = arith.constant 0 : index
    %c0_71 = arith.constant 0 : index
    %206 = vector.load %arg23[%c0_70, %c0_71] : memref<1x32xf32, #tpu.memory_space<vmem>>, vector<1x32xf32>
    %207 = arith.mulf %205, %205 : vector<16x32xf32>
    %cst_72 = arith.constant dense<0.000000e+00> : vector<16xf32>
    %208 = vector.multi_reduction <add>, %207, %cst_72 [1] : vector<16x32xf32> to vector<16xf32>
    %209 = vector.shape_cast %208 : vector<16xf32> to vector<16x1xf32>
    %cst_73 = arith.constant 3.200000e+01 : f32
    %210 = vector.broadcast %cst_73 : f32 to vector<16x1xf32>
    %211 = arith.divf %209, %210 : vector<16x1xf32>
    %cst_74 = arith.constant 9.99999997E-7 : f32
    %212 = vector.broadcast %cst_74 : f32 to vector<16x1xf32>
    %213 = arith.addf %211, %212 : vector<16x1xf32>
    %214 = math.rsqrt %213 : vector<16x1xf32>
    %215 = vector.broadcast %214 : vector<16x1xf32> to vector<16x32xf32>
    %216 = arith.mulf %205, %215 : vector<16x32xf32>
    %217 = vector.broadcast %206 : vector<1x32xf32> to vector<16x32xf32>
    %218 = arith.mulf %216, %217 : vector<16x32xf32>
    %c0_75 = arith.constant 0 : index
    %c0_76 = arith.constant 0 : index
    %219 = vector.load %arg15[%c0_75, %c0_76] : memref<32x32xf32, #tpu.memory_space<vmem>>, vector<32x32xf32>
    %c0_77 = arith.constant 0 : index
    %c0_78 = arith.constant 0 : index
    %220 = vector.load %arg16[%c0_77, %c0_78] : memref<32x32xf32, #tpu.memory_space<vmem>>, vector<32x32xf32>
    %c0_79 = arith.constant 0 : index
    %c0_80 = arith.constant 0 : index
    %221 = vector.load %arg17[%c0_79, %c0_80] : memref<32x32xf32, #tpu.memory_space<vmem>>, vector<32x32xf32>
    %c0_81 = arith.constant 0 : index
    %c0_82 = arith.constant 0 : index
    %222 = vector.load %arg18[%c0_81, %c0_82] : memref<32x32xf32, #tpu.memory_space<vmem>>, vector<32x32xf32>
    %cst_83 = arith.constant dense<0.000000e+00> : vector<16x32xf32>
    %223 = tpu.matmul %218, %219, %cst_83 {dimension_numbers = #tpu.dot_dimension_numbers<[1], [0], [0], [1], [0, 0, 1, 1], [], []>} : vector<16x32xf32>, vector<32x32xf32>, vector<16x32xf32> -> vector<16x32xf32>
    %cst_84 = arith.constant dense<0.000000e+00> : vector<16x32xf32>
    %224 = tpu.matmul %218, %220, %cst_84 {dimension_numbers = #tpu.dot_dimension_numbers<[1], [0], [0], [1], [0, 0, 1, 1], [], []>} : vector<16x32xf32>, vector<32x32xf32>, vector<16x32xf32> -> vector<16x32xf32>
    %cst_85 = arith.constant dense<0.000000e+00> : vector<16x32xf32>
    %225 = tpu.matmul %218, %221, %cst_85 {dimension_numbers = #tpu.dot_dimension_numbers<[1], [0], [0], [1], [0, 0, 1, 1], [], []>} : vector<16x32xf32>, vector<32x32xf32>, vector<16x32xf32> -> vector<16x32xf32>
    %cst_86 = arith.constant 0.000000e+00 : f32
    %226 = vector.broadcast %cst_86 : f32 to vector<16x32xf32>
    %227 = vector.broadcast %8 : vector<1x32xf32> to vector<16x32xf32>
    %228 = arith.mulf %223, %227 : vector<16x32xf32>
    %229 = vector.broadcast %8 : vector<1x32xf32> to vector<16x32xf32>
    %230 = arith.mulf %224, %229 : vector<16x32xf32>
    %cst_87 = arith.constant dense<0.000000e+00> : vector<16x16xf32>
    %231 = tpu.matmul %228, %230, %cst_87 {dimension_numbers = #tpu.dot_dimension_numbers<[1], [1], [0], [0], [0, 0, 1, 0], [], []>} : vector<16x32xf32>, vector<16x32xf32>, vector<16x16xf32> -> vector<16x16xf32>
    %232 = arith.addf %231, %48 : vector<16x16xf32>
    %cst_88 = arith.constant dense<0xFF800000> : vector<16xf32>
    %233 = vector.multi_reduction <maximumf>, %232, %cst_88 [1] : vector<16x16xf32> to vector<16xf32>
    %234 = vector.shape_cast %233 : vector<16xf32> to vector<16x1xf32>
    %235 = vector.broadcast %234 : vector<16x1xf32> to vector<16x16xf32>
    %236 = arith.subf %232, %235 : vector<16x16xf32>
    %237 = math.exp %236 : vector<16x16xf32>
    %cst_89 = arith.constant dense<0.000000e+00> : vector<16xf32>
    %238 = vector.multi_reduction <add>, %237, %cst_89 [1] : vector<16x16xf32> to vector<16xf32>
    %239 = vector.shape_cast %238 : vector<16xf32> to vector<16x1xf32>
    %240 = tpu.reciprocal %239 {approx = true} : vector<16x1xf32> -> vector<16x1xf32>
    %241 = vector.broadcast %240 : vector<16x1xf32> to vector<16x16xf32>
    %242 = arith.mulf %237, %241 : vector<16x16xf32>
    %243 = vector.broadcast %8 : vector<1x32xf32> to vector<16x32xf32>
    %244 = arith.mulf %225, %243 : vector<16x32xf32>
    %cst_90 = arith.constant dense<0.000000e+00> : vector<16x32xf32>
    %245 = tpu.matmul %242, %244, %cst_90 {dimension_numbers = #tpu.dot_dimension_numbers<[1], [0], [0], [1], [0, 0, 1, 1], [], []>} : vector<16x16xf32>, vector<16x32xf32>, vector<16x32xf32> -> vector<16x32xf32>
    %246 = arith.addf %226, %245 : vector<16x32xf32>
    %247 = vector.broadcast %15 : vector<1x32xf32> to vector<16x32xf32>
    %248 = arith.mulf %223, %247 : vector<16x32xf32>
    %249 = vector.broadcast %15 : vector<1x32xf32> to vector<16x32xf32>
    %250 = arith.mulf %224, %249 : vector<16x32xf32>
    %cst_91 = arith.constant dense<0.000000e+00> : vector<16x16xf32>
    %251 = tpu.matmul %248, %250, %cst_91 {dimension_numbers = #tpu.dot_dimension_numbers<[1], [1], [0], [0], [0, 0, 1, 0], [], []>} : vector<16x32xf32>, vector<16x32xf32>, vector<16x16xf32> -> vector<16x16xf32>
    %252 = arith.addf %251, %48 : vector<16x16xf32>
    %cst_92 = arith.constant dense<0xFF800000> : vector<16xf32>
    %253 = vector.multi_reduction <maximumf>, %252, %cst_92 [1] : vector<16x16xf32> to vector<16xf32>
    %254 = vector.shape_cast %253 : vector<16xf32> to vector<16x1xf32>
    %255 = vector.broadcast %254 : vector<16x1xf32> to vector<16x16xf32>
    %256 = arith.subf %252, %255 : vector<16x16xf32>
    %257 = math.exp %256 : vector<16x16xf32>
    %cst_93 = arith.constant dense<0.000000e+00> : vector<16xf32>
    %258 = vector.multi_reduction <add>, %257, %cst_93 [1] : vector<16x16xf32> to vector<16xf32>
    %259 = vector.shape_cast %258 : vector<16xf32> to vector<16x1xf32>
    %260 = tpu.reciprocal %259 {approx = true} : vector<16x1xf32> -> vector<16x1xf32>
    %261 = vector.broadcast %260 : vector<16x1xf32> to vector<16x16xf32>
    %262 = arith.mulf %257, %261 : vector<16x16xf32>
    %263 = vector.broadcast %15 : vector<1x32xf32> to vector<16x32xf32>
    %264 = arith.mulf %225, %263 : vector<16x32xf32>
    %cst_94 = arith.constant dense<0.000000e+00> : vector<16x32xf32>
    %265 = tpu.matmul %262, %264, %cst_94 {dimension_numbers = #tpu.dot_dimension_numbers<[1], [0], [0], [1], [0, 0, 1, 1], [], []>} : vector<16x16xf32>, vector<16x32xf32>, vector<16x32xf32> -> vector<16x32xf32>
    %266 = arith.addf %246, %265 : vector<16x32xf32>
    %267 = vector.broadcast %22 : vector<1x32xf32> to vector<16x32xf32>
    %268 = arith.mulf %223, %267 : vector<16x32xf32>
    %269 = vector.broadcast %22 : vector<1x32xf32> to vector<16x32xf32>
    %270 = arith.mulf %224, %269 : vector<16x32xf32>
    %cst_95 = arith.constant dense<0.000000e+00> : vector<16x16xf32>
    %271 = tpu.matmul %268, %270, %cst_95 {dimension_numbers = #tpu.dot_dimension_numbers<[1], [1], [0], [0], [0, 0, 1, 0], [], []>} : vector<16x32xf32>, vector<16x32xf32>, vector<16x16xf32> -> vector<16x16xf32>
    %272 = arith.addf %271, %48 : vector<16x16xf32>
    %cst_96 = arith.constant dense<0xFF800000> : vector<16xf32>
    %273 = vector.multi_reduction <maximumf>, %272, %cst_96 [1] : vector<16x16xf32> to vector<16xf32>
    %274 = vector.shape_cast %273 : vector<16xf32> to vector<16x1xf32>
    %275 = vector.broadcast %274 : vector<16x1xf32> to vector<16x16xf32>
    %276 = arith.subf %272, %275 : vector<16x16xf32>
    %277 = math.exp %276 : vector<16x16xf32>
    %cst_97 = arith.constant dense<0.000000e+00> : vector<16xf32>
    %278 = vector.multi_reduction <add>, %277, %cst_97 [1] : vector<16x16xf32> to vector<16xf32>
    %279 = vector.shape_cast %278 : vector<16xf32> to vector<16x1xf32>
    %280 = tpu.reciprocal %279 {approx = true} : vector<16x1xf32> -> vector<16x1xf32>
    %281 = vector.broadcast %280 : vector<16x1xf32> to vector<16x16xf32>
    %282 = arith.mulf %277, %281 : vector<16x16xf32>
    %283 = vector.broadcast %22 : vector<1x32xf32> to vector<16x32xf32>
    %284 = arith.mulf %225, %283 : vector<16x32xf32>
    %cst_98 = arith.constant dense<0.000000e+00> : vector<16x32xf32>
    %285 = tpu.matmul %282, %284, %cst_98 {dimension_numbers = #tpu.dot_dimension_numbers<[1], [0], [0], [1], [0, 0, 1, 1], [], []>} : vector<16x16xf32>, vector<16x32xf32>, vector<16x32xf32> -> vector<16x32xf32>
    %286 = arith.addf %266, %285 : vector<16x32xf32>
    %287 = vector.broadcast %29 : vector<1x32xf32> to vector<16x32xf32>
    %288 = arith.mulf %223, %287 : vector<16x32xf32>
    %289 = vector.broadcast %29 : vector<1x32xf32> to vector<16x32xf32>
    %290 = arith.mulf %224, %289 : vector<16x32xf32>
    %cst_99 = arith.constant dense<0.000000e+00> : vector<16x16xf32>
    %291 = tpu.matmul %288, %290, %cst_99 {dimension_numbers = #tpu.dot_dimension_numbers<[1], [1], [0], [0], [0, 0, 1, 0], [], []>} : vector<16x32xf32>, vector<16x32xf32>, vector<16x16xf32> -> vector<16x16xf32>
    %292 = arith.addf %291, %48 : vector<16x16xf32>
    %cst_100 = arith.constant dense<0xFF800000> : vector<16xf32>
    %293 = vector.multi_reduction <maximumf>, %292, %cst_100 [1] : vector<16x16xf32> to vector<16xf32>
    %294 = vector.shape_cast %293 : vector<16xf32> to vector<16x1xf32>
    %295 = vector.broadcast %294 : vector<16x1xf32> to vector<16x16xf32>
    %296 = arith.subf %292, %295 : vector<16x16xf32>
    %297 = math.exp %296 : vector<16x16xf32>
    %cst_101 = arith.constant dense<0.000000e+00> : vector<16xf32>
    %298 = vector.multi_reduction <add>, %297, %cst_101 [1] : vector<16x16xf32> to vector<16xf32>
    %299 = vector.shape_cast %298 : vector<16xf32> to vector<16x1xf32>
    %300 = tpu.reciprocal %299 {approx = true} : vector<16x1xf32> -> vector<16x1xf32>
    %301 = vector.broadcast %300 : vector<16x1xf32> to vector<16x16xf32>
    %302 = arith.mulf %297, %301 : vector<16x16xf32>
    %303 = vector.broadcast %29 : vector<1x32xf32> to vector<16x32xf32>
    %304 = arith.mulf %225, %303 : vector<16x32xf32>
    %cst_102 = arith.constant dense<0.000000e+00> : vector<16x32xf32>
    %305 = tpu.matmul %302, %304, %cst_102 {dimension_numbers = #tpu.dot_dimension_numbers<[1], [0], [0], [1], [0, 0, 1, 1], [], []>} : vector<16x16xf32>, vector<16x32xf32>, vector<16x32xf32> -> vector<16x32xf32>
    %306 = arith.addf %286, %305 : vector<16x32xf32>
    %cst_103 = arith.constant dense<0.000000e+00> : vector<16x32xf32>
    %307 = tpu.matmul %306, %222, %cst_103 {dimension_numbers = #tpu.dot_dimension_numbers<[1], [0], [0], [1], [0, 0, 1, 1], [], []>} : vector<16x32xf32>, vector<32x32xf32>, vector<16x32xf32> -> vector<16x32xf32>
    %308 = arith.addf %205, %307 : vector<16x32xf32>
    %c0_104 = arith.constant 0 : index
    %c0_105 = arith.constant 0 : index
    %309 = vector.load %arg24[%c0_104, %c0_105] : memref<1x32xf32, #tpu.memory_space<vmem>>, vector<1x32xf32>
    %310 = arith.mulf %308, %308 : vector<16x32xf32>
    %cst_106 = arith.constant dense<0.000000e+00> : vector<16xf32>
    %311 = vector.multi_reduction <add>, %310, %cst_106 [1] : vector<16x32xf32> to vector<16xf32>
    %312 = vector.shape_cast %311 : vector<16xf32> to vector<16x1xf32>
    %cst_107 = arith.constant 3.200000e+01 : f32
    %313 = vector.broadcast %cst_107 : f32 to vector<16x1xf32>
    %314 = arith.divf %312, %313 : vector<16x1xf32>
    %cst_108 = arith.constant 9.99999997E-7 : f32
    %315 = vector.broadcast %cst_108 : f32 to vector<16x1xf32>
    %316 = arith.addf %314, %315 : vector<16x1xf32>
    %317 = math.rsqrt %316 : vector<16x1xf32>
    %318 = vector.broadcast %317 : vector<16x1xf32> to vector<16x32xf32>
    %319 = arith.mulf %308, %318 : vector<16x32xf32>
    %320 = vector.broadcast %309 : vector<1x32xf32> to vector<16x32xf32>
    %321 = arith.mulf %319, %320 : vector<16x32xf32>
    %c0_109 = arith.constant 0 : index
    %c0_110 = arith.constant 0 : index
    %322 = vector.load %arg19[%c0_109, %c0_110] : memref<32x32xf32, #tpu.memory_space<vmem>>, vector<32x32xf32>
    %c0_111 = arith.constant 0 : index
    %c0_112 = arith.constant 0 : index
    %323 = vector.load %arg20[%c0_111, %c0_112] : memref<32x32xf32, #tpu.memory_space<vmem>>, vector<32x32xf32>
    %c0_113 = arith.constant 0 : index
    %c0_114 = arith.constant 0 : index
    %324 = vector.load %arg21[%c0_113, %c0_114] : memref<32x32xf32, #tpu.memory_space<vmem>>, vector<32x32xf32>
    %c0_115 = arith.constant 0 : index
    %c0_116 = arith.constant 0 : index
    %325 = vector.load %arg22[%c0_115, %c0_116] : memref<32x32xf32, #tpu.memory_space<vmem>>, vector<32x32xf32>
    %cst_117 = arith.constant dense<0.000000e+00> : vector<16x32xf32>
    %326 = tpu.matmul %321, %322, %cst_117 {dimension_numbers = #tpu.dot_dimension_numbers<[1], [0], [0], [1], [0, 0, 1, 1], [], []>} : vector<16x32xf32>, vector<32x32xf32>, vector<16x32xf32> -> vector<16x32xf32>
    %cst_118 = arith.constant dense<0.000000e+00> : vector<16x32xf32>
    %327 = tpu.matmul %198, %323, %cst_118 {dimension_numbers = #tpu.dot_dimension_numbers<[1], [0], [0], [1], [0, 0, 1, 1], [], []>} : vector<16x32xf32>, vector<32x32xf32>, vector<16x32xf32> -> vector<16x32xf32>
    %cst_119 = arith.constant dense<0.000000e+00> : vector<16x32xf32>
    %328 = tpu.matmul %198, %324, %cst_119 {dimension_numbers = #tpu.dot_dimension_numbers<[1], [0], [0], [1], [0, 0, 1, 1], [], []>} : vector<16x32xf32>, vector<32x32xf32>, vector<16x32xf32> -> vector<16x32xf32>
    %cst_120 = arith.constant 0.000000e+00 : f32
    %329 = vector.broadcast %cst_120 : f32 to vector<16x32xf32>
    %330 = vector.broadcast %8 : vector<1x32xf32> to vector<16x32xf32>
    %331 = arith.mulf %326, %330 : vector<16x32xf32>
    %332 = vector.broadcast %8 : vector<1x32xf32> to vector<16x32xf32>
    %333 = arith.mulf %327, %332 : vector<16x32xf32>
    %cst_121 = arith.constant dense<0.000000e+00> : vector<16x16xf32>
    %334 = tpu.matmul %331, %333, %cst_121 {dimension_numbers = #tpu.dot_dimension_numbers<[1], [1], [0], [0], [0, 0, 1, 0], [], []>} : vector<16x32xf32>, vector<16x32xf32>, vector<16x16xf32> -> vector<16x16xf32>
    %335 = arith.addf %334, %55 : vector<16x16xf32>
    %cst_122 = arith.constant dense<0xFF800000> : vector<16xf32>
    %336 = vector.multi_reduction <maximumf>, %335, %cst_122 [1] : vector<16x16xf32> to vector<16xf32>
    %337 = vector.shape_cast %336 : vector<16xf32> to vector<16x1xf32>
    %338 = vector.broadcast %337 : vector<16x1xf32> to vector<16x16xf32>
    %339 = arith.subf %335, %338 : vector<16x16xf32>
    %340 = math.exp %339 : vector<16x16xf32>
    %cst_123 = arith.constant dense<0.000000e+00> : vector<16xf32>
    %341 = vector.multi_reduction <add>, %340, %cst_123 [1] : vector<16x16xf32> to vector<16xf32>
    %342 = vector.shape_cast %341 : vector<16xf32> to vector<16x1xf32>
    %343 = tpu.reciprocal %342 {approx = true} : vector<16x1xf32> -> vector<16x1xf32>
    %344 = vector.broadcast %343 : vector<16x1xf32> to vector<16x16xf32>
    %345 = arith.mulf %340, %344 : vector<16x16xf32>
    %346 = vector.broadcast %8 : vector<1x32xf32> to vector<16x32xf32>
    %347 = arith.mulf %328, %346 : vector<16x32xf32>
    %cst_124 = arith.constant dense<0.000000e+00> : vector<16x32xf32>
    %348 = tpu.matmul %345, %347, %cst_124 {dimension_numbers = #tpu.dot_dimension_numbers<[1], [0], [0], [1], [0, 0, 1, 1], [], []>} : vector<16x16xf32>, vector<16x32xf32>, vector<16x32xf32> -> vector<16x32xf32>
    %349 = arith.addf %329, %348 : vector<16x32xf32>
    %350 = vector.broadcast %15 : vector<1x32xf32> to vector<16x32xf32>
    %351 = arith.mulf %326, %350 : vector<16x32xf32>
    %352 = vector.broadcast %15 : vector<1x32xf32> to vector<16x32xf32>
    %353 = arith.mulf %327, %352 : vector<16x32xf32>
    %cst_125 = arith.constant dense<0.000000e+00> : vector<16x16xf32>
    %354 = tpu.matmul %351, %353, %cst_125 {dimension_numbers = #tpu.dot_dimension_numbers<[1], [1], [0], [0], [0, 0, 1, 0], [], []>} : vector<16x32xf32>, vector<16x32xf32>, vector<16x16xf32> -> vector<16x16xf32>
    %355 = arith.addf %354, %55 : vector<16x16xf32>
    %cst_126 = arith.constant dense<0xFF800000> : vector<16xf32>
    %356 = vector.multi_reduction <maximumf>, %355, %cst_126 [1] : vector<16x16xf32> to vector<16xf32>
    %357 = vector.shape_cast %356 : vector<16xf32> to vector<16x1xf32>
    %358 = vector.broadcast %357 : vector<16x1xf32> to vector<16x16xf32>
    %359 = arith.subf %355, %358 : vector<16x16xf32>
    %360 = math.exp %359 : vector<16x16xf32>
    %cst_127 = arith.constant dense<0.000000e+00> : vector<16xf32>
    %361 = vector.multi_reduction <add>, %360, %cst_127 [1] : vector<16x16xf32> to vector<16xf32>
    %362 = vector.shape_cast %361 : vector<16xf32> to vector<16x1xf32>
    %363 = tpu.reciprocal %362 {approx = true} : vector<16x1xf32> -> vector<16x1xf32>
    %364 = vector.broadcast %363 : vector<16x1xf32> to vector<16x16xf32>
    %365 = arith.mulf %360, %364 : vector<16x16xf32>
    %366 = vector.broadcast %15 : vector<1x32xf32> to vector<16x32xf32>
    %367 = arith.mulf %328, %366 : vector<16x32xf32>
    %cst_128 = arith.constant dense<0.000000e+00> : vector<16x32xf32>
    %368 = tpu.matmul %365, %367, %cst_128 {dimension_numbers = #tpu.dot_dimension_numbers<[1], [0], [0], [1], [0, 0, 1, 1], [], []>} : vector<16x16xf32>, vector<16x32xf32>, vector<16x32xf32> -> vector<16x32xf32>
    %369 = arith.addf %349, %368 : vector<16x32xf32>
    %370 = vector.broadcast %22 : vector<1x32xf32> to vector<16x32xf32>
    %371 = arith.mulf %326, %370 : vector<16x32xf32>
    %372 = vector.broadcast %22 : vector<1x32xf32> to vector<16x32xf32>
    %373 = arith.mulf %327, %372 : vector<16x32xf32>
    %cst_129 = arith.constant dense<0.000000e+00> : vector<16x16xf32>
    %374 = tpu.matmul %371, %373, %cst_129 {dimension_numbers = #tpu.dot_dimension_numbers<[1], [1], [0], [0], [0, 0, 1, 0], [], []>} : vector<16x32xf32>, vector<16x32xf32>, vector<16x16xf32> -> vector<16x16xf32>
    %375 = arith.addf %374, %55 : vector<16x16xf32>
    %cst_130 = arith.constant dense<0xFF800000> : vector<16xf32>
    %376 = vector.multi_reduction <maximumf>, %375, %cst_130 [1] : vector<16x16xf32> to vector<16xf32>
    %377 = vector.shape_cast %376 : vector<16xf32> to vector<16x1xf32>
    %378 = vector.broadcast %377 : vector<16x1xf32> to vector<16x16xf32>
    %379 = arith.subf %375, %378 : vector<16x16xf32>
    %380 = math.exp %379 : vector<16x16xf32>
    %cst_131 = arith.constant dense<0.000000e+00> : vector<16xf32>
    %381 = vector.multi_reduction <add>, %380, %cst_131 [1] : vector<16x16xf32> to vector<16xf32>
    %382 = vector.shape_cast %381 : vector<16xf32> to vector<16x1xf32>
    %383 = tpu.reciprocal %382 {approx = true} : vector<16x1xf32> -> vector<16x1xf32>
    %384 = vector.broadcast %383 : vector<16x1xf32> to vector<16x16xf32>
    %385 = arith.mulf %380, %384 : vector<16x16xf32>
    %386 = vector.broadcast %22 : vector<1x32xf32> to vector<16x32xf32>
    %387 = arith.mulf %328, %386 : vector<16x32xf32>
    %cst_132 = arith.constant dense<0.000000e+00> : vector<16x32xf32>
    %388 = tpu.matmul %385, %387, %cst_132 {dimension_numbers = #tpu.dot_dimension_numbers<[1], [0], [0], [1], [0, 0, 1, 1], [], []>} : vector<16x16xf32>, vector<16x32xf32>, vector<16x32xf32> -> vector<16x32xf32>
    %389 = arith.addf %369, %388 : vector<16x32xf32>
    %390 = vector.broadcast %29 : vector<1x32xf32> to vector<16x32xf32>
    %391 = arith.mulf %326, %390 : vector<16x32xf32>
    %392 = vector.broadcast %29 : vector<1x32xf32> to vector<16x32xf32>
    %393 = arith.mulf %327, %392 : vector<16x32xf32>
    %cst_133 = arith.constant dense<0.000000e+00> : vector<16x16xf32>
    %394 = tpu.matmul %391, %393, %cst_133 {dimension_numbers = #tpu.dot_dimension_numbers<[1], [1], [0], [0], [0, 0, 1, 0], [], []>} : vector<16x32xf32>, vector<16x32xf32>, vector<16x16xf32> -> vector<16x16xf32>
    %395 = arith.addf %394, %55 : vector<16x16xf32>
    %cst_134 = arith.constant dense<0xFF800000> : vector<16xf32>
    %396 = vector.multi_reduction <maximumf>, %395, %cst_134 [1] : vector<16x16xf32> to vector<16xf32>
    %397 = vector.shape_cast %396 : vector<16xf32> to vector<16x1xf32>
    %398 = vector.broadcast %397 : vector<16x1xf32> to vector<16x16xf32>
    %399 = arith.subf %395, %398 : vector<16x16xf32>
    %400 = math.exp %399 : vector<16x16xf32>
    %cst_135 = arith.constant dense<0.000000e+00> : vector<16xf32>
    %401 = vector.multi_reduction <add>, %400, %cst_135 [1] : vector<16x16xf32> to vector<16xf32>
    %402 = vector.shape_cast %401 : vector<16xf32> to vector<16x1xf32>
    %403 = tpu.reciprocal %402 {approx = true} : vector<16x1xf32> -> vector<16x1xf32>
    %404 = vector.broadcast %403 : vector<16x1xf32> to vector<16x16xf32>
    %405 = arith.mulf %400, %404 : vector<16x16xf32>
    %406 = vector.broadcast %29 : vector<1x32xf32> to vector<16x32xf32>
    %407 = arith.mulf %328, %406 : vector<16x32xf32>
    %cst_136 = arith.constant dense<0.000000e+00> : vector<16x32xf32>
    %408 = tpu.matmul %405, %407, %cst_136 {dimension_numbers = #tpu.dot_dimension_numbers<[1], [0], [0], [1], [0, 0, 1, 1], [], []>} : vector<16x16xf32>, vector<16x32xf32>, vector<16x32xf32> -> vector<16x32xf32>
    %409 = arith.addf %389, %408 : vector<16x32xf32>
    %cst_137 = arith.constant dense<0.000000e+00> : vector<16x32xf32>
    %410 = tpu.matmul %409, %325, %cst_137 {dimension_numbers = #tpu.dot_dimension_numbers<[1], [0], [0], [1], [0, 0, 1, 1], [], []>} : vector<16x32xf32>, vector<32x32xf32>, vector<16x32xf32> -> vector<16x32xf32>
    %411 = arith.addf %308, %410 : vector<16x32xf32>
    %c0_138 = arith.constant 0 : index
    %c0_139 = arith.constant 0 : index
    %412 = vector.load %arg25[%c0_138, %c0_139] : memref<1x32xf32, #tpu.memory_space<vmem>>, vector<1x32xf32>
    %413 = arith.mulf %411, %411 : vector<16x32xf32>
    %cst_140 = arith.constant dense<0.000000e+00> : vector<16xf32>
    %414 = vector.multi_reduction <add>, %413, %cst_140 [1] : vector<16x32xf32> to vector<16xf32>
    %415 = vector.shape_cast %414 : vector<16xf32> to vector<16x1xf32>
    %cst_141 = arith.constant 3.200000e+01 : f32
    %416 = vector.broadcast %cst_141 : f32 to vector<16x1xf32>
    %417 = arith.divf %415, %416 : vector<16x1xf32>
    %cst_142 = arith.constant 9.99999997E-7 : f32
    %418 = vector.broadcast %cst_142 : f32 to vector<16x1xf32>
    %419 = arith.addf %417, %418 : vector<16x1xf32>
    %420 = math.rsqrt %419 : vector<16x1xf32>
    %421 = vector.broadcast %420 : vector<16x1xf32> to vector<16x32xf32>
    %422 = arith.mulf %411, %421 : vector<16x32xf32>
    %423 = vector.broadcast %412 : vector<1x32xf32> to vector<16x32xf32>
    %424 = arith.mulf %422, %423 : vector<16x32xf32>
    %c0_143 = arith.constant 0 : index
    %c0_144 = arith.constant 0 : index
    %425 = vector.load %arg27[%c0_143, %c0_144] : memref<32x64xf32, #tpu.memory_space<vmem>>, vector<32x64xf32>
    %c0_145 = arith.constant 0 : index
    %c0_146 = arith.constant 0 : index
    %426 = vector.load %arg28[%c0_145, %c0_146] : memref<64x32xf32, #tpu.memory_space<vmem>>, vector<64x32xf32>
    %cst_147 = arith.constant dense<0.000000e+00> : vector<16x64xf32>
    %427 = tpu.matmul %424, %425, %cst_147 {dimension_numbers = #tpu.dot_dimension_numbers<[1], [0], [0], [1], [0, 0, 1, 1], [], []>} : vector<16x32xf32>, vector<32x64xf32>, vector<16x64xf32> -> vector<16x64xf32>
    %cst_148 = arith.constant 0.000000e+00 : f32
    %428 = vector.broadcast %cst_148 : f32 to vector<16x64xf32>
    %429 = arith.maximumf %427, %428 : vector<16x64xf32>
    %cst_149 = arith.constant dense<0.000000e+00> : vector<16x32xf32>
    %430 = tpu.matmul %429, %426, %cst_149 {dimension_numbers = #tpu.dot_dimension_numbers<[1], [0], [0], [1], [0, 0, 1, 1], [], []>} : vector<16x64xf32>, vector<64x32xf32>, vector<16x32xf32> -> vector<16x32xf32>
    %431 = arith.addf %411, %430 : vector<16x32xf32>
    %c0_150 = arith.constant 0 : index
    %c0_151 = arith.constant 0 : index
    %432 = vector.load %arg26[%c0_150, %c0_151] : memref<1x32xf32, #tpu.memory_space<vmem>>, vector<1x32xf32>
    %433 = arith.mulf %431, %431 : vector<16x32xf32>
    %cst_152 = arith.constant dense<0.000000e+00> : vector<16xf32>
    %434 = vector.multi_reduction <add>, %433, %cst_152 [1] : vector<16x32xf32> to vector<16xf32>
    %435 = vector.shape_cast %434 : vector<16xf32> to vector<16x1xf32>
    %cst_153 = arith.constant 3.200000e+01 : f32
    %436 = vector.broadcast %cst_153 : f32 to vector<16x1xf32>
    %437 = arith.divf %435, %436 : vector<16x1xf32>
    %cst_154 = arith.constant 9.99999997E-7 : f32
    %438 = vector.broadcast %cst_154 : f32 to vector<16x1xf32>
    %439 = arith.addf %437, %438 : vector<16x1xf32>
    %440 = math.rsqrt %439 : vector<16x1xf32>
    %441 = vector.broadcast %440 : vector<16x1xf32> to vector<16x32xf32>
    %442 = arith.mulf %431, %441 : vector<16x32xf32>
    %443 = vector.broadcast %432 : vector<1x32xf32> to vector<16x32xf32>
    %444 = arith.mulf %442, %443 : vector<16x32xf32>
    %cst_155 = arith.constant 0.176776692 : f32
    %445 = vector.broadcast %cst_155 : f32 to vector<16x32xf32>
    %446 = arith.mulf %444, %445 : vector<16x32xf32>
    %cst_156 = arith.constant dense<0.000000e+00> : vector<16x128xf32>
    %447 = tpu.matmul %446, %0, %cst_156 {dimension_numbers = #tpu.dot_dimension_numbers<[1], [1], [0], [0], [0, 0, 1, 0], [], []>} : vector<16x32xf32>, vector<128x32xf32>, vector<16x128xf32> -> vector<16x128xf32>
    %c0_157 = arith.constant 0 : index
    %c0_158 = arith.constant 0 : index
    %448 = vector.load %arg29[%c0_157, %c0_158] : memref<16x128xf32, #tpu.memory_space<vmem>>, vector<16x128xf32>
    tpu.vector_store %arg29[%c0_157, %c0_158], %447 {strides = array<i32>} : memref<16x128xf32, #tpu.memory_space<vmem>>, vector<16x128xf32>,
    %c0_159 = arith.constant 0 : index
    %c0_160 = arith.constant 0 : index
    %449 = vector.load %arg3[%c0_159, %c0_160] : memref<16x1xi32, #tpu.memory_space<vmem>>, vector<16x1xi32>
    %cst_161 = arith.constant dense<0xFF800000> : vector<16xf32>
    %450 = vector.multi_reduction <maximumf>, %447, %cst_161 [1] : vector<16x128xf32> to vector<16xf32>
    %451 = vector.shape_cast %450 : vector<16xf32> to vector<16x1xf32>
    %452 = vector.broadcast %451 : vector<16x1xf32> to vector<16x128xf32>
    %453 = arith.subf %447, %452 : vector<16x128xf32>
    %454 = math.exp %453 : vector<16x128xf32>
    %cst_162 = arith.constant dense<0.000000e+00> : vector<16xf32>
    %455 = vector.multi_reduction <add>, %454, %cst_162 [1] : vector<16x128xf32> to vector<16xf32>
    %456 = vector.shape_cast %455 : vector<16xf32> to vector<16x1xf32>
    %457 = math.log %456 : vector<16x1xf32>
    %458 = arith.addf %451, %457 : vector<16x1xf32>
    %459 = tpu.iota {dimensions = array<i32: 1>} : vector<16x128xi32>
    %460 = vector.broadcast %449 : vector<16x1xi32> to vector<16x128xi32>
    %461 = arith.cmpi eq, %459, %460 : vector<16x128xi32>
    %cst_163 = arith.constant 0.000000e+00 : f32
    %462 = vector.broadcast %cst_163 : f32 to vector<16x128xf32>
    %463 = arith.select %461, %447, %462 : vector<16x128xi1>, vector<16x128xf32>
    %cst_164 = arith.constant dense<0.000000e+00> : vector<16xf32>
    %464 = vector.multi_reduction <add>, %463, %cst_164 [1] : vector<16x128xf32> to vector<16xf32>
    %465 = vector.shape_cast %464 : vector<16xf32> to vector<16x1xf32>
    %c-100_i32 = arith.constant -100 : i32
    %466 = vector.broadcast %c-100_i32 : i32 to vector<16x1xi32>
    %467 = arith.cmpi ne, %449, %466 : vector<16x1xi32>
    %468 = arith.extui %467 : vector<16x1xi1> to vector<16x1xi32>
    %469 = arith.sitofp %468 : vector<16x1xi32> to vector<16x1xf32>
    %470 = arith.subf %458, %465 : vector<16x1xf32>
    %471 = arith.mulf %470, %469 : vector<16x1xf32>
    %cst_165 = arith.constant dense<0.000000e+00> : vector<1xf32>
    %472 = vector.multi_reduction <add>, %471, %cst_165 [0] : vector<16x1xf32> to vector<1xf32>
    %473 = vector.shape_cast %472 : vector<1xf32> to vector<1x1xf32>
    %cst_166 = arith.constant dense<0.000000e+00> : vector<1xf32>
    %474 = vector.multi_reduction <add>, %469, %cst_166 [0] : vector<16x1xf32> to vector<1xf32>
    %475 = vector.shape_cast %474 : vector<1xf32> to vector<1x1xf32>
    %cst_167 = arith.constant 1.000000e+00 : f32
    %476 = vector.broadcast %cst_167 : f32 to vector<1x1xf32>
    %477 = arith.maximumf %475, %476 : vector<1x1xf32>
    %478 = arith.divf %473, %477 : vector<1x1xf32>
    %c0_168 = arith.constant 0 : index
    %c0_169 = arith.constant 0 : index
    %479 = vector.load %arg30[%c0_168, %c0_169] : memref<1x1xf32, #tpu.memory_space<vmem>>, vector<1x1xf32>
    tpu.vector_store %arg30[%c0_168, %c0_169], %478 {strides = array<i32>} : memref<1x1xf32, #tpu.memory_space<vmem>>, vector<1x1xf32>,
    return
  }
  func.func @transform_0(%arg0: i32) -> (i32, i32) {
    %c0_i32 = arith.constant 0 : i32
    %c0_i32_0 = arith.constant 0 : i32
    %c0_i32_1 = arith.constant 0 : i32
    return %c0_i32, %c0_i32_0 : i32, i32
  }
  func.func @transform_1(%arg0: i32) -> (i32, i32) {
    %c0_i32 = arith.constant 0 : i32
    %c0_i32_0 = arith.constant 0 : i32
    %c0_i32_1 = arith.constant 0 : i32
    return %c0_i32, %c0_i32_0 : i32, i32
  }
  func.func @transform_2(%arg0: i32) -> (i32, i32) {
    %c0_i32 = arith.constant 0 : i32
    %c0_i32_0 = arith.constant 0 : i32
    %c0_i32_1 = arith.constant 0 : i32
    return %c0_i32, %c0_i32_0 : i32, i32
  }
  func.func @transform_3(%arg0: i32) -> (i32, i32) {
    %c0_i32 = arith.constant 0 : i32
    %c0_i32_0 = arith.constant 0 : i32
    %c0_i32_1 = arith.constant 0 : i32
    return %c0_i32, %c0_i32_0 : i32, i32
  }
  func.func @transform_4(%arg0: i32) -> (i32, i32) {
    %c0_i32 = arith.constant 0 : i32
    %c0_i32_0 = arith.constant 0 : i32
    %c0_i32_1 = arith.constant 0 : i32
    return %c0_i32, %c0_i32_0 : i32, i32
  }
  func.func @transform_5(%arg0: i32) -> (i32, i32) {
    %c0_i32 = arith.constant 0 : i32
    %c0_i32_0 = arith.constant 0 : i32
    %c0_i32_1 = arith.constant 0 : i32
    return %c0_i32, %c0_i32_0 : i32, i32
  }
  func.func @transform_6(%arg0: i32) -> (i32, i32) {
    %c0_i32 = arith.constant 0 : i32
    %c0_i32_0 = arith.constant 0 : i32
    %c0_i32_1 = arith.constant 0 : i32
    return %c0_i32, %c0_i32_0 : i32, i32
  }
  func.func @transform_7(%arg0: i32) -> (i32, i32) {
    %c0_i32 = arith.constant 0 : i32
    %c0_i32_0 = arith.constant 0 : i32
    %c0_i32_1 = arith.constant 0 : i32
    return %c0_i32, %c0_i32_0 : i32, i32
  }
  func.func @transform_8(%arg0: i32) -> (i32, i32) {
    %c0_i32 = arith.constant 0 : i32
    %c0_i32_0 = arith.constant 0 : i32
    %c0_i32_1 = arith.constant 0 : i32
    return %c0_i32, %c0_i32_0 : i32, i32
  }
  func.func @transform_9(%arg0: i32) -> (i32, i32) {
    %c0_i32 = arith.constant 0 : i32
    %c0_i32_0 = arith.constant 0 : i32
    %c0_i32_1 = arith.constant 0 : i32
    return %c0_i32, %c0_i32_0 : i32, i32
  }
  func.func @transform_10(%arg0: i32) -> (i32, i32) {
    %c0_i32 = arith.constant 0 : i32
    %c0_i32_0 = arith.constant 0 : i32
    %c0_i32_1 = arith.constant 0 : i32
    return %c0_i32, %c0_i32_0 : i32, i32
  }
  func.func @transform_11(%arg0: i32) -> (i32, i32) {
    %c0_i32 = arith.constant 0 : i32
    %c0_i32_0 = arith.constant 0 : i32
    %c0_i32_1 = arith.constant 0 : i32
    return %c0_i32, %c0_i32_0 : i32, i32
  }
  func.func @transform_12(%arg0: i32) -> (i32, i32) {
    %c0_i32 = arith.constant 0 : i32
    %c0_i32_0 = arith.constant 0 : i32
    %c0_i32_1 = arith.constant 0 : i32
    return %c0_i32, %c0_i32_0 : i32, i32
  }
  func.func @transform_13(%arg0: i32) -> (i32, i32) {
    %c0_i32 = arith.constant 0 : i32
    %c0_i32_0 = arith.constant 0 : i32
    %c0_i32_1 = arith.constant 0 : i32
    return %c0_i32, %c0_i32_0 : i32, i32
  }
  func.func @transform_14(%arg0: i32) -> (i32, i32) {
    %c0_i32 = arith.constant 0 : i32
    %c0_i32_0 = arith.constant 0 : i32
    %c0_i32_1 = arith.constant 0 : i32
    return %c0_i32, %c0_i32_0 : i32, i32
  }
  func.func @transform_15(%arg0: i32) -> (i32, i32) {
    %c0_i32 = arith.constant 0 : i32
    %c0_i32_0 = arith.constant 0 : i32
    %c0_i32_1 = arith.constant 0 : i32
    return %c0_i32, %c0_i32_0 : i32, i32
  }
  func.func @transform_16(%arg0: i32) -> (i32, i32) {
    %c0_i32 = arith.constant 0 : i32
    %c0_i32_0 = arith.constant 0 : i32
    %c0_i32_1 = arith.constant 0 : i32
    return %c0_i32, %c0_i32_0 : i32, i32
  }
  func.func @transform_17(%arg0: i32) -> (i32, i32) {
    %c0_i32 = arith.constant 0 : i32
    %c0_i32_0 = arith.constant 0 : i32
    %c0_i32_1 = arith.constant 0 : i32
    return %c0_i32, %c0_i32_0 : i32, i32
  }
  func.func @transform_18(%arg0: i32) -> (i32, i32) {
    %c0_i32 = arith.constant 0 : i32
    %c0_i32_0 = arith.constant 0 : i32
    %c0_i32_1 = arith.constant 0 : i32
    return %c0_i32, %c0_i32_0 : i32, i32
  }
  func.func @transform_19(%arg0: i32) -> (i32, i32) {
    %c0_i32 = arith.constant 0 : i32
    %c0_i32_0 = arith.constant 0 : i32
    %c0_i32_1 = arith.constant 0 : i32
    return %c0_i32, %c0_i32_0 : i32, i32
  }
  func.func @transform_20(%arg0: i32) -> (i32, i32) {
    %c0_i32 = arith.constant 0 : i32
    %c0_i32_0 = arith.constant 0 : i32
    %c0_i32_1 = arith.constant 0 : i32
    return %c0_i32, %c0_i32_0 : i32, i32
  }
  func.func @transform_21(%arg0: i32) -> (i32, i32) {
    %c0_i32 = arith.constant 0 : i32
    %c0_i32_0 = arith.constant 0 : i32
    %c0_i32_1 = arith.constant 0 : i32
    return %c0_i32, %c0_i32_0 : i32, i32
  }
  func.func @transform_22(%arg0: i32) -> (i32, i32) {
    %c0_i32 = arith.constant 0 : i32
    %c0_i32_0 = arith.constant 0 : i32
    %c0_i32_1 = arith.constant 0 : i32
    return %c0_i32, %c0_i32_0 : i32, i32
  }
  func.func @transform_23(%arg0: i32) -> (i32, i32) {
    %c0_i32 = arith.constant 0 : i32
    %c0_i32_0 = arith.constant 0 : i32
    %c0_i32_1 = arith.constant 0 : i32
    return %c0_i32, %c0_i32_0 : i32, i32
  }
  func.func @transform_24(%arg0: i32) -> (i32, i32) {
    %c0_i32 = arith.constant 0 : i32
    %c0_i32_0 = arith.constant 0 : i32
    %c0_i32_1 = arith.constant 0 : i32
    return %c0_i32, %c0_i32_0 : i32, i32
  }
  func.func @transform_25(%arg0: i32) -> (i32, i32) {
    %c0_i32 = arith.constant 0 : i32
    %c0_i32_0 = arith.constant 0 : i32
    %c0_i32_1 = arith.constant 0 : i32
    return %c0_i32, %c0_i32_0 : i32, i32
  }
  func.func @transform_26(%arg0: i32) -> (i32, i32) {
    %c0_i32 = arith.constant 0 : i32
    %c0_i32_0 = arith.constant 0 : i32
    %c0_i32_1 = arith.constant 0 : i32
    return %c0_i32, %c0_i32_0 : i32, i32
  }
  func.func @transform_27(%arg0: i32) -> (i32, i32) {
    %c0_i32 = arith.constant 0 : i32
    %c0_i32_0 = arith.constant 0 : i32
    %c0_i32_1 = arith.constant 0 : i32
    return %c0_i32, %c0_i32_0 : i32, i32
  }
  func.func @transform_28(%arg0: i32) -> (i32, i32) {
    %c0_i32 = arith.constant 0 : i32
    %c0_i32_0 = arith.constant 0 : i32
    %c0_i32_1 = arith.constant 0 : i32
    return %c0_i32, %c0_i32_0 : i32, i32
  }
  func.func @transform_29(%arg0: i32) -> (i32, i32) {
    %c0_i32 = arith.constant 0 : i32
    %c0_i32_0 = arith.constant 0 : i32
    %c0_i32_1 = arith.constant 0 : i32
    return %c0_i32, %c0_i32_0 : i32, i32
  }
}

</mosaic_0001>

<bundles_post_ra>
// kernel: filling_model_forward.1
= control target key start
LH: loop header
LB: loop body
LE: loop exit
PB: predicated region body
PF: predicated region fallthrough
CT: control target
= control target key end

     0   :  { %s6163_s6 = smov 1   ;;  %s6164_s10 = smov 2   ;;  %s7162_s0 = inlined_call_operand.smem [shape: u32[30], index: -1, kind: input, shape index: {}] }
   0x1   :  { %s6223_s5 = sld [smem:[%s7162_s0]]   ;;  %s6165_s14 = smov 3  }
   0x2   :  { %s6228_s9 = sld [smem:[%s7162_s0 + %s6163_s6]]   ;;  %s6166_s18 = smov 4  }
   0x3   :  { %s6233_s13 = sld [smem:[%s7162_s0 + %s6164_s10]]   ;;  %s6167_s22 = smov 5  }
   0x4   :  { %s6238_s17 = sld [smem:[%s7162_s0 + %s6165_s14]]   ;;  %s6168_s26 = smov 6  }
   0x5   :  { %s6243_s21 = sld [smem:[%s7162_s0 + %s6166_s18]]   ;;  %s6169_s30 = smov 7  }
   0x6   :  { %s6248_s25 = sld [smem:[%s7162_s0 + %s6167_s22]]   ;;  %s6170_s4 = smov 8  }
   0x7   :  { %7166 = sst [smem:[#allocation39_spill]] %s6223_s5  ;;  %s6171_s10 = smov 9  }
   0x8   :  { %7167 = sst [smem:[#allocation40_spill]] %s6228_s9  ;;  %s6172_s15 = smov 10  }
   0x9   :  { %7168 = sst [smem:[#allocation41_spill]] %s6233_s13  ;;  %s6173_s20 = smov 11  }
   0xa   :  { %7169 = sst [smem:[#allocation42_spill]] %s6238_s17  ;;  %s6175_s1 = smov 13  }
   0xb   :  { %s6253_s29 = sld [smem:[%s7162_s0 + %s6168_s26]]   ;;  %s6174_s26 = smov 12  }
   0xc   :  { %s6258_s3 = sld [smem:[%s7162_s0 + %s6169_s30]]   ;;  %s6176_s7 = smov 14  }
   0xd   :  { %s6263_s8 = sld [smem:[%s7162_s0 + %s6170_s4]]   ;;  %s6178_s22 = smov 16  }
   0xe   :  { %s6268_s14 = sld [smem:[%s7162_s0 + %s6171_s10]]   ;;  %s6179_s28 = smov 17  }
   0xf   :  { %s6273_s19 = sld [smem:[%s7162_s0 + %s6172_s15]]   ;;  %s6177_s15 = smov 15  }
  0x10   :  { %s6278_s24 = sld [smem:[%s7162_s0 + %s6173_s20]]  }
  0x11   :  { %s6283_s30 = sld [smem:[%s7162_s0 + %s6174_s26]]  }
  0x12   :  { %s6288_s6 = sld [smem:[%s7162_s0 + %s6175_s1]]  }
  0x13   :  { %s6293_s12 = sld [smem:[%s7162_s0 + %s6176_s7]]   ;;  %s6180_s7 = smov 18  }
  0x14   :  { %7170 = sst [smem:[#allocation43_spill]] %s6268_s14 }
  0x15   :  { %7171 = sst [smem:[#allocation44_spill]] %s6273_s19 }
  0x16   :  { %7172 = sst [smem:[#allocation45_spill]] %s6278_s24 }
  0x17   :  { %s6298_s20 = sld [smem:[%s7162_s0 + %s6177_s15]]   ;;  %s6181_s15 = smov 19  }
  0x18   :  { %s6303_s27 = sld [smem:[%s7162_s0 + %s6178_s22]]   ;;  %s6182_s22 = smov 20  }
  0x19   :  { %s6308_s4 = sld [smem:[%s7162_s0 + %s6179_s28]]   ;;  %s6183_s28 = smov 21  }
  0x1a   :  { %s6313_s13 = sld [smem:[%s7162_s0 + %s6180_s7]]   ;;  %s6184_s7 = smov 22  }
  0x1b   :  { %s6318_s24 = sld [smem:[%s7162_s0 + %s6181_s15]]   ;;  %s6185_s15 = smov 23  }
  0x1c   :  { %s6323_s19 = sld [smem:[%s7162_s0 + %s6182_s22]]   ;;  %s6186_s22 = smov 24  }
  0x1d   :  { %s6328_s9 = sld [smem:[%s7162_s0 + %s6183_s28]]   ;;  %s6187_s28 = smov 25  }
  0x1e   :  { %s6333_s17 = sld [smem:[%s7162_s0 + %s6184_s7]]   ;;  %s6188_s7 = smov 26  }
  0x1f   :  { %s6338_s14 = sld [smem:[%s7162_s0 + %s6185_s15]]   ;;  %s6189_s15 = smov 27  }
  0x20   :  { %s6343_s5 = sld [smem:[%s7162_s0 + %s6186_s22]]   ;;  %s6190_s22 = smov 28  }
  0x23   :  { %7173 = sst [smem:[#allocation46_spill]] %s6328_s9 }
  0x24   :  { %7174 = sst [smem:[#allocation47_spill]] %s6333_s17 }
  0x25   :  { %7175 = sst [smem:[#allocation48_spill]] %s6338_s14 }
  0x26   :  { %7176 = sst [smem:[#allocation49_spill]] %s6343_s5 }
  0x27   :  { %s6348_s9 = sld [smem:[%s7162_s0 + %s6187_s28]]   ;;  %s6191_s28 = smov 29  }
  0x28   :  { %s6353_s17 = sld [smem:[%s7162_s0 + %s6188_s7]]  }
  0x29   :  { %s6358_s14 = sld [smem:[%s7162_s0 + %s6189_s15]]  }
  0x2a   :  { %s6363_s5 = sld [smem:[%s7162_s0 + %s6190_s22]]  }
  0x2d   :  { %7177 = sst [smem:[#allocation50_spill]] %s6348_s9 }
  0x2e   :  { %s6368_s9 = sld [smem:[%s7162_s0 + %s6191_s28]]  }
  0x2f   :  { %65 = vsyncpa [#allocation3], 0 }
  0x30   :  { %66 = vsyncpa [#allocation6], 0 }
  0x31   :  { %67 = vsyncpa [#allocation9], 0 }
  0x32   :  { %68 = vsyncpa [#allocation12], 0 }
  0x33   :  { %69 = vsyncpa [#allocation15], 0 }
  0x34   :  { %70 = vsyncpa [#allocation18], 0 }
  0x35   :  { %71 = vsyncpa [#allocation21], 0 }
  0x36   :  { %72 = vsyncpa [#allocation24], 0 }
  0x37   :  { %73 = vsyncpa [#allocation4], 0 }
  0x38   :  { %74 = vsyncpa [#allocation28], 0  ;;  %s6192_s7 = smov [#allocation5]   ;;  %s6193_s11 = smov [#allocation8]  }
  0x39   :  { %s100_s10 = sshll.u32 %s6192_s7, 4  ;;  %s124_s15 = sshll.u32 %s6193_s11, 4  ;;  %s101_s10 = int_to_ptr.vmem [resolvable:$true] %s100_s10  ;;  %s125_s15 = int_to_ptr.vmem [resolvable:$true] %s124_s15 }
  0x3a   :  { %s5811_s16 = scalar_lea.vmem %s101_s10, 512  ;;  %p5816_p1 = scmp.lt.s32.totalorder %s101_s10, %s101_s10 }
  0x3b   :  { %p5812_p0 = scmp.ne.s32.totalorder %s101_s10, %s5811_s16  ;;  %p5817_p2 = scmp.lt.s32.totalorder %s5811_s16, %s5811_s16 }
  0x3d   :  { %p5818_p3 = por %p5817_p2, %p5816_p1 }
  0x3f   :  { %p5819_p4 = pnand %p5818_p3, %p5812_p0 }
  0x41   :  { %5822 = shalt.err (!%p5819_p4)
}
  0x42   :  { %s6194_s0 = smov 128   ;;  %s6195_s18 = smov 8  }
  0x43   :  { %106 = dma.hbm_to_vmem [thread:$0]  %s6248_s25, 512, %s101_s10, [#allocation6], %s6194_s0, %s6194_s0, %s6195_s18  }
  0x44   :  { %s5831_s22 = scalar_lea.vmem %s125_s15, 512  ;;  %p5836_p6 = scmp.lt.s32.totalorder %s125_s15, %s125_s15 }
  0x45   :  { %p5832_p5 = scmp.ne.s32.totalorder %s125_s15, %s5831_s22  ;;  %p5837_p7 = scmp.lt.s32.totalorder %s5831_s22, %s5831_s22 }
  0x47   :  { %p5838_p8 = por %p5837_p7, %p5836_p6 }
  0x49   :  { %p5839_p9 = pnand %p5838_p8, %p5832_p5 }
  0x4b   :  { %5842 = shalt.err (!%p5839_p9)
}
  0x4c   :  { %130 = dma.hbm_to_vmem [thread:$0]  %s6258_s3, 512, %s125_s15, [#allocation9], %s6194_s0, %s6194_s0, %s6195_s18  }
  0x4d   :  { %s6196_s23 = smov [#allocation11]   ;;  %s6197_s28 = smov [#allocation14]  }
  0x4e   :  { %s154_s26 = sshll.u32 %s6196_s23, 4  ;;  %s178_s1 = sshll.u32 %s6197_s28, 4  ;;  %s155_s26 = int_to_ptr.vmem [resolvable:$true] %s154_s26  ;;  %s179_s1 = int_to_ptr.vmem [resolvable:$true] %s178_s1 }
  0x4f   :  { %s5851_s2 = scalar_lea.vmem %s155_s26, 512  ;;  %p5856_p11 = scmp.lt.s32.totalorder %s155_s26, %s155_s26 }
  0x50   :  { %p5852_p10 = scmp.ne.s32.totalorder %s155_s26, %s5851_s2  ;;  %p5857_p12 = scmp.lt.s32.totalorder %s5851_s2, %s5851_s2 }
  0x52   :  { %p5858_p13 = por %p5857_p12, %p5856_p11 }
  0x54   :  { %p5859_p0 = pnand %p5858_p13, %p5852_p10 }
  0x56   :  { %5862 = shalt.err (!%p5859_p0)
}
  0x57   :  { %160 = dma.hbm_to_vmem [thread:$0]  %s6283_s30, 512, %s155_s26, [#allocation12], %s6194_s0, %s6194_s0, %s6195_s18  }
  0x58   :  { %s5871_s25 = scalar_lea.vmem %s179_s1, 512  ;;  %p5876_p2 = scmp.lt.s32.totalorder %s179_s1, %s179_s1 }
  0x59   :  { %p5872_p1 = scmp.ne.s32.totalorder %s179_s1, %s5871_s25  ;;  %p5877_p3 = scmp.lt.s32.totalorder %s5871_s25, %s5871_s25 }
  0x5b   :  { %p5878_p4 = por %p5877_p3, %p5876_p2 }
  0x5d   :  { %p5879_p5 = pnand %p5878_p4, %p5872_p1 }
  0x5f   :  { %5882 = shalt.err (!%p5879_p5)
}
  0x60   :  { %184 = dma.hbm_to_vmem [thread:$0]  %s6293_s12, 512, %s179_s1, [#allocation15], %s6194_s0, %s6194_s0, %s6195_s18  }
  0x61   :  { %s6198_s3 = smov [#allocation17]   ;;  %s6199_s10 = smov [#allocation20]  }
  0x62   :  { %s202_s7 = sshll.u32 %s6198_s3, 4  ;;  %s226_s11 = sshll.u32 %s6199_s10, 4  ;;  %s203_s7 = int_to_ptr.vmem [resolvable:$true] %s202_s7  ;;  %s227_s11 = int_to_ptr.vmem [resolvable:$true] %s226_s11 }
  0x63   :  { %s5891_s15 = scalar_lea.vmem %s203_s7, 512  ;;  %p5896_p7 = scmp.lt.s32.totalorder %s203_s7, %s203_s7 }
  0x64   :  { %p5892_p6 = scmp.ne.s32.totalorder %s203_s7, %s5891_s15  ;;  %p5897_p8 = scmp.lt.s32.totalorder %s5891_s15, %s5891_s15 }
  0x66   :  { %p5898_p9 = por %p5897_p8, %p5896_p7 }
  0x68   :  { %p5899_p10 = pnand %p5898_p9, %p5892_p6 }
  0x6a   :  { %5902 = shalt.err (!%p5899_p10)
}
  0x6b   :  { %208 = dma.hbm_to_vmem [thread:$0]  %s6303_s27, 512, %s203_s7, [#allocation18], %s6194_s0, %s6194_s0, %s6195_s18  }
  0x6c   :  { %s5911_s30 = scalar_lea.vmem %s227_s11, 512  ;;  %p5916_p12 = scmp.lt.s32.totalorder %s227_s11, %s227_s11 }
  0x6d   :  { %p5912_p11 = scmp.ne.s32.totalorder %s227_s11, %s5911_s30  ;;  %p5917_p13 = scmp.lt.s32.totalorder %s5911_s30, %s5911_s30 }
  0x6f   :  { %p5918_p0 = por %p5917_p13, %p5916_p12 }
  0x71   :  { %p5919_p1 = pnand %p5918_p0, %p5912_p11 }
  0x73   :  { %5922 = shalt.err (!%p5919_p1)
}
  0x74   :  { %232 = dma.hbm_to_vmem [thread:$0]  %s6313_s13, 512, %s227_s11, [#allocation21], %s6194_s0, %s6194_s0, %s6195_s18  }
  0x75   :  { %s6200_s12 = smov [#allocation23]   ;;  %s6201_s22 = smov [#allocation2]  }
  0x76   :  { %s250_s16 = sshll.u32 %s6200_s12, 4  ;;  %s88_s23 = sshll.u32 %s6201_s22, 4  ;;  %s251_s16 = int_to_ptr.vmem [resolvable:$true] %s250_s16  ;;  %s89_s23 = int_to_ptr.vmem [resolvable:$true] %s88_s23 }
  0x77   :  { %s5931_s26 = scalar_lea.vmem %s251_s16, 512  ;;  %p5936_p3 = scmp.lt.s32.totalorder %s251_s16, %s251_s16 }
  0x78   :  { %p5932_p2 = scmp.ne.s32.totalorder %s251_s16, %s5931_s26  ;;  %p5937_p4 = scmp.lt.s32.totalorder %s5931_s26, %s5931_s26 }
  0x7a   :  { %p5938_p5 = por %p5937_p4, %p5936_p3 }
  0x7c   :  { %p5939_p6 = pnand %p5938_p5, %p5932_p2 }
  0x7e   :  { %5942 = shalt.err (!%p5939_p6)
}
  0x7f   :  { %256 = dma.hbm_to_vmem [thread:$0]  %s6323_s19, 512, %s251_s16, [#allocation24], %s6194_s0, %s6194_s0, %s6195_s18  }
  0x80   :  { %s5951_s27 = scalar_lea.vmem %s89_s23, 2048  ;;  %p5956_p8 = scmp.lt.s32.totalorder %s89_s23, %s89_s23 }
  0x81   :  { %p5952_p7 = scmp.ne.s32.totalorder %s89_s23, %s5951_s27  ;;  %p5957_p9 = scmp.lt.s32.totalorder %s5951_s27, %s5951_s27 }
  0x83   :  { %p5958_p10 = por %p5957_p9, %p5956_p8 }
  0x85   :  { %p5959_p11 = pnand %p5958_p10, %p5952_p7 }
  0x87   :  { %5962 = shalt.err (!%p5959_p11)
}
  0x88   :  { %94 = dma.hbm_to_vmem [thread:$0]  %s6243_s21, 2048, %s89_s23, [#allocation3], %s6194_s0, %s6194_s0, %s6195_s18  }
  0x89   :  { %s6202_s13 = smov [#allocation7]   ;;  %s6203_s1 = smov [#allocation10]  }
  0x8a   :  { %s112_s28 = sshll.u32 %s6202_s13, 4  ;;  %s136_s2 = sshll.u32 %s6203_s1, 4  ;;  %s113_s28 = int_to_ptr.vmem [resolvable:$true] %s112_s28  ;;  %s137_s2 = int_to_ptr.vmem [resolvable:$true] %s136_s2 }
  0x8b   :  { %s5971_s25 = scalar_lea.vmem %s113_s28, 512  ;;  %p5976_p13 = scmp.lt.s32.totalorder %s113_s28, %s113_s28 }
  0x8c   :  { %p5972_p12 = scmp.ne.s32.totalorder %s113_s28, %s5971_s25  ;;  %p5977_p0 = scmp.lt.s32.totalorder %s5971_s25, %s5971_s25 }
  0x8e   :  { %p5978_p1 = por %p5977_p0, %p5976_p13 }
  0x90   :  { %p5979_p2 = pnand %p5978_p1, %p5972_p12 }
  0x92   :  { %5982 = shalt.err (!%p5979_p2)
}
  0x93   :  { %118 = dma.hbm_to_vmem [thread:$0]  %s6253_s29, 512, %s113_s28, [#allocation6], %s6194_s0, %s6194_s0, %s6195_s18  }
  0x94   :  { %s5991_s19 = scalar_lea.vmem %s137_s2, 512  ;;  %p5996_p4 = scmp.lt.s32.totalorder %s137_s2, %s137_s2 }
  0x95   :  { %p5992_p3 = scmp.ne.s32.totalorder %s137_s2, %s5991_s19  ;;  %p5997_p5 = scmp.lt.s32.totalorder %s5991_s19, %s5991_s19 }
  0x97   :  { %p5998_p6 = por %p5997_p5, %p5996_p4 }
  0x99   :  { %p5999_p7 = pnand %p5998_p6, %p5992_p3 }
  0x9b   :  { %6002 = shalt.err (!%p5999_p7)
}
  0x9c   :  { %142 = dma.hbm_to_vmem [thread:$0]  %s6263_s8, 512, %s137_s2, [#allocation9], %s6194_s0, %s6194_s0, %s6195_s18  }
  0x9d   :  { %s6204_s21 = smov [#allocation13]   ;;  %s6205_s7 = smov [#allocation16]  }
  0x9e   :  { %s166_s3 = sshll.u32 %s6204_s21, 4  ;;  %s190_s10 = sshll.u32 %s6205_s7, 4  ;;  %s167_s3 = int_to_ptr.vmem [resolvable:$true] %s166_s3  ;;  %s191_s10 = int_to_ptr.vmem [resolvable:$true] %s190_s10 }
  0x9f   :  { %s6011_s11 = scalar_lea.vmem %s167_s3, 1024  ;;  %p6016_p9 = scmp.lt.s32.totalorder %s167_s3, %s167_s3 }
  0xa0   :  { %p6012_p8 = scmp.ne.s32.totalorder %s167_s3, %s6011_s11  ;;  %p6017_p10 = scmp.lt.s32.totalorder %s6011_s11, %s6011_s11 }
  0xa2   :  { %p6018_p11 = por %p6017_p10, %p6016_p9 }
  0xa4   :  { %p6019_p12 = pnand %p6018_p11, %p6012_p8 }
  0xa6   :  { %6022 = shalt.err (!%p6019_p12)
}
  0xa7   :  { %172 = dma.hbm_to_vmem [thread:$0]  %s6288_s6, 1024, %s167_s3, [#allocation12], %s6194_s0, %s6194_s0, %s6195_s18  }
  0xa8   :  { %s6031_s29 = scalar_lea.vmem %s191_s10, 512  ;;  %p6036_p0 = scmp.lt.s32.totalorder %s191_s10, %s191_s10 }
  0xa9   :  { %p6032_p13 = scmp.ne.s32.totalorder %s191_s10, %s6031_s29  ;;  %p6037_p1 = scmp.lt.s32.totalorder %s6031_s29, %s6031_s29 }
  0xab   :  { %p6038_p2 = por %p6037_p1, %p6036_p0 }
  0xad   :  { %p6039_p3 = pnand %p6038_p2, %p6032_p13 }
  0xaf   :  { %6042 = shalt.err (!%p6039_p3)
}
  0xb0   :  { %196 = dma.hbm_to_vmem [thread:$0]  %s6298_s20, 512, %s191_s10, [#allocation15], %s6194_s0, %s6194_s0, %s6195_s18  }
  0xb1   :  { %s6206_s8 = smov [#allocation19]   ;;  %s6207_s30 = smov [#allocation22]  }
  0xb2   :  { %s214_s15 = sshll.u32 %s6206_s8, 4  ;;  %s238_s12 = sshll.u32 %s6207_s30, 4  ;;  %s215_s15 = int_to_ptr.vmem [resolvable:$true] %s214_s15  ;;  %s239_s12 = int_to_ptr.vmem [resolvable:$true] %s238_s12 }
  0xb3   :  { %s6051_s16 = scalar_lea.vmem %s215_s15, 512  ;;  %p6056_p5 = scmp.lt.s32.totalorder %s215_s15, %s215_s15 }
  0xb4   :  { %p6052_p4 = scmp.ne.s32.totalorder %s215_s15, %s6051_s16  ;;  %p6057_p6 = scmp.lt.s32.totalorder %s6051_s16, %s6051_s16 }
  0xb6   :  { %p6058_p7 = por %p6057_p6, %p6056_p5 }
  0xb8   :  { %p6059_p8 = pnand %p6058_p7, %p6052_p4 }
  0xba   :  { %6062 = shalt.err (!%p6059_p8)
}
  0xbb   :  { %220 = dma.hbm_to_vmem [thread:$0]  %s6308_s4, 512, %s215_s15, [#allocation18], %s6194_s0, %s6194_s0, %s6195_s18  }
  0xbc   :  { %s6071_s6 = scalar_lea.vmem %s239_s12, 512  ;;  %p6076_p10 = scmp.lt.s32.totalorder %s239_s12, %s239_s12 }
  0xbd   :  { %p6072_p9 = scmp.ne.s32.totalorder %s239_s12, %s6071_s6  ;;  %p6077_p11 = scmp.lt.s32.totalorder %s6071_s6, %s6071_s6 }
  0xbf   :  { %p6078_p12 = por %p6077_p11, %p6076_p10 }
  0xc1   :  { %p6079_p13 = pnand %p6078_p12, %p6072_p9 }
  0xc3   :  { %6082 = shalt.err (!%p6079_p13)
}
  0xc4   :  { %244 = dma.hbm_to_vmem [thread:$0]  %s6318_s24, 512, %s239_s12, [#allocation21], %s6194_s0, %s6194_s0, %s6195_s18  }
  0xc5   :  { %s6208_s20 = smov [#allocation25]  }
  0xc6   :  { %s262_s22 = sshll.u32 %s6208_s20, 4  ;;  %s263_s22 = int_to_ptr.vmem [resolvable:$true] %s262_s22 }
  0xc7   :  { %s6091_s23 = scalar_lea.vmem %s263_s22, 512  ;;  %p6096_p1 = scmp.lt.s32.totalorder %s263_s22, %s263_s22 }
  0xc8   :  { %p6092_p0 = scmp.ne.s32.totalorder %s263_s22, %s6091_s23  ;;  %p6097_p2 = scmp.lt.s32.totalorder %s6091_s23, %s6091_s23 }
  0xca   :  { %p6098_p3 = por %p6097_p2, %p6096_p1 }
  0xcc   :  { %p6099_p4 = pnand %p6098_p3, %p6092_p0 }
  0xce   :  { %6102 = shalt.err (!%p6099_p4)
}
  0xcf   :  { %s7178_s4 = sld [smem:[#allocation46_spill]] }
  0xd5   :  { %268 = dma.hbm_to_vmem [thread:$0]  %s7178_s4, 512, %s263_s22, [#allocation24], %s6194_s0, %s6194_s0, %s6195_s18  }
  0xd6   :  { %6143 = dma.done.wait [#allocation3], 2048  }
  0xd7   :  { %6144 = vsyncadd [#allocation3], 4294965248 }
  0xd8   :  { %6145 = dma.done.wait [#allocation6], 1024  }
  0xd9   :  { %6146 = vsyncadd [#allocation6], 4294966272 }
  0xda   :  { %6147 = dma.done.wait [#allocation9], 1024  }
  0xdb   :  { %6148 = vsyncadd [#allocation9], 4294966272 }
  0xdc   :  { %6149 = dma.done.wait [#allocation12], 1536  }
  0xdd   :  { %6150 = vsyncadd [#allocation12], 4294965760 }
  0xde   :  { %6151 = dma.done.wait [#allocation15], 1024  }
  0xdf   :  { %6152 = vsyncadd [#allocation15], 4294966272 }
  0xe0   :  { %6153 = dma.done.wait [#allocation18], 1024  }
  0xe1   :  { %6154 = vsyncadd [#allocation18], 4294966272 }
  0xe2   :  { %6155 = dma.done.wait [#allocation21], 1024  }
  0xe3   :  { %6156 = vsyncadd [#allocation21], 4294966272 }
  0xe4   :  { %6157 = dma.done.wait [#allocation24], 1024  }
  0xe5   :  { %6158 = vsyncadd [#allocation24], 4294966272  ;;  %s7179_s24 = sld [smem:[#allocation39_spill]]  ;;  %v6209_v0 = vmov 0   ;;  %v6431_v2 = vld [vmem:[#allocation2 + $0x78] sm:$0xff]  ;;  %v6434_v3 = vld [vmem:[#allocation2 + $0x70] sm:$0xff]  ;;  %v342_v19 = vlaneseq }
  0xe6   :  { %5651 = vset.pattern.permute.xlu0 %v6209_v0  ;;  %5652 = vset.pattern.permute.xlu1 %v6209_v0  ;;  %v6438_v5 = vld [vmem:[#allocation2 + $0x68] sm:$0xff]  ;;  %v6442_v6 = vld [vmem:[#allocation2 + $0x60] sm:$0xff]  ;;  %v6446_v7 = vld [vmem:[#allocation2 + $0x58] sm:$0xff]  ;;  %v6210_v22 = vmov 1.0   ;;  %vm486_vm2 = vcmask 261120   ;;  %s7180_s26 = sld [smem:[#allocation43_spill]] }
  0xe7   :  { %5134 = vmatprep.subr.mxu0 %v6431_v2  ;;  %v6450_v8 = vld [vmem:[#allocation2 + $0x50] sm:$0xff]  ;;  %v6454_v9 = vld [vmem:[#allocation2 + $0x48] sm:$0xff]  ;;  %v6458_v10 = vld [vmem:[#allocation2 + $0x40] sm:$0xff]  ;;  %v6497_v20 = vand.u32 127, %v342_v19  ;;  %v6211_v56 = vmov 0.0   ;;  %s7181_s27 = sld [smem:[#allocation42_spill]] }
  0xe8   :  { %5135 = vmatpush3.msra.mxu0 %v6431_v2  ;;  %v6462_v11 = vld [vmem:[#allocation2 + $0x38] sm:$0xff]  ;;  %v6466_v12 = vld [vmem:[#allocation2 + $0x30] sm:$0xff]  ;;  %v6470_v13 = vld [vmem:[#allocation2 + $0x28] sm:$0xff]  ;;  %vm848_vm15 = vcmask 130048   ;;  %s7186_s13 = sld [smem:[#allocation40_spill]]  ;;  %s6213_s21 = smov [#allocation26]  }
  0xe9   :  { %5136 = vmatprep.subr.mxu0 %v6434_v3  ;;  %v6474_v14 = vld [vmem:[#allocation2 + $0x20] sm:$0xff]  ;;  %v6478_v15 = vld [vmem:[#allocation2 + $0x18] sm:$0xff]  ;;  %v6482_v16 = vld [vmem:[#allocation2 + $0x10] sm:$0xff]  ;;  %vm354_vm3 = vcmp.ge.s32.totalorder %v6497_v20, 16  ;;  %vm355_vm4 = vcmp.lt.s32.totalorder %v6497_v20, 24  ;;  %vm345_vm5 = vcmp.lt.s32.totalorder %v6497_v20, 8 }
  0xea   :  { %5137 = vmatpush3.msra.mxu0 %v6434_v3  ;;  %v6486_v17 = vld [vmem:[#allocation2 + $0x8] sm:$0xff]  ;;  %v6490_v18 = vld [vmem:[#allocation2] sm:$0xff]  ;;  %v513_v30 = vld [vmem:[#allocation5 + $0x18] sm:$0xff]  ;;  %v6528_v57 = vsel %vm345_vm5, 1.0, %v6211_v56  ;;  %vm349_vm7 = vcmp.ge.s32.totalorder %v6497_v20, 8  ;;  %vm350_vm8 = vcmp.lt.s32.totalorder %v6497_v20, 16 }
  0xeb   :  { %v394_v1 = vld [vmem:[%s7179_s24] sm:$0xff]  ;;  %v395_v4 = vld [vmem:[%s7179_s24 + $0x8] sm:$0xff]  ;;  %5138 = vmatprep.subr.mxu0 %v6438_v5  ;;  %v512_v31 = vld [vmem:[#allocation5 + $0x10] sm:$0xff]  ;;  %5169 = vmatprep.subr.mxu1 %v513_v30  ;;  %vm359_vm9 = vcmp.ge.s32.totalorder %v6497_v20, 24  ;;  %vm360_vm10 = vcmp.lt.s32.totalorder %v6497_v20, 32  ;;  %s7187_s28 = sld [smem:[#allocation44_spill]] }
  0xec   :  { %397 = vperm.xlu0 %5651, %v394_v1   ;;  %5139 = vmatpush3.msra.mxu0 %v6438_v5  ;;  %v511_v32 = vld [vmem:[#allocation5 + $0x8] sm:$0xff]  ;;  %v510_v33 = vld [vmem:[#allocation5] sm:$0xff]  ;;  %v517_v34 = vld [vmem:[#allocation7 + $0x18] sm:$0xff]  ;;  %s7188_s1 = sld [smem:[#allocation47_spill]]  ;;  %s4675_s3 = sshll.u32 %s6213_s21, 4  ;;  %s4676_s3 = int_to_ptr.vmem [resolvable:$true] %s4675_s3 }
  0xed   :  { %5140 = vmatprep.subr.mxu0 %v6442_v6  ;;  %5170 = vmatpush3.msra.mxu1 %v513_v30  ;;  %v4745_v42 = vld [vmem:[%s7180_s26] ss:$0 sm:$0xff]  ;;  %v516_v48 = vld [vmem:[#allocation7 + $0x10] sm:$0xff]  ;;  %v515_v49 = vld [vmem:[#allocation7 + $0x8] sm:$0xff]  ;;  %s7189_s2 = sld [smem:[#allocation45_spill]]  ;;  %s6103_s7 = scalar_lea.vmem %s4676_s3, 256 }
  0xee   :  { %5141 = vmatpush3.msra.mxu0 %v6442_v6  ;;  %5171 = vmatprep.subr.mxu1 %v512_v31  ;;  %v514_v50 = vld [vmem:[#allocation7] sm:$0xff]  ;;  %v521_v51 = vld [vmem:[#allocation8 + $0x18] sm:$0xff]  ;;  %v520_v52 = vld [vmem:[#allocation8 + $0x10] sm:$0xff]  ;;  %s7190_s25 = sld [smem:[#allocation48_spill]]  ;;  %p6104_p5 = scmp.ne.s32.totalorder %s4676_s3, %s6103_s7 }
  0xef   :  { %5142 = vmatprep.subr.mxu0 %v6446_v7  ;;  %5172 = vmatpush3.msra.mxu1 %v512_v31  ;;  %v519_v53 = vld [vmem:[#allocation8 + $0x8] sm:$0xff]  ;;  %v518_v54 = vld [vmem:[#allocation8] sm:$0xff]  ;;  %vm356_vm6 = vmand %vm354_vm3, %vm355_vm4  ;;  %s7192_s19 = sld [smem:[#allocation50_spill]]  ;;  %p6108_p6 = scmp.lt.s32.totalorder %s4676_s3, %s4676_s3 }
  0xf0   :  { %400 = vperm.xlu0 %5651, %v395_v4   ;;  %5143 = vmatpush3.msra.mxu0 %v6446_v7  ;;  %v6531_v58 = vsel %vm356_vm6, 1.0, %v6211_v56  ;;  %vm351_vm11 = vmand %vm349_vm7, %vm350_vm8  ;;  %p6109_p7 = scmp.lt.s32.totalorder %s6103_s7, %s6103_s7 }
  0xf1   :  { %5144 = vmatprep.subr.mxu0 %v6450_v8  ;;  %5173 = vmatprep.subr.mxu1 %v511_v32  ;;  %vm361_vm12 = vmand %vm359_vm9, %vm360_vm10 }
  0xf2   :  { %5145 = vmatpush3.msra.mxu0 %v6450_v8  ;;  %5174 = vmatpush3.msra.mxu1 %v511_v32  ;;  %p6110_p8 = por %p6109_p7, %p6108_p6 }
  0xf3   :  { %5146 = vmatprep.subr.mxu0 %v6454_v9  ;;  %5175 = vmatprep.subr.mxu1 %v510_v33 }
  0xf4   :  { %5147 = vmatpush3.msra.mxu0 %v6454_v9  ;;  %5176 = vmatpush3.msra.mxu1 %v510_v33  ;;  %p6111_p9 = pnand %p6110_p8, %p6104_p5 }
  0xf5   :  { %5148 = vmatprep.subr.mxu0 %v6458_v10  ;;  %5180 = vmatprep.subr.mxu1 %v517_v34 }
  0xf6   :  { %5149 = vmatpush3.msra.mxu0 %v6458_v10 }
  0xf7   :  { %5150 = vmatprep.subr.mxu0 %v6462_v11 }
  0xf8   :  { %5151 = vmatpush3.msra.mxu0 %v6462_v11 }
  0xf9   :  { %5152 = vmatprep.subr.mxu0 %v6466_v12 }
  0xfa   :  { %5153 = vmatpush3.msra.mxu0 %v6466_v12 }
  0xfb   :  { %5154 = vmatprep.subr.mxu0 %v6470_v13 }
  0xfc   :  { %5155 = vmatpush3.msra.mxu0 %v6470_v13 }
  0xfd   :  { %5156 = vmatprep.subr.mxu0 %v6474_v14 }
  0xfe   :  { %5157 = vmatpush3.msra.mxu0 %v6474_v14 }
  0xff   :  { %5158 = vmatprep.subr.mxu0 %v6478_v15 }
 0x100   :  { %5159 = vmatpush3.msra.mxu0 %v6478_v15 }
 0x101   :  { %5160 = vmatprep.subr.mxu0 %v6482_v16 }
 0x102   :  { %5161 = vmatpush3.msra.mxu0 %v6482_v16 }
 0x103   :  { %5162 = vmatprep.subr.mxu0 %v6486_v17 }
 0x104   :  { %5163 = vmatpush3.msra.mxu0 %v6486_v17 }
 0x105   :  { %5164 = vmatprep.subr.mxu0 %v6490_v18 }
 0x106   :  { %5165 = vmatpush3.msra.mxu0 %v6490_v18 }
 0x167   :  { %v398_v21 = vpop.permute.xlu0 %397 }
 0x168   :  { %vm402_vm0 = vcmp.eq.s32.totalorder %v6497_v20, %v398_v21 }
 0x169   :  { %5166 = vmatprep.mubr.msk.f32.mxu0 %vm402_vm0, %v6210_v22  ;;  %vm1749_vm0 = vcmask 523264  }
 0x16b   :  { %v401_v23 = vpop.permute.xlu0 %400 }
 0x16c   :  { %vm403_vm1 = vcmp.eq.s32.totalorder %v6497_v20, %v401_v23  ;;  %v6563_v23 = vsel %vm351_vm11, 1.0, %v6211_v56 }
 0x16d   :  { %5167 = vmatmul.mubr.msk.f32.vlgmr.msra.gmra.mxu0 %vm403_vm1, %v6210_v22 }
 0x22d   :  { %v6503_v24 = vpop.f32.mrf.mxu0 }
 0x22e   :  { %v485_v28 = vmul.f32 %v6503_v24, %v6503_v24 }
 0x22f   :  { %v6505_v25 = vpop.f32.mrf.mxu0 }
 0x230   :  { %v484_v26 = vmul.f32 %v6505_v25, %v6505_v25  ;;  %v490_v29 = vsel %vm486_vm2, %v485_v28, 0.0 }
 0x232   :  { %v487_v27 = vsel %vm486_vm2, %v484_v26, 0.0 }
 0x233   :  { %488 = vadd.xlane.f32.xlu1 %v487_v27  ;;  %v6569_v27 = vsel %vm361_vm12, 1.0, %v6211_v56 }
 0x237   :  { %491 = vadd.xlane.f32.xlu1 %v490_v29 }
 0x2bc   :  { %v489_v35 = vpop.xlane.xlu1 %488 }
 0x2bd   :  { %v494_v36 = vmul.f32 0.03125, %v489_v35 }
 0x2bf   :  { %v496_v37 = vadd.f32 1e-06, %v494_v36 }
 0x2c0   :  { %v492_v38 = vpop.xlane.xlu1 %491 }
 0x2c1   :  { %5653 = vrsqrt.f32 %v496_v37  ;;  %v495_v39 = vmul.f32 0.03125, %v492_v38 }
 0x2c3   :  { %v497_v40 = vadd.f32 1e-06, %v495_v39 }
 0x2c5   :  { %5655 = vrsqrt.f32 %v497_v40  ;;  %v6609_v40 = vshrl.u32 %v342_v19, 7 }
 0x2ce   :  { %v5654_v41 = vpop.eup %5653 }
 0x2cf   :  { %v500_v43 = vmul.f32 %v5654_v41, %v6505_v25  ;;  %v383_v41 = vld [vmem:[%s7181_s27] sm:$0x1] }
 0x2d1   :  { %v508_v44 = vmul.f32 %v4745_v42, %v500_v43  ;;  %v384_v43 = vsub.f32 1.0, %v383_v41 }
 0x2d2   :  { %v5656_v45 = vpop.eup %5655 }
 0x2d3   :  { %v501_v46 = vmul.f32 %v5656_v45, %v6503_v24  ;;  %5177 = vmatprep.mubr.msk.f32.mxu1 %vm486_vm2, %v508_v44  ;;  %v369_v45 = vshra.s32 %v6497_v20, 3 }
 0x2d5   :  { %v509_v47 = vmul.f32 %v4745_v42, %v501_v46  ;;  %v6613_v42 = vadd.s32 8, %v6609_v40  ;;  %v367_v46 = vshra.s32 %v6609_v40, 3 }
 0x2d7   :  { %5178 = vmatmul.mubr.msk.f32.vlgmr.msra.gmra.mxu1 %vm486_vm2, %v509_v47  ;;  %vm6623_vm14 = vcmp.eq.s32.totalorder %v367_v46, %v369_v45 }
 0x2d8   :  { %5181 = vmatpush3.msra.mxu1 %v517_v34  ;;  %5188 = vmatprep.mubr.msk.f32.mxu1 %vm486_vm2, %v508_v44 }
 0x2d9   :  { %5182 = vmatprep.subr.mxu1 %v516_v48 }
 0x2da   :  { %5183 = vmatpush3.msra.mxu1 %v516_v48  ;;  %v389_v48 = vsub.s32 0, %v6609_v40 }
 0x2db   :  { %5184 = vmatprep.subr.mxu1 %v515_v49 }
 0x2dc   :  { %5185 = vmatpush3.msra.mxu1 %v515_v49 }
 0x2dd   :  { %5186 = vmatprep.subr.mxu1 %v514_v50 }
 0x2de   :  { %5187 = vmatpush3.msra.mxu1 %v514_v50 }
 0x2df   :  { %5189 = vmatmul.mubr.msk.f32.vlgmr.msra.gmra.mxu1 %vm486_vm2, %v509_v47  ;;  %5191 = vmatprep.subr.mxu1 %v521_v51 }
 0x2e0   :  { %5192 = vmatpush3.msra.mxu1 %v521_v51  ;;  %5199 = vmatprep.mubr.msk.f32.mxu1 %vm486_vm2, %v508_v44  ;;  %v368_v44 = vshra.s32 %v6613_v42, 3 }
 0x2e1   :  { %5193 = vmatprep.subr.mxu1 %v520_v52 }
 0x2e2   :  { %5194 = vmatpush3.msra.mxu1 %v520_v52  ;;  %vm6619_vm13 = vcmp.eq.s32.totalorder %v368_v44, %v369_v45  ;;  %v6212_v52 = vmov -1e+09  }
 0x2e3   :  { %5195 = vmatprep.subr.mxu1 %v519_v53 }
 0x2e4   :  { %5196 = vmatpush3.msra.mxu1 %v519_v53  ;;  %v373_v53 = vsel %vm6619_vm13, 0.0, %v6212_v52 }
 0x2e5   :  { %5197 = vmatprep.subr.mxu1 %v518_v54 }
 0x2e6   :  { %5198 = vmatpush3.msra.mxu1 %v518_v54  ;;  %v372_v54 = vsel %vm6623_vm14, 0.0, %v6212_v52 }
 0x2e7   :  { %5200 = vmatmul.mubr.msk.f32.vlgmr.msra.gmra.mxu1 %vm486_vm2, %v509_v47  ;;  %v385_v47 = vmul.f32 -1e+09, %v384_v43 }
 0x2e9   :  { %v390_v51 = vrot.slane %v385_v47, %v389_v48 }
 0x397   :  { %v6525_v55 = vpop.f32.mrf.mxu1 }
 0x398   :  { %v758_v29 = vmul.f32 %v6525_v55, %v6528_v57  ;;  %v1151_v31 = vmul.f32 %v6525_v55, %v6531_v58  ;;  %v874_v37 = vmul.f32 %v6525_v55, %v6563_v23 }
 0x399   :  { %v6533_v59 = vpop.f32.mrf.mxu1 }
 0x39a   :  { %v757_v60 = vmul.f32 %v6528_v57, %v6533_v59  ;;  %v1150_v61 = vmul.f32 %v6531_v58, %v6533_v59  ;;  %v873_v33 = vmul.f32 %v6563_v23, %v6533_v59 }
 0x39c   :  { %5206 = vmatprep.mubr.msk.f32.mxu1 %vm486_vm2, %v757_v60  ;;  %5234 = vmatprep.mubr.msk.f32.mxu0 %vm486_vm2, %v1150_v61  ;;  %v6633_v61 = vadd.f32 %v390_v51, %v373_v53 }
 0x39f   :  { %v6543_v62 = vpop.f32.mrf.mxu1 }
 0x3a0   :  { %v760_v63 = vmul.f32 %v6543_v62, %v6528_v57  ;;  %v1153_v0 = vmul.f32 %v6543_v62, %v6531_v58  ;;  %v876_v26 = vmul.f32 %v6543_v62, %v6563_v23 }
 0x3a1   :  { %v6551_v1 = vpop.f32.mrf.mxu1 }
 0x3a2   :  { %v759_v4 = vmul.f32 %v6528_v57, %v6551_v1  ;;  %v1152_v21 = vmul.f32 %v6531_v58, %v6551_v1  ;;  %5202 = vmatprep.subr.msk.mxu1 %vm486_vm2, %v760_v63  ;;  %5230 = vmatprep.subr.msk.mxu0 %vm486_vm2, %v1153_v0  ;;  %v875_v35 = vmul.f32 %v6563_v23, %v6551_v1 }
 0x3a3   :  { %5203 = vmatpush3.xpose.msk.msra.mxu1 %vm486_vm2, %v760_v63  ;;  %5231 = vmatpush3.xpose.msk.msra.mxu0 %vm486_vm2, %v1153_v0  ;;  %v6635_v63 = vadd.f32 %v390_v51, %v372_v54 }
 0x3a4   :  { %5204 = vmatprep.subr.msk.mxu1 %vm486_vm2, %v759_v4  ;;  %5232 = vmatprep.subr.msk.mxu0 %vm486_vm2, %v1152_v21 }
 0x3a7   :  { %v6571_v28 = vpop.f32.mrf.mxu1  ;;  %5205 = vmatpush3.xpose.msk.msra.mxu1 %vm486_vm2, %v759_v4  ;;  %5233 = vmatpush3.xpose.msk.msra.mxu0 %vm486_vm2, %v1152_v21 }
 0x3a8   :  { %5209 = vmatprep.subr.msk.mxu1 %vm486_vm2, %v876_v26  ;;  %v1462_v30 = vmul.f32 %v6571_v28, %v6569_v27  ;;  %v987_v36 = vmul.f32 %v6571_v28, %v6563_v23  ;;  %v6605_v39 = vmul.f32 %v6571_v28, %v6528_v57 }
 0x3a9   :  { %v6582_v32 = vpop.f32.mrf.mxu1 }
 0x3aa   :  { %5207 = vmatmul.mubr.msk.f32.vlgmr.msra.gmra.mxu1 %vm486_vm2, %v758_v29  ;;  %5251 = vmatprep.subr.mxu0 %v1462_v30  ;;  %v1461_v34 = vmul.f32 %v6569_v27, %v6582_v32  ;;  %v986_v38 = vmul.f32 %v6563_v23, %v6582_v32 }
 0x3ab   :  { %5235 = vmatmul.mubr.msk.f32.vlgmr.msra.gmra.mxu0 %vm486_vm2, %v1151_v31  ;;  %5210 = vmatpush3.xpose.msk.msra.mxu1 %vm486_vm2, %v876_v26 }
 0x3ac   :  { %5213 = vmatprep.mubr.msk.f32.mxu1 %vm486_vm2, %v873_v33  ;;  %5252 = vmatpush3.msra.mxu0 %v1462_v30 }
 0x3ad   :  { %5211 = vmatprep.subr.msk.mxu1 %vm486_vm2, %v875_v35  ;;  %5253 = vmatprep.subr.mxu0 %v1461_v34 }
 0x3ae   :  { %5254 = vmatpush3.msra.mxu0 %v1461_v34 }
 0x3af   :  { %5212 = vmatpush3.xpose.msk.msra.mxu1 %vm486_vm2, %v875_v35 }
 0x3b0   :  { %5216 = vmatprep.subr.mxu1 %v987_v36 }
 0x3b2   :  { %5214 = vmatmul.mubr.msk.f32.vlgmr.msra.gmra.mxu1 %vm486_vm2, %v874_v37 }
 0x3b3   :  { %5217 = vmatpush3.msra.mxu1 %v987_v36 }
 0x3b4   :  { %5218 = vmatprep.subr.mxu1 %v986_v38 }
 0x3b5   :  { %5219 = vmatpush3.msra.mxu1 %v986_v38 }
 0x3b6   :  { %5223 = vmatprep.subr.mxu1 %v6605_v39 }
 0x46a   :  { %v5208_v50 = vpop.f32.mrf.mxu1 }
 0x46b   :  { %v5236_v31 = vpop.f32.mrf.mxu0  ;;  %v845_v34 = vadd.f32 %v5208_v50, %v6633_v61 }
 0x46c   :  { %v839_v60 = vpop.f32.mrf.mxu1  ;;  %v1238_v41 = vadd.f32 %v5236_v31, %v6633_v61 }
 0x46d   :  { %v840_v26 = vadd.f32 %v839_v60, %v6635_v63  ;;  %v1232_v36 = vpop.f32.mrf.mxu0  ;;  %v852_v38 = vsel %vm848_vm15, %v845_v34, -inf }
 0x46e   :  { %v1233_v37 = vadd.f32 %v1232_v36, %v6635_v63  ;;  %v1244_v44 = vsel %vm848_vm15, %v1238_v41, -inf }
 0x46f   :  { %v849_v35 = vsel %vm848_vm15, %v840_v26, -inf }
 0x470   :  { %v1241_v43 = vsel %vm848_vm15, %v1233_v37, -inf }
 0x472   :  { %v5215_v0 = vpop.f32.mrf.mxu1 }
 0x473   :  { %v961_v4 = vadd.f32 %v5215_v0, %v6633_v61 }
 0x474   :  { %v955_v21 = vpop.f32.mrf.mxu1 }
 0x475   :  { %v956_v29 = vadd.f32 %v955_v21, %v6635_v63  ;;  %v967_v30 = vsel %vm848_vm15, %v961_v4, -inf }
 0x476   :  { %968 = vmax.xlane.f32.xlu1 %v967_v30 }
 0x477   :  { %v964_v33 = vsel %vm848_vm15, %v956_v29, -inf }
 0x478   :  { %965 = vmax.xlane.f32.xlu0 %v964_v33 }
 0x47a   :  { %850 = vmax.xlane.f32.xlu1 %v849_v35 }
 0x47e   :  { %853 = vmax.xlane.f32.xlu1 %v852_v38 }
 0x482   :  { %1242 = vmax.xlane.f32.xlu1 %v1241_v43 }
 0x486   :  { %1245 = vmax.xlane.f32.xlu1 %v1244_v44 }
 0x4ff   :  { %v969_v45 = vpop.xlane.xlu1 %968 }
 0x500   :  { %v971_v46 = vsub.f32 %v961_v4, %v969_v45 }
 0x501   :  { %v966_v47 = vpop.xlane.xlu0 %965 }
 0x502   :  { %v974_v48 = vmul.f32 1.442695, %v971_v46  ;;  %v970_v50 = vsub.f32 %v956_v29, %v966_v47 }
 0x503   :  { %v851_v51 = vpop.xlane.xlu1 %850 }
 0x504   :  { %5657 = vpow2.f32 %v974_v48  ;;  %v972_v53 = vmul.f32 1.442695, %v970_v50  ;;  %v855_v54 = vsub.f32 %v840_v26, %v851_v51 }
 0x506   :  { %5659 = vpow2.f32 %v972_v53  ;;  %v857_v60 = vmul.f32 1.442695, %v855_v54 }
 0x507   :  { %v854_v0 = vpop.xlane.xlu1 %853 }
 0x508   :  { %v856_v21 = vsub.f32 %v845_v34, %v854_v0  ;;  %5661 = vpow2.f32 %v857_v60 }
 0x50a   :  { %v859_v30 = vmul.f32 1.442695, %v856_v21 }
 0x50b   :  { %v1243_v31 = vpop.xlane.xlu1 %1242 }
 0x50c   :  { %5663 = vpow2.f32 %v859_v30  ;;  %v1247_v33 = vsub.f32 %v1233_v37, %v1243_v31 }
 0x50e   :  { %v1249_v35 = vmul.f32 1.442695, %v1247_v33 }
 0x50f   :  { %v1246_v36 = vpop.xlane.xlu1 %1245 }
 0x510   :  { %5665 = vpow2.f32 %v1249_v35  ;;  %v1248_v4 = vsub.f32 %v1238_v41, %v1246_v36 }
 0x511   :  { %v5658_v38 = vpop.eup %5657 }
 0x512   :  { %v1251_v43 = vmul.f32 1.442695, %v1248_v4  ;;  %v979_v29 = vsel %vm848_vm15, %v5658_v38, 0.0  ;;  %v871_v4 = vmul.f32 %v6528_v57, %v6582_v32 }
 0x513   :  { %v5660_v44 = vpop.eup %5659  ;;  %980 = vadd.xlane.f32.xlu1 %v979_v29 }
 0x514   :  { %5667 = vpow2.f32 %v1251_v43  ;;  %v976_v26 = vsel %vm848_vm15, %v5660_v44, 0.0 }
 0x515   :  { %v5662_v45 = vpop.eup %5661 }
 0x516   :  { %v861_v46 = vsel %vm848_vm15, %v5662_v45, 0.0 }
 0x517   :  { %977 = vadd.xlane.f32.xlu1 %v976_v26 }
 0x519   :  { %v5664_v34 = vpop.eup %5663 }
 0x51a   :  { %v864_v37 = vsel %vm848_vm15, %v5664_v34, 0.0 }
 0x51b   :  { %862 = vadd.xlane.f32.xlu1 %v861_v46  ;;  %865 = vadd.xlane.f32.xlu0 %v864_v37  ;;  %v1264_v46 = vmul.f32 %v6571_v28, %v6531_v58 }
 0x51d   :  { %v5666_v47 = vpop.eup %5665 }
 0x51e   :  { %v1253_v41 = vsel %vm848_vm15, %v5666_v47, 0.0 }
 0x51f   :  { %1254 = vadd.xlane.f32.xlu1 %v1253_v41  ;;  %v1350_v41 = vmul.f32 %v6569_v27, %v6551_v1 }
 0x521   :  { %v5668_v48 = vpop.eup %5667 }
 0x522   :  { %v1256_v50 = vsel %vm848_vm15, %v5668_v48, 0.0 }
 0x523   :  { %1257 = vadd.xlane.f32.xlu0 %v1256_v50 }
 0x59c   :  { %v981_v51 = vpop.xlane.xlu1 %980 }
 0x59d   :  { %5669 = vrcp.f32 %v981_v51 }
 0x5a0   :  { %v978_v53 = vpop.xlane.xlu1 %977 }
 0x5a1   :  { %5671 = vrcp.f32 %v978_v53 }
 0x5a4   :  { %v866_v54 = vpop.xlane.xlu0 %865  ;;  %v863_v60 = vpop.xlane.xlu1 %862 }
 0x5a5   :  { %5673 = vrcp.f32 %v866_v54 }
 0x5a6   :  { %5675 = vrcp.f32 %v863_v60 }
 0x5a8   :  { %v1255_v0 = vpop.xlane.xlu1 %1254 }
 0x5a9   :  { %5677 = vrcp.f32 %v1255_v0 }
 0x5aa   :  { %v5670_v30 = vpop.eup %5669 }
 0x5ab   :  { %v985_v35 = vmul.f32 %v5670_v30, %v5658_v38  ;;  %v1263_v38 = vmul.f32 %v6531_v58, %v6582_v32 }
 0x5ac   :  { %v1258_v21 = vpop.xlane.xlu0 %1257 }
 0x5ad   :  { %5679 = vrcp.f32 %v1258_v21 }
 0x5ae   :  { %v5672_v31 = vpop.eup %5671 }
 0x5af   :  { %v984_v33 = vmul.f32 %v5672_v31, %v5660_v44 }
 0x5b1   :  { %5220 = vmatprep.mubr.msk.f32.mxu1 %vm848_vm15, %v984_v33 }
 0x5b2   :  { %v5674_v36 = vpop.eup %5673  ;;  %5221 = vmatmul.mubr.msk.f32.vlgmr.msra.gmra.mxu1 %vm848_vm15, %v985_v35 }
 0x5b3   :  { %v5676_v43 = vpop.eup %5675  ;;  %5224 = vmatpush3.msra.mxu1 %v6605_v39  ;;  %v870_v29 = vmul.f32 %v5674_v36, %v5664_v34  ;;  %v1351_v39 = vmul.f32 %v6543_v62, %v6569_v27  ;;  %v1348_v34 = vmul.f32 %v6569_v27, %v6533_v59  ;;  %v1349_v62 = vmul.f32 %v6525_v55, %v6569_v27 }
 0x5b4   :  { %5225 = vmatprep.subr.mxu1 %v871_v4  ;;  %v869_v26 = vmul.f32 %v5676_v43, %v5662_v45 }
 0x5b5   :  { %5226 = vmatpush3.msra.mxu1 %v871_v4 }
 0x5b6   :  { %v5678_v44 = vpop.eup %5677  ;;  %5227 = vmatprep.mubr.msk.f32.mxu1 %vm848_vm15, %v869_v26  ;;  %5237 = vmatprep.subr.mxu1 %v1264_v46 }
 0x5b7   :  { %5228 = vmatmul.mubr.msk.f32.vlgmr.msra.gmra.mxu1 %vm848_vm15, %v870_v29  ;;  %v1261_v37 = vmul.f32 %v5678_v44, %v5666_v47 }
 0x5b8   :  { %5238 = vmatpush3.msra.mxu1 %v1264_v46 }
 0x5b9   :  { %5239 = vmatprep.subr.mxu1 %v1263_v38  ;;  %5241 = vmatprep.mubr.msk.f32.mxu1 %vm848_vm15, %v1261_v37 }
 0x5ba   :  { %v5680_v45 = vpop.eup %5679  ;;  %5240 = vmatpush3.msra.mxu1 %v1263_v38 }
 0x5bb   :  { %5244 = vmatprep.subr.msk.mxu1 %vm486_vm2, %v1351_v39  ;;  %v1262_v28 = vmul.f32 %v5680_v45, %v5668_v48 }
 0x5bd   :  { %5242 = vmatmul.mubr.msk.f32.vlgmr.msra.gmra.mxu1 %vm848_vm15, %v1262_v28 }
 0x5be   :  { %5245 = vmatpush3.xpose.msk.msra.mxu1 %vm486_vm2, %v1351_v39  ;;  %5248 = vmatprep.mubr.msk.f32.mxu1 %vm486_vm2, %v1348_v34  ;;  %v525_v39 = vld [vmem:[#allocation10 + $0x18] sm:$0xff] }
 0x5bf   :  { %5246 = vmatprep.subr.msk.mxu1 %vm486_vm2, %v1350_v41  ;;  %5258 = vmatprep.subr.mxu0 %v525_v39 }
 0x5c2   :  { %5247 = vmatpush3.xpose.msk.msra.mxu1 %vm486_vm2, %v1350_v41 }
 0x5c5   :  { %5249 = vmatmul.mubr.msk.f32.vlgmr.msra.gmra.mxu1 %vm486_vm2, %v1349_v62 }
 0x672   :  { %v5222_v32 = vpop.f32.mrf.mxu1 }
 0x674   :  { %v1060_v59 = vpop.f32.mrf.mxu1 }
 0x677   :  { %v5229_v47 = vpop.f32.mrf.mxu1 }
 0x678   :  { %v1147_v48 = vadd.f32 %v5229_v47, %v5222_v32  ;;  %v523_v47 = vld [vmem:[#allocation10 + $0x8] sm:$0xff] }
 0x679   :  { %v1141_v1 = vpop.f32.mrf.mxu1 }
 0x67a   :  { %v1142_v50 = vadd.f32 %v1141_v1, %v1060_v59  ;;  %v524_v59 = vld [vmem:[#allocation10 + $0x10] sm:$0xff] }
 0x67d   :  { %v5243_v51 = vpop.f32.mrf.mxu1 }
 0x67e   :  { %v1347_v53 = vadd.f32 %v5243_v51, %v1147_v48  ;;  %v522_v48 = vld [vmem:[#allocation10] sm:$0xff] }
 0x67f   :  { %v1337_v54 = vpop.f32.mrf.mxu1 }
 0x680   :  { %v1346_v60 = vadd.f32 %v1337_v54, %v1142_v50 }
 0x685   :  { %v5250_v0 = vpop.f32.mrf.mxu1 }
 0x686   :  { %v1436_v21 = vadd.f32 %v5250_v0, %v6633_v61 }
 0x687   :  { %v1430_v30 = vpop.f32.mrf.mxu1 }
 0x688   :  { %v1431_v31 = vadd.f32 %v1430_v30, %v6635_v63  ;;  %v1442_v55 = vsel %vm848_vm15, %v1436_v21, -inf }
 0x689   :  { %1443 = vmax.xlane.f32.xlu0 %v1442_v55 }
 0x68a   :  { %v1439_v33 = vsel %vm848_vm15, %v1431_v31, -inf }
 0x68b   :  { %1440 = vmax.xlane.f32.xlu1 %v1439_v33 }
 0x712   :  { %v1444_v35 = vpop.xlane.xlu0 %1443 }
 0x713   :  { %v1446_v36 = vsub.f32 %v1436_v21, %v1444_v35  ;;  %v1657_v35 = vld [vmem:[#allocation11 + $0x18] sm:$0xff] }
 0x714   :  { %v1441_v4 = vpop.xlane.xlu1 %1440  ;;  %5269 = vmatprep.subr.mxu1 %v1657_v35 }
 0x715   :  { %v1449_v43 = vmul.f32 1.442695, %v1446_v36  ;;  %v1445_v29 = vsub.f32 %v1431_v31, %v1441_v4  ;;  %v1859_v36 = vld [vmem:[%s7186_s13 + $0x8] sm:$0xff]  ;;  %5270 = vmatpush3.msra.mxu1 %v1657_v35  ;;  %v1654_v4 = vld [vmem:[#allocation11] sm:$0xff] }
 0x717   :  { %5681 = vpow2.f32 %v1449_v43  ;;  %v1447_v26 = vmul.f32 1.442695, %v1445_v29  ;;  %v1858_v43 = vld [vmem:[%s7186_s13] sm:$0xff]  ;;  %v1665_v29 = vld [vmem:[#allocation13 + $0x38] sm:$0xff] }
 0x719   :  { %5683 = vpow2.f32 %v1447_v26  ;;  %v1664_v26 = vld [vmem:[#allocation13 + $0x30] sm:$0xff] }
 0x724   :  { %v5682_v46 = vpop.eup %5681 }
 0x725   :  { %v1454_v44 = vsel %vm848_vm15, %v5682_v46, 0.0 }
 0x726   :  { %v5684_v38 = vpop.eup %5683  ;;  %1455 = vadd.xlane.f32.xlu0 %v1454_v44  ;;  %v1662_v44 = vld [vmem:[#allocation13 + $0x20] sm:$0xff] }
 0x727   :  { %v1451_v37 = vsel %vm848_vm15, %v5684_v38, 0.0 }
 0x728   :  { %1452 = vadd.xlane.f32.xlu1 %v1451_v37  ;;  %v1660_v37 = vld [vmem:[#allocation13 + $0x10] sm:$0xff] }
 0x7af   :  { %v1456_v45 = vpop.xlane.xlu0 %1455 }
 0x7b0   :  { %5685 = vrcp.f32 %v1456_v45 }
 0x7b1   :  { %v1453_v28 = vpop.xlane.xlu1 %1452 }
 0x7b2   :  { %5687 = vrcp.f32 %v1453_v28 }
 0x7bd   :  { %v5686_v34 = vpop.eup %5685 }
 0x7be   :  { %v1460_v32 = vmul.f32 %v5686_v34, %v5682_v46  ;;  %v1663_v46 = vld [vmem:[#allocation13 + $0x28] sm:$0xff] }
 0x7bf   :  { %v5688_v41 = vpop.eup %5687 }
 0x7c0   :  { %v1459_v62 = vmul.f32 %v5688_v41, %v5684_v38  ;;  %v1661_v38 = vld [vmem:[#allocation13 + $0x18] sm:$0xff] }
 0x7c2   :  { %5255 = vmatprep.mubr.msk.f32.mxu0 %vm848_vm15, %v1459_v62 }
 0x7c3   :  { %5256 = vmatmul.mubr.msk.f32.vlgmr.msra.gmra.mxu0 %vm848_vm15, %v1460_v32 }
 0x7c4   :  { %5259 = vmatpush3.msra.mxu0 %v525_v39 }
 0x7c5   :  { %5260 = vmatprep.subr.mxu0 %v524_v59 }
 0x7c6   :  { %5261 = vmatpush3.msra.mxu0 %v524_v59 }
 0x7c7   :  { %5262 = vmatprep.subr.mxu0 %v523_v47 }
 0x7c8   :  { %5263 = vmatpush3.msra.mxu0 %v523_v47 }
 0x7c9   :  { %5264 = vmatprep.subr.mxu0 %v522_v48 }
 0x7ca   :  { %5265 = vmatpush3.msra.mxu0 %v522_v48  ;;  %v4778_v48 = vld [vmem:[%s7187_s28] ss:$0 sm:$0xff] }
 0x7cb   :  { %5280 = vmatprep.subr.mxu0 %v1665_v29 }
 0x883   :  { %v5257_v1 = vpop.f32.mrf.mxu0 }
 0x884   :  { %v1545_v54 = vadd.f32 %v5257_v1, %v1347_v53 }
 0x885   :  { %v1535_v50 = vpop.f32.mrf.mxu0 }
 0x886   :  { %v1544_v51 = vadd.f32 %v1535_v50, %v1346_v60 }
 0x888   :  { %5266 = vmatprep.mubr.msk.f32.mxu0 %vm486_vm2, %v1544_v51 }
 0x889   :  { %5267 = vmatmul.mubr.msk.f32.vlgmr.msra.gmra.mxu0 %vm486_vm2, %v1545_v54  ;;  %v1659_v54 = vld [vmem:[#allocation13 + $0x8] sm:$0xff] }
 0x88a   :  { %5281 = vmatpush3.msra.mxu0 %v1665_v29  ;;  %v4788_v29 = vld [vmem:[%s7188_s1] ss:$0 sm:$0xff] }
 0x88b   :  { %5282 = vmatprep.subr.mxu0 %v1664_v26 }
 0x88c   :  { %5283 = vmatpush3.msra.mxu0 %v1664_v26 }
 0x88d   :  { %5284 = vmatprep.subr.mxu0 %v1663_v46 }
 0x88e   :  { %5285 = vmatpush3.msra.mxu0 %v1663_v46 }
 0x88f   :  { %5286 = vmatprep.subr.mxu0 %v1662_v44 }
 0x890   :  { %5287 = vmatpush3.msra.mxu0 %v1662_v44 }
 0x891   :  { %5288 = vmatprep.subr.mxu0 %v1661_v38 }
 0x892   :  { %5289 = vmatpush3.msra.mxu0 %v1661_v38  ;;  %v1978_v38 = vld [vmem:[#allocation16 + $0x10] sm:$0xff] }
 0x893   :  { %5290 = vmatprep.subr.mxu0 %v1660_v37 }
 0x894   :  { %5291 = vmatpush3.msra.mxu0 %v1660_v37  ;;  %v1977_v37 = vld [vmem:[#allocation16 + $0x8] sm:$0xff] }
 0x895   :  { %5292 = vmatprep.subr.mxu0 %v1659_v54 }
 0x896   :  { %5293 = vmatpush3.msra.mxu0 %v1659_v54 }
 0x949   :  { %v5268_v0 = vpop.f32.mrf.mxu0 }
 0x94a   :  { %v6693_v21 = vadd.f32 %v5268_v0, %v6503_v24  ;;  %v1656_v24 = vld [vmem:[#allocation11 + $0x10] sm:$0xff]  ;;  %v1658_v0 = vld [vmem:[#allocation13] sm:$0xff] }
 0x94b   :  { %v1618_v30 = vpop.f32.mrf.mxu0  ;;  %5271 = vmatprep.subr.mxu1 %v1656_v24  ;;  %5294 = vmatprep.subr.mxu0 %v1658_v0 }
 0x94c   :  { %v6696_v31 = vadd.f32 %v1618_v30, %v6505_v25  ;;  %v1631_v55 = vmul.f32 %v6693_v21, %v6693_v21  ;;  %v1655_v25 = vld [vmem:[#allocation11 + $0x8] sm:$0xff]  ;;  %5272 = vmatpush3.msra.mxu1 %v1656_v24  ;;  %5295 = vmatpush3.msra.mxu0 %v1658_v0 }
 0x94d   :  { %5273 = vmatprep.subr.mxu1 %v1655_v25  ;;  %5299 = vmatprep.subr.mxu0 %v6431_v2 }
 0x94e   :  { %v1635_v33 = vsel %vm486_vm2, %v1631_v55, 0.0  ;;  %v1630_v53 = vmul.f32 %v6696_v31, %v6696_v31  ;;  %5274 = vmatpush3.msra.mxu1 %v1655_v25 }
 0x94f   :  { %1636 = vadd.xlane.f32.xlu0 %v1635_v33  ;;  %5275 = vmatprep.subr.mxu1 %v1654_v4 }
 0x950   :  { %v1632_v60 = vsel %vm486_vm2, %v1630_v53, 0.0  ;;  %5276 = vmatpush3.msra.mxu1 %v1654_v4 }
 0x951   :  { %1633 = vadd.xlane.f32.xlu1 %v1632_v60 }
 0x962   :  { %1861 = vperm.xlu1 %5652, %v1858_v43  }
 0x965   :  { %1864 = vperm.xlu0 %5651, %v1859_v36  }
 0x9d8   :  { %v1637_v39 = vpop.xlane.xlu0 %1636 }
 0x9d9   :  { %v1639_v45 = vmul.f32 0.03125, %v1637_v39  ;;  %v1976_v39 = vld [vmem:[#allocation16] sm:$0xff] }
 0x9da   :  { %v1634_v28 = vpop.xlane.xlu1 %1633 }
 0x9db   :  { %v1641_v34 = vadd.f32 1e-06, %v1639_v45  ;;  %v1638_v41 = vmul.f32 0.03125, %v1634_v28  ;;  %v1983_v45 = vld [vmem:[#allocation17 + $0x18] sm:$0xff]  ;;  %v1982_v28 = vld [vmem:[#allocation17 + $0x10] sm:$0xff] }
 0x9dd   :  { %5689 = vrsqrt.f32 %v1641_v34  ;;  %v1640_v62 = vadd.f32 1e-06, %v1638_v41  ;;  %v1981_v34 = vld [vmem:[#allocation17 + $0x8] sm:$0xff]  ;;  %v1980_v41 = vld [vmem:[#allocation17] sm:$0xff] }
 0x9de   :  { %v1862_v55 = vpop.permute.xlu1 %1861 }
 0x9df   :  { %5691 = vrsqrt.f32 %v1640_v62  ;;  %vm1866_vm1 = vcmp.eq.s32.totalorder %v6497_v20, %v1862_v55 }
 0x9ea   :  { %v5690_v32 = vpop.eup %5689 }
 0x9eb   :  { %v1645_v47 = vmul.f32 %v5690_v32, %v6693_v21 }
 0x9ec   :  { %v5692_v59 = vpop.eup %5691 }
 0x9ed   :  { %v1644_v1 = vmul.f32 %v5692_v59, %v6696_v31  ;;  %v1653_v51 = vmul.f32 %v4778_v48, %v1645_v47 }
 0x9ef   :  { %v1652_v50 = vmul.f32 %v4778_v48, %v1644_v1 }
 0x9f1   :  { %5277 = vmatprep.mubr.msk.f32.mxu1 %vm486_vm2, %v1652_v50 }
 0x9f2   :  { %5278 = vmatmul.mubr.msk.f32.vlgmr.msra.gmra.mxu1 %vm486_vm2, %v1653_v51 }
 0xab2   :  { %v5279_v30 = vpop.f32.mrf.mxu1 }
 0xab3   :  { %v1748_v60 = vmax.f32 %v5279_v30, 0.0 }
 0xab4   :  { %v1738_v33 = vpop.f32.mrf.mxu1 }
 0xab5   :  { %v1747_v53 = vmax.f32 %v1738_v33, 0.0 }
 0xab7   :  { %5296 = vmatprep.mubr.msk.f32.mxu0 %vm1749_vm0, %v1747_v53 }
 0xab8   :  { %5297 = vmatmul.mubr.msk.f32.vlgmr.msra.gmra.mxu0 %vm1749_vm0, %v1748_v60 }
 0xab9   :  { %5300 = vmatpush3.msra.mxu0 %v6431_v2  ;;  %5331 = vmatprep.mubr.msk.f32.mxu0 %vm1866_vm1, %v6210_v22  ;;  %v1865_v2 = vpop.permute.xlu0 %1864 }
 0xaba   :  { %5301 = vmatprep.subr.mxu0 %v6434_v3  ;;  %vm1867_vm3 = vcmp.eq.s32.totalorder %v6497_v20, %v1865_v2 }
 0xabb   :  { %5302 = vmatpush3.msra.mxu0 %v6434_v3 }
 0xabc   :  { %5303 = vmatprep.subr.mxu0 %v6438_v5 }
 0xabd   :  { %5304 = vmatpush3.msra.mxu0 %v6438_v5 }
 0xabe   :  { %5305 = vmatprep.subr.mxu0 %v6442_v6 }
 0xabf   :  { %5306 = vmatpush3.msra.mxu0 %v6442_v6 }
 0xac0   :  { %5307 = vmatprep.subr.mxu0 %v6446_v7 }
 0xac1   :  { %5308 = vmatpush3.msra.mxu0 %v6446_v7 }
 0xac2   :  { %5309 = vmatprep.subr.mxu0 %v6450_v8 }
 0xac3   :  { %5310 = vmatpush3.msra.mxu0 %v6450_v8 }
 0xac4   :  { %5311 = vmatprep.subr.mxu0 %v6454_v9 }
 0xac5   :  { %5312 = vmatpush3.msra.mxu0 %v6454_v9 }
 0xac6   :  { %5313 = vmatprep.subr.mxu0 %v6458_v10 }
 0xac7   :  { %5314 = vmatpush3.msra.mxu0 %v6458_v10 }
 0xac8   :  { %5315 = vmatprep.subr.mxu0 %v6462_v11 }
 0xac9   :  { %5316 = vmatpush3.msra.mxu0 %v6462_v11 }
 0xaca   :  { %5317 = vmatprep.subr.mxu0 %v6466_v12 }
 0xacb   :  { %5318 = vmatpush3.msra.mxu0 %v6466_v12  ;;  %v1975_v12 = vld [vmem:[#allocation14 + $0x18] sm:$0xff] }
 0xacc   :  { %5319 = vmatprep.subr.mxu0 %v6470_v13 }
 0xacd   :  { %5320 = vmatpush3.msra.mxu0 %v6470_v13  ;;  %v1974_v13 = vld [vmem:[#allocation14 + $0x10] sm:$0xff] }
 0xace   :  { %5321 = vmatprep.subr.mxu0 %v6474_v14 }
 0xacf   :  { %5322 = vmatpush3.msra.mxu0 %v6474_v14  ;;  %v1973_v14 = vld [vmem:[#allocation14 + $0x8] sm:$0xff] }
 0xad0   :  { %5323 = vmatprep.subr.mxu0 %v6478_v15 }
 0xad1   :  { %5324 = vmatpush3.msra.mxu0 %v6478_v15  ;;  %v1972_v15 = vld [vmem:[#allocation14] sm:$0xff] }
 0xad2   :  { %5325 = vmatprep.subr.mxu0 %v6482_v16 }
 0xad3   :  { %5326 = vmatpush3.msra.mxu0 %v6482_v16  ;;  %v1979_v16 = vld [vmem:[#allocation16 + $0x18] sm:$0xff] }
 0xad4   :  { %5327 = vmatprep.subr.mxu0 %v6486_v17 }
 0xad5   :  { %5328 = vmatpush3.msra.mxu0 %v6486_v17 }
 0xad6   :  { %5329 = vmatprep.subr.mxu0 %v6490_v18 }
 0xad7   :  { %5330 = vmatpush3.msra.mxu0 %v6490_v18 }
 0xad8   :  { %5332 = vmatmul.mubr.msk.f32.vlgmr.msra.gmra.mxu0 %vm1867_vm3, %v6210_v22  ;;  %5334 = vmatprep.subr.mxu0 %v1975_v12 }
 0xad9   :  { %5335 = vmatpush3.msra.mxu0 %v1975_v12 }
 0xada   :  { %5336 = vmatprep.subr.mxu0 %v1974_v13 }
 0xadb   :  { %5337 = vmatpush3.msra.mxu0 %v1974_v13 }
 0xadc   :  { %5338 = vmatprep.subr.mxu0 %v1973_v14 }
 0xadd   :  { %5339 = vmatpush3.msra.mxu0 %v1973_v14 }
 0xade   :  { %5340 = vmatprep.subr.mxu0 %v1972_v15 }
 0xadf   :  { %5341 = vmatpush3.msra.mxu0 %v1972_v15  ;;  %v374_v15 = vand.u32 7, %v6497_v20 }
 0xae0   :  { %5345 = vmatprep.subr.mxu0 %v1979_v16 }
 0xb78   :  { %v6749_v3 = vpop.f32.mrf.mxu0 }
 0xb7a   :  { %v6751_v5 = vpop.f32.mrf.mxu0 }
 0xb98   :  { %v6753_v6 = vpop.f32.mrf.mxu0 }
 0xb99   :  { %v1949_v7 = vmul.f32 %v6753_v6, %v6753_v6 }
 0xb9a   :  { %v6757_v8 = vpop.f32.mrf.mxu0 }
 0xb9b   :  { %v1953_v9 = vsel %vm486_vm2, %v1949_v7, 0.0  ;;  %v1948_v10 = vmul.f32 %v6757_v8, %v6757_v8 }
 0xb9c   :  { %1954 = vadd.xlane.f32.xlu0 %v1953_v9 }
 0xb9d   :  { %v1950_v11 = vsel %vm486_vm2, %v1948_v10, 0.0 }
 0xb9e   :  { %1951 = vadd.xlane.f32.xlu1 %v1950_v11 }
 0xc25   :  { %v1955_v17 = vpop.xlane.xlu0 %1954 }
 0xc26   :  { %v1957_v18 = vmul.f32 0.03125, %v1955_v17  ;;  %v375_v17 = vand.u32 7, %v6609_v40 }
 0xc27   :  { %v1952_v22 = vpop.xlane.xlu1 %1951 }
 0xc28   :  { %v1959_v35 = vadd.f32 1e-06, %v1957_v18  ;;  %v1956_v24 = vmul.f32 0.03125, %v1952_v22  ;;  %vm377_vm5 = vcmp.le.s32.totalorder %v374_v15, %v375_v17 }
 0xc29   :  { %vm379_vm7 = vmand %vm6623_vm14, %vm377_vm5 }
 0xc2a   :  { %5693 = vrsqrt.f32 %v1959_v35  ;;  %v1958_v36 = vadd.f32 1e-06, %v1956_v24  ;;  %v6850_v24 = vsel %vm379_vm7, 0.0, %v6212_v52 }
 0xc2c   :  { %5695 = vrsqrt.f32 %v1958_v36 }
 0xc37   :  { %v5694_v25 = vpop.eup %5693 }
 0xc38   :  { %v1963_v43 = vmul.f32 %v5694_v25, %v6753_v6 }
 0xc39   :  { %v5696_v4 = vpop.eup %5695 }
 0xc3a   :  { %v1962_v26 = vmul.f32 %v5696_v4, %v6757_v8  ;;  %v1971_v44 = vmul.f32 %v4788_v29, %v1963_v43 }
 0xc3c   :  { %v1970_v46 = vmul.f32 %v4788_v29, %v1962_v26 }
 0xc3e   :  { %5342 = vmatprep.mubr.msk.f32.mxu0 %vm486_vm2, %v1970_v46 }
 0xc3f   :  { %5343 = vmatmul.mubr.msk.f32.vlgmr.msra.gmra.mxu0 %vm486_vm2, %v1971_v44 }
 0xc40   :  { %5346 = vmatpush3.msra.mxu0 %v1979_v16  ;;  %5353 = vmatprep.mubr.msk.f32.mxu0 %vm486_vm2, %v1970_v46  ;;  %v376_v16 = vand.u32 7, %v6613_v42 }
 0xc41   :  { %5347 = vmatprep.subr.mxu0 %v1978_v38 }
 0xc42   :  { %5348 = vmatpush3.msra.mxu0 %v1978_v38  ;;  %vm378_vm4 = vcmp.le.s32.totalorder %v374_v15, %v376_v16 }
 0xc43   :  { %5349 = vmatprep.subr.mxu0 %v1977_v37  ;;  %vm380_vm6 = vmand %vm6619_vm13, %vm378_vm4 }
 0xc44   :  { %5350 = vmatpush3.msra.mxu0 %v1977_v37  ;;  %v6847_v18 = vsel %vm380_vm6, 0.0, %v6212_v52 }
 0xc45   :  { %5351 = vmatprep.subr.mxu0 %v1976_v39 }
 0xc46   :  { %5352 = vmatpush3.msra.mxu0 %v1976_v39 }
 0xc47   :  { %5354 = vmatmul.mubr.msk.f32.vlgmr.msra.gmra.mxu0 %vm486_vm2, %v1971_v44  ;;  %5356 = vmatprep.subr.mxu0 %v1983_v45 }
 0xc48   :  { %5357 = vmatpush3.msra.mxu0 %v1983_v45  ;;  %5364 = vmatprep.mubr.msk.f32.mxu0 %vm486_vm2, %v1970_v46 }
 0xc49   :  { %5358 = vmatprep.subr.mxu0 %v1982_v28 }
 0xc4a   :  { %5359 = vmatpush3.msra.mxu0 %v1982_v28 }
 0xc4b   :  { %5360 = vmatprep.subr.mxu0 %v1981_v34 }
 0xc4c   :  { %5361 = vmatpush3.msra.mxu0 %v1981_v34 }
 0xc4d   :  { %5362 = vmatprep.subr.mxu0 %v1980_v41 }
 0xc4e   :  { %5363 = vmatpush3.msra.mxu0 %v1980_v41 }
 0xc4f   :  { %5365 = vmatmul.mubr.msk.f32.vlgmr.msra.gmra.mxu0 %vm486_vm2, %v1971_v44 }
 0xcff   :  { %v6772_v62 = vpop.f32.mrf.mxu0 }
 0xd00   :  { %v2220_v33 = vmul.f32 %v6772_v62, %v6528_v57  ;;  %v2335_v60 = vmul.f32 %v6772_v62, %v6563_v23  ;;  %v2612_v13 = vmul.f32 %v6772_v62, %v6531_v58 }
 0xd01   :  { %v6774_v32 = vpop.f32.mrf.mxu0 }
 0xd02   :  { %v2219_v59 = vmul.f32 %v6528_v57, %v6774_v32  ;;  %v2334_v47 = vmul.f32 %v6563_v23, %v6774_v32  ;;  %v2611_v7 = vmul.f32 %v6531_v58, %v6774_v32 }
 0xd04   :  { %5371 = vmatprep.mubr.msk.f32.mxu1 %vm486_vm2, %v2219_v59  ;;  %5378 = vmatprep.mubr.msk.f32.mxu0 %vm486_vm2, %v2334_v47 }
 0xd07   :  { %v6782_v48 = vpop.f32.mrf.mxu0 }
 0xd08   :  { %v2222_v1 = vmul.f32 %v6782_v48, %v6528_v57  ;;  %v2337_v50 = vmul.f32 %v6782_v48, %v6563_v23  ;;  %v2614_v30 = vmul.f32 %v6782_v48, %v6531_v58 }
 0xd09   :  { %v6788_v51 = vpop.f32.mrf.mxu0 }
 0xd0a   :  { %v2221_v54 = vmul.f32 %v6528_v57, %v6788_v51  ;;  %v2336_v0 = vmul.f32 %v6563_v23, %v6788_v51  ;;  %5367 = vmatprep.subr.msk.mxu1 %vm486_vm2, %v2222_v1  ;;  %5374 = vmatprep.subr.msk.mxu0 %vm486_vm2, %v2337_v50  ;;  %v2613_v10 = vmul.f32 %v6531_v58, %v6788_v51 }
 0xd0b   :  { %5368 = vmatpush3.xpose.msk.msra.mxu1 %vm486_vm2, %v2222_v1  ;;  %5375 = vmatpush3.xpose.msk.msra.mxu0 %vm486_vm2, %v2337_v50 }
 0xd0c   :  { %5369 = vmatprep.subr.msk.mxu1 %vm486_vm2, %v2221_v54  ;;  %5376 = vmatprep.subr.msk.mxu0 %vm486_vm2, %v2336_v0 }
 0xd0f   :  { %v6802_v55 = vpop.f32.mrf.mxu0  ;;  %5370 = vmatpush3.xpose.msk.msra.mxu1 %vm486_vm2, %v2221_v54  ;;  %5377 = vmatpush3.xpose.msk.msra.mxu0 %vm486_vm2, %v2336_v0 }
 0xd10   :  { %v2448_v53 = vmul.f32 %v6802_v55, %v6563_v23  ;;  %5395 = vmatprep.subr.msk.mxu0 %vm486_vm2, %v2614_v30  ;;  %v6828_v11 = vmul.f32 %v6802_v55, %v6528_v57  ;;  %v2923_v12 = vmul.f32 %v6802_v55, %v6569_v27 }
 0xd11   :  { %v6813_v2 = vpop.f32.mrf.mxu0 }
 0xd12   :  { %5372 = vmatmul.mubr.msk.f32.vlgmr.msra.gmra.mxu1 %vm486_vm2, %v2220_v33  ;;  %5381 = vmatprep.subr.mxu1 %v2448_v53  ;;  %v2447_v9 = vmul.f32 %v6563_v23, %v6813_v2  ;;  %v2922_v14 = vmul.f32 %v6569_v27, %v6813_v2 }
 0xd13   :  { %5379 = vmatmul.mubr.msk.f32.vlgmr.msra.gmra.mxu0 %vm486_vm2, %v2335_v60  ;;  %5382 = vmatpush3.msra.mxu1 %v2448_v53 }
 0xd14   :  { %5396 = vmatpush3.xpose.msk.msra.mxu0 %vm486_vm2, %v2614_v30  ;;  %5399 = vmatprep.mubr.msk.f32.mxu0 %vm486_vm2, %v2611_v7 }
 0xd15   :  { %5383 = vmatprep.subr.mxu1 %v2447_v9  ;;  %5397 = vmatprep.subr.msk.mxu0 %vm486_vm2, %v2613_v10 }
 0xd16   :  { %5384 = vmatpush3.msra.mxu1 %v2447_v9 }
 0xd17   :  { %5388 = vmatprep.subr.mxu1 %v6828_v11 }
 0xd18   :  { %5398 = vmatpush3.xpose.msk.msra.mxu0 %vm486_vm2, %v2613_v10 }
 0xd19   :  { %5416 = vmatprep.subr.mxu0 %v2923_v12 }
 0xd1b   :  { %5400 = vmatmul.mubr.msk.f32.vlgmr.msra.gmra.mxu0 %vm486_vm2, %v2612_v13 }
 0xd1c   :  { %5417 = vmatpush3.msra.mxu0 %v2923_v12 }
 0xd1d   :  { %5418 = vmatprep.subr.mxu0 %v2922_v14 }
 0xd1e   :  { %5419 = vmatpush3.msra.mxu0 %v2922_v14 }
 0xdd2   :  { %v5373_v22 = vpop.f32.mrf.mxu1 }
 0xdd3   :  { %v5380_v35 = vpop.f32.mrf.mxu0  ;;  %v2307_v25 = vadd.f32 %v5373_v22, %v6847_v18 }
 0xdd4   :  { %v2422_v42 = vadd.f32 %v5380_v35, %v6847_v18  ;;  %v2301_v36 = vpop.f32.mrf.mxu1 }
 0xdd5   :  { %v2416_v40 = vpop.f32.mrf.mxu0  ;;  %v2302_v19 = vadd.f32 %v2301_v36, %v6850_v24  ;;  %v2313_v29 = vsel %vm848_vm15, %v2307_v25, -inf }
 0xdd6   :  { %v2417_v49 = vadd.f32 %v2416_v40, %v6850_v24  ;;  %v2428_v4 = vsel %vm848_vm15, %v2422_v42, -inf }
 0xdd7   :  { %2429 = vmax.xlane.f32.xlu0 %v2428_v4  ;;  %v2310_v46 = vsel %vm848_vm15, %v2302_v19, -inf }
 0xdd8   :  { %v2425_v43 = vsel %vm848_vm15, %v2417_v49, -inf }
 0xdd9   :  { %2426 = vmax.xlane.f32.xlu1 %v2425_v43 }
 0xddb   :  { %2314 = vmax.xlane.f32.xlu0 %v2313_v29  ;;  %v5401_v52 = vpop.f32.mrf.mxu0 }
 0xddc   :  { %v2699_v26 = vadd.f32 %v5401_v52, %v6847_v18 }
 0xddd   :  { %v2693_v44 = vpop.f32.mrf.mxu0  ;;  %2311 = vmax.xlane.f32.xlu1 %v2310_v46 }
 0xdde   :  { %v2694_v38 = vadd.f32 %v2693_v44, %v6850_v24  ;;  %v2705_v37 = vsel %vm848_vm15, %v2699_v26, -inf }
 0xddf   :  { %2706 = vmax.xlane.f32.xlu0 %v2705_v37 }
 0xde0   :  { %v2702_v39 = vsel %vm848_vm15, %v2694_v38, -inf }
 0xde1   :  { %2703 = vmax.xlane.f32.xlu1 %v2702_v39 }
 0xe60   :  { %v2430_v45 = vpop.xlane.xlu0 %2429 }
 0xe61   :  { %v2432_v28 = vsub.f32 %v2422_v42, %v2430_v45 }
 0xe62   :  { %v2427_v34 = vpop.xlane.xlu1 %2426 }
 0xe63   :  { %v2435_v41 = vmul.f32 1.442695, %v2432_v28  ;;  %v2431_v59 = vsub.f32 %v2417_v49, %v2427_v34  ;;  %v2332_v28 = vmul.f32 %v6528_v57, %v6813_v2 }
 0xe64   :  { %v2315_v47 = vpop.xlane.xlu0 %2314 }
 0xe65   :  { %5697 = vpow2.f32 %v2435_v41  ;;  %v2433_v1 = vmul.f32 1.442695, %v2431_v59  ;;  %v2317_v50 = vsub.f32 %v2307_v25, %v2315_v47  ;;  %v2725_v41 = vmul.f32 %v6802_v55, %v6531_v58 }
 0xe66   :  { %v2312_v54 = vpop.xlane.xlu1 %2311  ;;  %v2809_v55 = vmul.f32 %v6569_v27, %v6774_v32  ;;  %v2810_v32 = vmul.f32 %v6772_v62, %v6569_v27 }
 0xe67   :  { %5699 = vpow2.f32 %v2433_v1  ;;  %v2320_v0 = vmul.f32 1.442695, %v2317_v50  ;;  %v2316_v30 = vsub.f32 %v2302_v19, %v2312_v54  ;;  %v2724_v50 = vmul.f32 %v6531_v58, %v6813_v2 }
 0xe68   :  { %v2707_v33 = vpop.xlane.xlu0 %2706 }
 0xe69   :  { %5701 = vpow2.f32 %v2320_v0  ;;  %v2318_v53 = vmul.f32 1.442695, %v2316_v30  ;;  %v2709_v60 = vsub.f32 %v2699_v26, %v2707_v33  ;;  %v2811_v30 = vmul.f32 %v6569_v27, %v6788_v51 }
 0xe6a   :  { %v2704_v7 = vpop.xlane.xlu1 %2703 }
 0xe6b   :  { %5703 = vpow2.f32 %v2318_v53  ;;  %v2712_v9 = vmul.f32 1.442695, %v2709_v60  ;;  %v2708_v10 = vsub.f32 %v2694_v38, %v2704_v7 }
 0xe6d   :  { %5705 = vpow2.f32 %v2712_v9  ;;  %v2710_v12 = vmul.f32 1.442695, %v2708_v10 }
 0xe6f   :  { %5707 = vpow2.f32 %v2710_v12 }
 0xe72   :  { %v5698_v13 = vpop.eup %5697 }
 0xe73   :  { %v2440_v14 = vsel %vm848_vm15, %v5698_v13, 0.0 }
 0xe74   :  { %v5700_v15 = vpop.eup %5699  ;;  %2441 = vadd.xlane.f32.xlu0 %v2440_v14 }
 0xe75   :  { %v2437_v16 = vsel %vm848_vm15, %v5700_v15, 0.0 }
 0xe76   :  { %v5702_v17 = vpop.eup %5701  ;;  %2438 = vadd.xlane.f32.xlu1 %v2437_v16 }
 0xe77   :  { %v2325_v22 = vsel %vm848_vm15, %v5702_v17, 0.0 }
 0xe78   :  { %v5704_v35 = vpop.eup %5703  ;;  %2326 = vadd.xlane.f32.xlu0 %v2325_v22 }
 0xe79   :  { %v2322_v42 = vsel %vm848_vm15, %v5704_v35, 0.0 }
 0xe7a   :  { %v5706_v36 = vpop.eup %5705  ;;  %2323 = vadd.xlane.f32.xlu1 %v2322_v42 }
 0xe7b   :  { %v2717_v40 = vsel %vm848_vm15, %v5706_v36, 0.0 }
 0xe7c   :  { %v5708_v25 = vpop.eup %5707  ;;  %2718 = vadd.xlane.f32.xlu0 %v2717_v40 }
 0xe7d   :  { %v2714_v49 = vsel %vm848_vm15, %v5708_v25, 0.0 }
 0xe7e   :  { %2715 = vadd.xlane.f32.xlu1 %v2714_v49 }
 0xefd   :  { %v2442_v4 = vpop.xlane.xlu0 %2441 }
 0xefe   :  { %5709 = vrcp.f32 %v2442_v4 }
 0xeff   :  { %v2439_v19 = vpop.xlane.xlu1 %2438 }
 0xf00   :  { %5711 = vrcp.f32 %v2439_v19 }
 0xf01   :  { %v2327_v43 = vpop.xlane.xlu0 %2326 }
 0xf02   :  { %5713 = vrcp.f32 %v2327_v43 }
 0xf03   :  { %v2324_v29 = vpop.xlane.xlu1 %2323 }
 0xf04   :  { %5715 = vrcp.f32 %v2324_v29 }
 0xf05   :  { %v2719_v52 = vpop.xlane.xlu0 %2718 }
 0xf06   :  { %5717 = vrcp.f32 %v2719_v52 }
 0xf07   :  { %v2716_v26 = vpop.xlane.xlu1 %2715 }
 0xf08   :  { %5719 = vrcp.f32 %v2716_v26 }
 0xf0b   :  { %v5710_v46 = vpop.eup %5709 }
 0xf0c   :  { %v2446_v37 = vmul.f32 %v5710_v46, %v5698_v13 }
 0xf0d   :  { %v5712_v44 = vpop.eup %5711 }
 0xf0e   :  { %v2445_v38 = vmul.f32 %v5712_v44, %v5700_v15 }
 0xf0f   :  { %v5714_v39 = vpop.eup %5713 }
 0xf10   :  { %5385 = vmatprep.mubr.msk.f32.mxu1 %vm848_vm15, %v2445_v38  ;;  %v2331_v59 = vmul.f32 %v5714_v39, %v5702_v17  ;;  %v1986_v39 = vld [vmem:[#allocation19 + $0x10] sm:$0xff] }
 0xf11   :  { %v5716_v45 = vpop.eup %5715  ;;  %5386 = vmatmul.mubr.msk.f32.vlgmr.msra.gmra.mxu1 %vm848_vm15, %v2446_v37 }
 0xf12   :  { %5389 = vmatpush3.msra.mxu1 %v6828_v11  ;;  %v2330_v34 = vmul.f32 %v5716_v45, %v5704_v35  ;;  %v2812_v11 = vmul.f32 %v6782_v48, %v6569_v27  ;;  %v1985_v45 = vld [vmem:[#allocation19 + $0x8] sm:$0xff] }
 0xf13   :  { %5390 = vmatprep.subr.mxu1 %v2332_v28  ;;  %v5718_v47 = vpop.eup %5717 }
 0xf14   :  { %5391 = vmatpush3.msra.mxu1 %v2332_v28  ;;  %5392 = vmatprep.mubr.msk.f32.mxu1 %vm848_vm15, %v2330_v34  ;;  %v2723_v0 = vmul.f32 %v5718_v47, %v5706_v36  ;;  %v1984_v28 = vld [vmem:[#allocation19] sm:$0xff]  ;;  %v3122_v34 = vld [vmem:[#allocation22 + $0x18] sm:$0xff] }
 0xf15   :  { %v5720_v1 = vpop.eup %5719  ;;  %5402 = vmatprep.subr.mxu1 %v2725_v41  ;;  %5393 = vmatmul.mubr.msk.f32.vlgmr.msra.gmra.mxu1 %vm848_vm15, %v2331_v59 }
 0xf16   :  { %5403 = vmatpush3.msra.mxu1 %v2725_v41  ;;  %v2722_v54 = vmul.f32 %v5720_v1, %v5708_v25 }
 0xf17   :  { %5404 = vmatprep.subr.mxu1 %v2724_v50 }
 0xf18   :  { %5405 = vmatpush3.msra.mxu1 %v2724_v50  ;;  %5406 = vmatprep.mubr.msk.f32.mxu1 %vm848_vm15, %v2722_v54 }
 0xf19   :  { %5409 = vmatprep.subr.msk.mxu1 %vm486_vm2, %v2812_v11  ;;  %5407 = vmatmul.mubr.msk.f32.vlgmr.msra.gmra.mxu1 %vm848_vm15, %v2723_v0 }
 0xf1a   :  { %5410 = vmatpush3.xpose.msk.msra.mxu1 %vm486_vm2, %v2812_v11  ;;  %5413 = vmatprep.mubr.msk.f32.mxu1 %vm486_vm2, %v2809_v55 }
 0xf1b   :  { %5411 = vmatprep.subr.msk.mxu1 %vm486_vm2, %v2811_v30 }
 0xf1e   :  { %5412 = vmatpush3.xpose.msk.msra.mxu1 %vm486_vm2, %v2811_v30 }
 0xf21   :  { %5414 = vmatmul.mubr.msk.f32.vlgmr.msra.gmra.mxu1 %vm486_vm2, %v2810_v32 }
 0xfd1   :  { %v5387_v48 = vpop.f32.mrf.mxu1 }
 0xfd3   :  { %v2521_v2 = vpop.f32.mrf.mxu1 }
 0xfd5   :  { %v5394_v51 = vpop.f32.mrf.mxu1 }
 0xfd6   :  { %v2608_v33 = vadd.f32 %v5394_v51, %v5387_v48 }
 0xfd7   :  { %v2602_v53 = vpop.f32.mrf.mxu1 }
 0xfd8   :  { %v2603_v60 = vadd.f32 %v2602_v53, %v2521_v2  ;;  %v4783_v2 = vld [vmem:[%s7189_s2] ss:$0 sm:$0xff] }
 0xfd9   :  { %v5408_v7 = vpop.f32.mrf.mxu1 }
 0xfda   :  { %v6897_v9 = vadd.f32 %v5408_v7, %v2608_v33  ;;  %v3121_v33 = vld [vmem:[#allocation22 + $0x10] sm:$0xff] }
 0xfdb   :  { %v2798_v10 = vpop.f32.mrf.mxu1 }
 0xfdc   :  { %v6899_v12 = vadd.f32 %v2798_v10, %v2603_v60  ;;  %v3120_v60 = vld [vmem:[#allocation22 + $0x8] sm:$0xff]  ;;  %v3119_v10 = vld [vmem:[#allocation22] sm:$0xff] }
 0xfe1   :  { %v5415_v13 = vpop.f32.mrf.mxu1 }
 0xfe2   :  { %v2897_v14 = vadd.f32 %v5415_v13, %v6847_v18  ;;  %v1832_v18 = vadd.f32 %v6749_v3, %v6693_v21  ;;  %v1987_v21 = vld [vmem:[#allocation19 + $0x18] sm:$0xff] }
 0xfe3   :  { %v2891_v15 = vpop.f32.mrf.mxu1  ;;  %5423 = vmatprep.subr.mxu0 %v1987_v21 }
 0xfe4   :  { %v2892_v62 = vadd.f32 %v2891_v15, %v6850_v24  ;;  %v2903_v16 = vsel %vm848_vm15, %v2897_v14, -inf  ;;  %v1831_v24 = vadd.f32 %v6751_v5, %v6696_v31  ;;  %v1835_v19 = vmul.f32 %v1832_v18, %v1832_v18 }
 0xfe5   :  { %2904 = vmax.xlane.f32.xlu0 %v2903_v16 }
 0xfe6   :  { %v2900_v17 = vsel %vm848_vm15, %v2892_v62, -inf  ;;  %v1834_v52 = vmul.f32 %v1831_v24, %v1831_v24  ;;  %v1839_v26 = vsel %vm486_vm2, %v1835_v19, 0.0 }
 0xfe7   :  { %2901 = vmax.xlane.f32.xlu1 %v2900_v17 }
 0xfe8   :  { %v1836_v46 = vsel %vm486_vm2, %v1834_v52, 0.0 }
0x106e   :  { %v2905_v22 = vpop.xlane.xlu0 %2904 }
0x106f   :  { %v2907_v35 = vsub.f32 %v2897_v14, %v2905_v22 }
0x1070   :  { %v2902_v42 = vpop.xlane.xlu1 %2901 }
0x1071   :  { %v2910_v36 = vmul.f32 1.442695, %v2907_v35  ;;  %v2906_v40 = vsub.f32 %v2892_v62, %v2902_v42 }
0x1073   :  { %5721 = vpow2.f32 %v2910_v36  ;;  %v2908_v25 = vmul.f32 1.442695, %v2906_v40  ;;  %v3118_v36 = vld [vmem:[#allocation20 + $0x18] sm:$0xff]  ;;  %v3117_v40 = vld [vmem:[#allocation20 + $0x10] sm:$0xff] }
0x1074   :  { %5434 = vmatprep.subr.mxu1 %v3118_v36 }
0x1075   :  { %5723 = vpow2.f32 %v2908_v25  ;;  %5435 = vmatpush3.msra.mxu1 %v3118_v36  ;;  %v3116_v25 = vld [vmem:[#allocation20 + $0x8] sm:$0xff] }
0x1076   :  { %5436 = vmatprep.subr.mxu1 %v3117_v40 }
0x1077   :  { %5437 = vmatpush3.msra.mxu1 %v3117_v40 }
0x1078   :  { %5438 = vmatprep.subr.mxu1 %v3116_v25 }
0x1079   :  { %5439 = vmatpush3.msra.mxu1 %v3116_v25 }
0x1080   :  { %v5722_v49 = vpop.eup %5721 }
0x1081   :  { %v2915_v4 = vsel %vm848_vm15, %v5722_v49, 0.0 }
0x1082   :  { %v5724_v43 = vpop.eup %5723  ;;  %2916 = vadd.xlane.f32.xlu0 %v2915_v4 }
0x1083   :  { %v2912_v29 = vsel %vm848_vm15, %v5724_v43, 0.0 }
0x1084   :  { %2913 = vadd.xlane.f32.xlu1 %v2912_v29 }
0x1086   :  { %1840 = vadd.xlane.f32.xlu0 %v1839_v26 }
0x1088   :  { %1837 = vadd.xlane.f32.xlu1 %v1836_v46 }
0x110b   :  { %v2917_v3 = vpop.xlane.xlu0 %2916 }
0x110c   :  { %5725 = vrcp.f32 %v2917_v3  ;;  %v4821_v3 = vld [vmem:[%s7190_s25] ss:$0 sm:$0xff] }
0x110d   :  { %v2914_v31 = vpop.xlane.xlu1 %2913 }
0x110e   :  { %5727 = vrcp.f32 %v2914_v31 }
0x110f   :  { %v1841_v47 = vpop.xlane.xlu0 %1840 }
0x1110   :  { %v1843_v50 = vmul.f32 0.03125, %v1841_v47 }
0x1111   :  { %v1838_v41 = vpop.xlane.xlu1 %1837 }
0x1112   :  { %v1842_v59 = vmul.f32 0.03125, %v1838_v41  ;;  %v1845_v54 = vadd.f32 1e-06, %v1843_v50 }
0x1114   :  { %v1844_v1 = vadd.f32 1e-06, %v1842_v59 }
0x1116   :  { %5729 = vrsqrt.f32 %v1844_v1 }
0x1117   :  { %5731 = vrsqrt.f32 %v1845_v54 }
0x1119   :  { %v5726_v5 = vpop.eup %5725 }
0x111a   :  { %v2921_v37 = vmul.f32 %v5726_v5, %v5722_v49 }
0x111b   :  { %v5728_v44 = vpop.eup %5727 }
0x111c   :  { %v2920_v38 = vmul.f32 %v5728_v44, %v5724_v43 }
0x111e   :  { %5420 = vmatprep.mubr.msk.f32.mxu0 %vm848_vm15, %v2920_v38  ;;  %v3125_v38 = vld [vmem:[#allocation23 + $0x10] sm:$0xff] }
0x111f   :  { %5421 = vmatmul.mubr.msk.f32.vlgmr.msra.gmra.mxu0 %vm848_vm15, %v2921_v37  ;;  %v3124_v37 = vld [vmem:[#allocation23 + $0x8] sm:$0xff] }
0x1120   :  { %5424 = vmatpush3.msra.mxu0 %v1987_v21 }
0x1121   :  { %5425 = vmatprep.subr.mxu0 %v1986_v39 }
0x1122   :  { %5426 = vmatpush3.msra.mxu0 %v1986_v39  ;;  %v3123_v39 = vld [vmem:[#allocation23] sm:$0xff] }
0x1123   :  { %5427 = vmatprep.subr.mxu0 %v1985_v45  ;;  %v5730_v11 = vpop.eup %5729 }
0x1124   :  { %5428 = vmatpush3.msra.mxu0 %v1985_v45  ;;  %v1848_v55 = vmul.f32 %v5730_v11, %v1831_v24  ;;  %v5732_v51 = vpop.eup %5731  ;;  %v3126_v24 = vld [vmem:[#allocation23 + $0x18] sm:$0xff] }
0x1125   :  { %5429 = vmatprep.subr.mxu0 %v1984_v28  ;;  %v1849_v7 = vmul.f32 %v5732_v51, %v1832_v18  ;;  %v3115_v18 = vld [vmem:[#allocation20] sm:$0xff] }
0x1126   :  { %5430 = vmatpush3.msra.mxu0 %v1984_v28  ;;  %v6919_v53 = vmul.f32 %v4783_v2, %v1848_v55  ;;  %5440 = vmatprep.subr.mxu1 %v3115_v18 }
0x1127   :  { %5445 = vmatprep.subr.mxu0 %v3122_v34  ;;  %5441 = vmatpush3.msra.mxu1 %v3115_v18 }
0x1128   :  { %5456 = vmatprep.subr.mxu1 %v3126_v24 }
0x11df   :  { %v5422_v0 = vpop.f32.mrf.mxu0 }
0x11e0   :  { %v3006_v48 = vadd.f32 %v5422_v0, %v6897_v9  ;;  %v6924_v9 = vmul.f32 %v4783_v2, %v1849_v7 }
0x11e1   :  { %v2996_v30 = vpop.f32.mrf.mxu0 }
0x11e2   :  { %v3005_v32 = vadd.f32 %v2996_v30, %v6899_v12 }
0x11e4   :  { %5431 = vmatprep.mubr.msk.f32.mxu0 %vm486_vm2, %v3005_v32 }
0x11e5   :  { %5432 = vmatmul.mubr.msk.f32.vlgmr.msra.gmra.mxu0 %vm486_vm2, %v3006_v48 }
0x11e6   :  { %5446 = vmatpush3.msra.mxu0 %v3122_v34  ;;  %5453 = vmatprep.mubr.msk.f32.mxu0 %vm486_vm2, %v6919_v53 }
0x11e7   :  { %5447 = vmatprep.subr.mxu0 %v3121_v33 }
0x11e8   :  { %5448 = vmatpush3.msra.mxu0 %v3121_v33 }
0x11e9   :  { %5449 = vmatprep.subr.mxu0 %v3120_v60 }
0x11ea   :  { %5450 = vmatpush3.msra.mxu0 %v3120_v60 }
0x11eb   :  { %5451 = vmatprep.subr.mxu0 %v3119_v10 }
0x11ec   :  { %5452 = vmatpush3.msra.mxu0 %v3119_v10 }
0x11ed   :  { %5454 = vmatmul.mubr.msk.f32.vlgmr.msra.gmra.mxu0 %vm486_vm2, %v6924_v9 }
0x12a5   :  { %v5433_v12 = vpop.f32.mrf.mxu0 }
0x12a6   :  { %v6929_v13 = vadd.f32 %v5433_v12, %v6753_v6 }
0x12a7   :  { %v3079_v14 = vpop.f32.mrf.mxu0 }
0x12a8   :  { %v6932_v15 = vadd.f32 %v3079_v14, %v6757_v8  ;;  %v3092_v62 = vmul.f32 %v6929_v13, %v6929_v13 }
0x12aa   :  { %v3096_v16 = vsel %vm486_vm2, %v3092_v62, 0.0  ;;  %v3091_v17 = vmul.f32 %v6932_v15, %v6932_v15 }
0x12ab   :  { %3097 = vadd.xlane.f32.xlu0 %v3096_v16 }
0x12ac   :  { %v3093_v22 = vsel %vm486_vm2, %v3091_v17, 0.0 }
0x12ad   :  { %v6940_v35 = vpop.f32.mrf.mxu0  ;;  %3094 = vadd.xlane.f32.xlu1 %v3093_v22 }
0x12ae   :  { %v3371_v6 = vmul.f32 %v6940_v35, %v6528_v57  ;;  %v3486_v45 = vmul.f32 %v6940_v35, %v6563_v23  ;;  %v3763_v48 = vmul.f32 %v6940_v35, %v6531_v58 }
0x12af   :  { %v6944_v42 = vpop.f32.mrf.mxu0 }
0x12b0   :  { %v3370_v8 = vmul.f32 %v6528_v57, %v6944_v42  ;;  %5467 = vmatprep.subr.msk.mxu0 %vm486_vm2, %v3371_v6  ;;  %v3485_v28 = vmul.f32 %v6563_v23, %v6944_v42 }
0x12b1   :  { %5468 = vmatpush3.xpose.msk.msra.mxu0 %vm486_vm2, %v3371_v6 }
0x12b2   :  { %5469 = vmatprep.subr.msk.mxu0 %vm486_vm2, %v3370_v8 }
0x12b5   :  { %5470 = vmatpush3.xpose.msk.msra.mxu0 %vm486_vm2, %v3370_v8 }
0x1334   :  { %v3098_v49 = vpop.xlane.xlu0 %3097 }
0x1335   :  { %v3100_v4 = vmul.f32 0.03125, %v3098_v49 }
0x1336   :  { %v3095_v19 = vpop.xlane.xlu1 %3094 }
0x1337   :  { %v3102_v43 = vadd.f32 1e-06, %v3100_v4  ;;  %v3099_v29 = vmul.f32 0.03125, %v3095_v19 }
0x1339   :  { %5733 = vrsqrt.f32 %v3102_v43  ;;  %v3101_v52 = vadd.f32 1e-06, %v3099_v29 }
0x133b   :  { %5735 = vrsqrt.f32 %v3101_v52 }
0x1346   :  { %v5734_v26 = vpop.eup %5733 }
0x1347   :  { %v3106_v21 = vmul.f32 %v5734_v26, %v6929_v13 }
0x1348   :  { %v5736_v46 = vpop.eup %5735 }
0x1349   :  { %v3105_v31 = vmul.f32 %v5736_v46, %v6932_v15  ;;  %v3114_v44 = vmul.f32 %v4821_v3, %v3106_v21  ;;  %v3762_v46 = vmul.f32 %v6531_v58, %v6944_v42 }
0x134b   :  { %v3113_v5 = vmul.f32 %v4821_v3, %v3105_v31 }
0x134d   :  { %5442 = vmatprep.mubr.msk.f32.mxu1 %vm486_vm2, %v3113_v5 }
0x134e   :  { %5443 = vmatmul.mubr.msk.f32.vlgmr.msra.gmra.mxu1 %vm486_vm2, %v3114_v44 }
0x134f   :  { %5457 = vmatpush3.msra.mxu1 %v3126_v24  ;;  %5464 = vmatprep.mubr.msk.f32.mxu1 %vm486_vm2, %v6919_v53 }
0x1350   :  { %5458 = vmatprep.subr.mxu1 %v3125_v38 }
0x1351   :  { %5459 = vmatpush3.msra.mxu1 %v3125_v38 }
0x1352   :  { %5460 = vmatprep.subr.mxu1 %v3124_v37 }
0x1353   :  { %5461 = vmatpush3.msra.mxu1 %v3124_v37 }
0x1354   :  { %5462 = vmatprep.subr.mxu1 %v3123_v39 }
0x1355   :  { %5463 = vmatpush3.msra.mxu1 %v3123_v39 }
0x1356   :  { %5465 = vmatmul.mubr.msk.f32.vlgmr.msra.gmra.mxu1 %vm486_vm2, %v6924_v9  ;;  %5474 = vmatprep.subr.msk.mxu1 %vm486_vm2, %v3486_v45 }
0x1357   :  { %5475 = vmatpush3.xpose.msk.msra.mxu1 %vm486_vm2, %v3486_v45 }
0x1358   :  { %5476 = vmatprep.subr.msk.mxu1 %vm486_vm2, %v3485_v28 }
0x135b   :  { %5477 = vmatpush3.xpose.msk.msra.mxu1 %vm486_vm2, %v3485_v28 }
0x140e   :  { %v6969_v34 = vpop.f32.mrf.mxu1 }
0x140f   :  { %v3369_v1 = vmul.f32 %v6969_v34, %v6528_v57  ;;  %v3484_v50 = vmul.f32 %v6969_v34, %v6563_v23  ;;  %v3761_v3 = vmul.f32 %v6969_v34, %v6531_v58 }
0x1410   :  { %v6971_v41 = vpop.f32.mrf.mxu1 }
0x1411   :  { %v3368_v59 = vmul.f32 %v6528_v57, %v6971_v41  ;;  %v3483_v47 = vmul.f32 %v6563_v23, %v6971_v41  ;;  %v3760_v26 = vmul.f32 %v6531_v58, %v6971_v41 }
0x1413   :  { %5471 = vmatprep.mubr.msk.f32.mxu0 %vm486_vm2, %v3368_v59  ;;  %5478 = vmatprep.mubr.msk.f32.mxu1 %vm486_vm2, %v3483_v47 }
0x1414   :  { %5472 = vmatmul.mubr.msk.f32.vlgmr.msra.gmra.mxu0 %vm486_vm2, %v3369_v1  ;;  %5479 = vmatmul.mubr.msk.f32.vlgmr.msra.gmra.mxu1 %vm486_vm2, %v3484_v50 }
0x1416   :  { %v6985_v54 = vpop.f32.mrf.mxu1 }
0x1417   :  { %v3597_v11 = vmul.f32 %v6985_v54, %v6563_v23  ;;  %v3482_v0 = vmul.f32 %v6985_v54, %v6528_v57  ;;  %v7001_v2 = vmul.f32 %v6985_v54, %v6531_v58  ;;  %v4072_v21 = vmul.f32 %v6985_v54, %v6569_v27 }
0x1418   :  { %v6991_v55 = vpop.f32.mrf.mxu1 }
0x1419   :  { %5481 = vmatprep.subr.mxu0 %v3597_v11  ;;  %5488 = vmatprep.subr.mxu1 %v3482_v0  ;;  %v3596_v30 = vmul.f32 %v6563_v23, %v6991_v55  ;;  %v3481_v32 = vmul.f32 %v6528_v57, %v6991_v55  ;;  %v4071_v31 = vmul.f32 %v6569_v27, %v6991_v55 }
0x141a   :  { %5482 = vmatpush3.msra.mxu0 %v3597_v11  ;;  %5489 = vmatpush3.msra.mxu1 %v3482_v0 }
0x141b   :  { %5483 = vmatprep.subr.mxu0 %v3596_v30  ;;  %5490 = vmatprep.subr.mxu1 %v3481_v32 }
0x141c   :  { %5484 = vmatpush3.msra.mxu0 %v3596_v30  ;;  %5491 = vmatpush3.msra.mxu1 %v3481_v32 }
0x141d   :  { %5495 = vmatprep.subr.msk.mxu0 %vm486_vm2, %v3763_v48  ;;  %5502 = vmatprep.subr.mxu1 %v7001_v2 }
0x14d4   :  { %v5480_v23 = vpop.f32.mrf.mxu1  ;;  %v5473_v16 = vpop.f32.mrf.mxu0 }
0x14d5   :  { %v3571_v57 = vadd.f32 %v5480_v23, %v6633_v61  ;;  %v3456_v6 = vadd.f32 %v5473_v16, %v6633_v61 }
0x14d6   :  { %v3565_v51 = vpop.f32.mrf.mxu1  ;;  %v3450_v22 = vpop.f32.mrf.mxu0 }
0x14d7   :  { %v3566_v33 = vadd.f32 %v3565_v51, %v6635_v63  ;;  %v3577_v53 = vsel %vm848_vm15, %v3571_v57, -inf  ;;  %v3451_v40 = vadd.f32 %v3450_v22, %v6635_v63  ;;  %v3462_v18 = vsel %vm848_vm15, %v3456_v6, -inf }
0x14d8   :  { %3578 = vmax.xlane.f32.xlu0 %v3577_v53 }
0x14d9   :  { %v3574_v60 = vsel %vm848_vm15, %v3566_v33, -inf  ;;  %v3459_v24 = vsel %vm848_vm15, %v3451_v40, -inf }
0x14da   :  { %3575 = vmax.xlane.f32.xlu1 %v3574_v60 }
0x1561   :  { %v3579_v7 = vpop.xlane.xlu0 %3578 }
0x1562   :  { %v3581_v10 = vsub.f32 %v3571_v57, %v3579_v7 }
0x1563   :  { %v3576_v9 = vpop.xlane.xlu1 %3575 }
0x1564   :  { %v3584_v12 = vmul.f32 1.442695, %v3581_v10  ;;  %v3580_v14 = vsub.f32 %v3566_v33, %v3576_v9 }
0x1566   :  { %5737 = vpow2.f32 %v3584_v12  ;;  %v3582_v62 = vmul.f32 1.442695, %v3580_v14 }
0x1568   :  { %5739 = vpow2.f32 %v3582_v62 }
0x1573   :  { %v5738_v17 = vpop.eup %5737 }
0x1574   :  { %v3589_v8 = vsel %vm848_vm15, %v5738_v17, 0.0 }
0x1575   :  { %v5740_v36 = vpop.eup %5739  ;;  %3590 = vadd.xlane.f32.xlu0 %v3589_v8 }
0x1576   :  { %v3586_v25 = vsel %vm848_vm15, %v5740_v36, 0.0 }
0x1577   :  { %3587 = vadd.xlane.f32.xlu1 %v3586_v25 }
0x1579   :  { %3463 = vmax.xlane.f32.xlu0 %v3462_v18 }
0x157b   :  { %3460 = vmax.xlane.f32.xlu1 %v3459_v24 }
0x15fe   :  { %v3591_v49 = vpop.xlane.xlu0 %3590 }
0x15ff   :  { %5741 = vrcp.f32 %v3591_v49 }
0x1600   :  { %v3588_v4 = vpop.xlane.xlu1 %3587 }
0x1601   :  { %5743 = vrcp.f32 %v3588_v4 }
0x1602   :  { %v3464_v5 = vpop.xlane.xlu0 %3463 }
0x1603   :  { %v3466_v38 = vsub.f32 %v3456_v6, %v3464_v5 }
0x1604   :  { %v3461_v44 = vpop.xlane.xlu1 %3460 }
0x1605   :  { %v3465_v37 = vsub.f32 %v3451_v40, %v3461_v44  ;;  %v3469_v39 = vmul.f32 1.442695, %v3466_v38  ;;  %v3961_v40 = vmul.f32 %v6940_v35, %v6569_v27  ;;  %v3960_v35 = vmul.f32 %v6569_v27, %v6944_v42 }
0x1607   :  { %v3467_v45 = vmul.f32 1.442695, %v3465_v37  ;;  %5745 = vpow2.f32 %v3469_v39 }
0x1609   :  { %5747 = vpow2.f32 %v3467_v45 }
0x160c   :  { %v5742_v19 = vpop.eup %5741 }
0x160d   :  { %v3595_v52 = vmul.f32 %v5742_v19, %v5738_v17 }
0x160e   :  { %v5744_v43 = vpop.eup %5743 }
0x160f   :  { %v3594_v29 = vmul.f32 %v5744_v43, %v5740_v36  ;;  %v3873_v36 = vmul.f32 %v6531_v58, %v6991_v55  ;;  %v3958_v58 = vmul.f32 %v6569_v27, %v6971_v41  ;;  %v3959_v55 = vmul.f32 %v6969_v34, %v6569_v27 }
0x1611   :  { %5485 = vmatprep.mubr.msk.f32.mxu0 %vm848_vm15, %v3594_v29 }
0x1612   :  { %5486 = vmatmul.mubr.msk.f32.vlgmr.msra.gmra.mxu0 %vm848_vm15, %v3595_v52 }
0x1613   :  { %5496 = vmatpush3.xpose.msk.msra.mxu0 %vm486_vm2, %v3763_v48  ;;  %5499 = vmatprep.mubr.msk.f32.mxu0 %vm486_vm2, %v3760_v26 }
0x1614   :  { %5497 = vmatprep.subr.msk.mxu0 %vm486_vm2, %v3762_v46  ;;  %v5746_v0 = vpop.eup %5745 }
0x1615   :  { %v3474_v48 = vsel %vm848_vm15, %v5746_v0, 0.0 }
0x1616   :  { %v5748_v32 = vpop.eup %5747 }
0x1617   :  { %5498 = vmatpush3.xpose.msk.msra.mxu0 %vm486_vm2, %v3762_v46  ;;  %v3471_v23 = vsel %vm848_vm15, %v5748_v32, 0.0 }
0x1618   :  { %5516 = vmatprep.subr.mxu0 %v4072_v21 }
0x161a   :  { %5500 = vmatmul.mubr.msk.f32.vlgmr.msra.gmra.mxu0 %vm486_vm2, %v3761_v3 }
0x161b   :  { %5517 = vmatpush3.msra.mxu0 %v4072_v21 }
0x161c   :  { %5518 = vmatprep.subr.mxu0 %v4071_v31 }
0x161d   :  { %5519 = vmatpush3.msra.mxu0 %v4071_v31 }
0x16d2   :  { %v7032_v28 = vpop.f32.mrf.mxu0 }
0x16d4   :  { %v7034_v59 = vpop.f32.mrf.mxu0 }
0x16da   :  { %v5501_v47 = vpop.f32.mrf.mxu0 }
0x16db   :  { %v3848_v1 = vadd.f32 %v5501_v47, %v6633_v61  ;;  %v3130_v47 = vld [vmem:[#allocation25 + $0x18] sm:$0xff] }
0x16dc   :  { %v3842_v50 = vpop.f32.mrf.mxu0  ;;  %5523 = vmatprep.subr.mxu0 %v3130_v47 }
0x16dd   :  { %v3843_v54 = vadd.f32 %v3842_v50, %v6635_v63  ;;  %v3854_v11 = vsel %vm848_vm15, %v3848_v1, -inf }
0x16de   :  { %3855 = vmax.xlane.f32.xlu0 %v3854_v11 }
0x16df   :  { %v3851_v30 = vsel %vm848_vm15, %v3843_v54, -inf }
0x16e0   :  { %3852 = vmax.xlane.f32.xlu1 %v3851_v30 }
0x16e2   :  { %3475 = vadd.xlane.f32.xlu0 %v3474_v48  ;;  %v3128_v48 = vld [vmem:[#allocation25 + $0x8] sm:$0xff] }
0x16e4   :  { %3472 = vadd.xlane.f32.xlu1 %v3471_v23  ;;  %v3127_v23 = vld [vmem:[#allocation25] sm:$0xff] }
0x1767   :  { %v3856_v57 = vpop.xlane.xlu0 %3855 }
0x1768   :  { %v3858_v51 = vsub.f32 %v3848_v1, %v3856_v57 }
0x1769   :  { %v3853_v33 = vpop.xlane.xlu1 %3852 }
0x176a   :  { %v3861_v53 = vmul.f32 1.442695, %v3858_v51  ;;  %v3857_v60 = vsub.f32 %v3843_v54, %v3853_v33 }
0x176b   :  { %v3476_v7 = vpop.xlane.xlu0 %3475 }
0x176c   :  { %5749 = vpow2.f32 %v3861_v53  ;;  %v3859_v10 = vmul.f32 1.442695, %v3857_v60 }
0x176d   :  { %5751 = vrcp.f32 %v3476_v7  ;;  %v3473_v9 = vpop.xlane.xlu1 %3472 }
0x176e   :  { %5753 = vpow2.f32 %v3859_v10 }
0x176f   :  { %5755 = vrcp.f32 %v3473_v9 }
0x1779   :  { %v5750_v12 = vpop.eup %5749 }
0x177a   :  { %v5752_v14 = vpop.eup %5751  ;;  %v3866_v62 = vsel %vm848_vm15, %v5750_v12, 0.0 }
0x177b   :  { %v5754_v16 = vpop.eup %5753  ;;  %3867 = vadd.xlane.f32.xlu0 %v3866_v62  ;;  %v3480_v8 = vmul.f32 %v5752_v14, %v5746_v0 }
0x177c   :  { %v5756_v17 = vpop.eup %5755  ;;  %v3863_v22 = vsel %vm848_vm15, %v5754_v16, 0.0 }
0x177d   :  { %3864 = vadd.xlane.f32.xlu1 %v3863_v22  ;;  %v3479_v6 = vmul.f32 %v5756_v17, %v5748_v32  ;;  %v3129_v32 = vld [vmem:[#allocation25 + $0x10] sm:$0xff] }
0x177e   :  { %v4266_v22 = vld [vmem:[%s6353_s17 + $0x10] sm:$0xff] }
0x177f   :  { %5492 = vmatprep.mubr.msk.f32.mxu1 %vm848_vm15, %v3479_v6  ;;  %v4264_v6 = vld [vmem:[%s6353_s17] sm:$0xff] }
0x1780   :  { %5493 = vmatmul.mubr.msk.f32.vlgmr.msra.gmra.mxu1 %vm848_vm15, %v3480_v8  ;;  %v5787_v8 = vld [vmem:[#allocation2 + $0x78] sm:$0xff] }
0x1781   :  { %5503 = vmatpush3.msra.mxu1 %v7001_v2 }
0x1782   :  { %5504 = vmatprep.subr.mxu1 %v3873_v36 }
0x1783   :  { %5505 = vmatpush3.msra.mxu1 %v3873_v36  ;;  %v4275_v36 = vld [vmem:[%s6358_s14 + $0x38] sm:$0xff] }
0x1784   :  { %5509 = vmatprep.subr.msk.mxu1 %vm486_vm2, %v3961_v40 }
0x1804   :  { %v3868_v25 = vpop.xlane.xlu0 %3867 }
0x1805   :  { %5757 = vrcp.f32 %v3868_v25  ;;  %v4273_v25 = vld [vmem:[%s6358_s14 + $0x28] sm:$0xff] }
0x1806   :  { %v3865_v18 = vpop.xlane.xlu1 %3864 }
0x1807   :  { %5759 = vrcp.f32 %v3865_v18  ;;  %v4272_v18 = vld [vmem:[%s6358_s14 + $0x20] sm:$0xff] }
0x1812   :  { %v5758_v24 = vpop.eup %5757 }
0x1813   :  { %v3872_v19 = vmul.f32 %v5758_v24, %v5750_v12  ;;  %v4271_v24 = vld [vmem:[%s6358_s14 + $0x18] sm:$0xff] }
0x1814   :  { %v5760_v49 = vpop.eup %5759 }
0x1815   :  { %v3871_v4 = vmul.f32 %v5760_v49, %v5754_v16 }
0x1817   :  { %5506 = vmatprep.mubr.msk.f32.mxu1 %vm848_vm15, %v3871_v4 }
0x1818   :  { %5507 = vmatmul.mubr.msk.f32.vlgmr.msra.gmra.mxu1 %vm848_vm15, %v3872_v19 }
0x1819   :  { %5510 = vmatpush3.xpose.msk.msra.mxu1 %vm486_vm2, %v3961_v40  ;;  %5513 = vmatprep.mubr.msk.f32.mxu1 %vm486_vm2, %v3958_v58  ;;  %v4274_v40 = vld [vmem:[%s6358_s14 + $0x30] sm:$0xff] }
0x181a   :  { %5511 = vmatprep.subr.msk.mxu1 %vm486_vm2, %v3960_v35 }
0x181d   :  { %5512 = vmatpush3.xpose.msk.msra.mxu1 %vm486_vm2, %v3960_v35 }
0x1820   :  { %5514 = vmatmul.mubr.msk.f32.vlgmr.msra.gmra.mxu1 %vm486_vm2, %v3959_v55 }
0x1840   :  { %v5494_v41 = vpop.f32.mrf.mxu1 }
0x1841   :  { %v3757_v43 = vadd.f32 %v5494_v41, %v7032_v28 }
0x1842   :  { %v3751_v2 = vpop.f32.mrf.mxu1 }
0x1843   :  { %v3752_v57 = vadd.f32 %v3751_v2, %v7034_v59 }
0x18d8   :  { %v5508_v42 = vpop.f32.mrf.mxu1 }
0x18d9   :  { %v3957_v29 = vadd.f32 %v5508_v42, %v3757_v43 }
0x18da   :  { %v3947_v52 = vpop.f32.mrf.mxu1 }
0x18db   :  { %v3956_v33 = vadd.f32 %v3947_v52, %v3752_v57 }
0x18e0   :  { %v5515_v26 = vpop.f32.mrf.mxu1 }
0x18e1   :  { %v4046_v46 = vadd.f32 %v5515_v26, %v6633_v61 }
0x18e2   :  { %v4040_v21 = vpop.f32.mrf.mxu1 }
0x18e3   :  { %v4041_v3 = vadd.f32 %v4040_v21, %v6635_v63  ;;  %v4052_v31 = vsel %vm848_vm15, %v4046_v46, -inf  ;;  %v5789_v21 = vld [vmem:[#allocation2 + $0x68] sm:$0xff] }
0x18e4   :  { %4053 = vmax.xlane.f32.xlu0 %v4052_v31  ;;  %v5791_v31 = vld [vmem:[#allocation2 + $0x58] sm:$0xff] }
0x18e5   :  { %v4049_v27 = vsel %vm848_vm15, %v4041_v3, -inf }
0x18e6   :  { %4050 = vmax.xlane.f32.xlu1 %v4049_v27  ;;  %v5792_v27 = vld [vmem:[#allocation2 + $0x50] sm:$0xff] }
0x196d   :  { %v4054_v34 = vpop.xlane.xlu0 %4053 }
0x196e   :  { %v4056_v5 = vsub.f32 %v4046_v46, %v4054_v34  ;;  %v5788_v46 = vld [vmem:[#allocation2 + $0x70] sm:$0xff]  ;;  %v5793_v34 = vld [vmem:[#allocation2 + $0x48] sm:$0xff] }
0x196f   :  { %v4051_v44 = vpop.xlane.xlu1 %4050 }
0x1970   :  { %v4059_v38 = vmul.f32 1.442695, %v4056_v5  ;;  %v4055_v37 = vsub.f32 %v4041_v3, %v4051_v44  ;;  %v5790_v3 = vld [vmem:[#allocation2 + $0x60] sm:$0xff]  ;;  %v5795_v44 = vld [vmem:[#allocation2 + $0x38] sm:$0xff] }
0x1971   :  { %v5794_v5 = vld [vmem:[#allocation2 + $0x40] sm:$0xff] }
0x1972   :  { %5761 = vpow2.f32 %v4059_v38  ;;  %v4057_v39 = vmul.f32 1.442695, %v4055_v37  ;;  %v5796_v38 = vld [vmem:[#allocation2 + $0x30] sm:$0xff]  ;;  %v5797_v37 = vld [vmem:[#allocation2 + $0x28] sm:$0xff] }
0x1974   :  { %5763 = vpow2.f32 %v4057_v39  ;;  %v5798_v39 = vld [vmem:[#allocation2 + $0x20] sm:$0xff] }
0x197f   :  { %v5762_v45 = vpop.eup %5761 }
0x1980   :  { %v4064_v61 = vsel %vm848_vm15, %v5762_v45, 0.0 }
0x1981   :  { %v5764_v28 = vpop.eup %5763  ;;  %4065 = vadd.xlane.f32.xlu0 %v4064_v61  ;;  %v5800_v61 = vld [vmem:[#allocation2 + $0x10] sm:$0xff] }
0x1982   :  { %v4061_v63 = vsel %vm848_vm15, %v5764_v28, 0.0 }
0x1983   :  { %4062 = vadd.xlane.f32.xlu1 %v4061_v63  ;;  %v5802_v63 = vld [vmem:[#allocation2] sm:$0xff] }
0x1a0a   :  { %v4066_v1 = vpop.xlane.xlu0 %4065 }
0x1a0b   :  { %5765 = vrcp.f32 %v4066_v1  ;;  %v4269_v1 = vld [vmem:[%s6358_s14 + $0x8] sm:$0xff] }
0x1a0c   :  { %v4063_v50 = vpop.xlane.xlu1 %4062 }
0x1a0d   :  { %5767 = vrcp.f32 %v4063_v50  ;;  %v4268_v50 = vld [vmem:[%s6358_s14] sm:$0xff] }
0x1a18   :  { %v5766_v54 = vpop.eup %5765 }
0x1a19   :  { %v4070_v30 = vmul.f32 %v5766_v54, %v5762_v45  ;;  %v5799_v45 = vld [vmem:[#allocation2 + $0x18] sm:$0xff] }
0x1a1a   :  { %v5768_v11 = vpop.eup %5767 }
0x1a1b   :  { %v4069_v0 = vmul.f32 %v5768_v11, %v5764_v28  ;;  %v5801_v28 = vld [vmem:[#allocation2 + $0x8] sm:$0xff] }
0x1a1d   :  { %5520 = vmatprep.mubr.msk.f32.mxu0 %vm848_vm15, %v4069_v0 }
0x1a1e   :  { %5521 = vmatmul.mubr.msk.f32.vlgmr.msra.gmra.mxu0 %vm848_vm15, %v4070_v30 }
0x1a1f   :  { %5524 = vmatpush3.msra.mxu0 %v3130_v47  ;;  %v4270_v47 = vld [vmem:[%s6358_s14 + $0x10] sm:$0xff]  ;;  %s7193_s14 = sld [smem:[#allocation41_spill]] }
0x1a20   :  { %5525 = vmatprep.subr.mxu0 %v3129_v32 }
0x1a21   :  { %5526 = vmatpush3.msra.mxu0 %v3129_v32 }
0x1a22   :  { %5527 = vmatprep.subr.mxu0 %v3128_v48 }
0x1a23   :  { %5528 = vmatpush3.msra.mxu0 %v3128_v48 }
0x1a24   :  { %5529 = vmatprep.subr.mxu0 %v3127_v23 }
0x1a25   :  { %5530 = vmatpush3.msra.mxu0 %v3127_v23 }
0x1a26   :  { %5545 = vmatprep.subr.mxu0 %v4275_v36 }
0x1ade   :  { %v5522_v51 = vpop.f32.mrf.mxu0 }
0x1adf   :  { %v4155_v7 = vadd.f32 %v5522_v51, %v3957_v29 }
0x1ae0   :  { %v4145_v53 = vpop.f32.mrf.mxu0 }
0x1ae1   :  { %v4154_v60 = vadd.f32 %v4145_v53, %v3956_v33 }
0x1ae3   :  { %5531 = vmatprep.mubr.msk.f32.mxu0 %vm486_vm2, %v4154_v60 }
0x1ae4   :  { %5532 = vmatmul.mubr.msk.f32.vlgmr.msra.gmra.mxu0 %vm486_vm2, %v4155_v7 }
0x1ae5   :  { %5546 = vmatpush3.msra.mxu0 %v4275_v36 }
0x1ae6   :  { %5547 = vmatprep.subr.mxu0 %v4274_v40 }
0x1ae7   :  { %5548 = vmatpush3.msra.mxu0 %v4274_v40 }
0x1ae8   :  { %5549 = vmatprep.subr.mxu0 %v4273_v25 }
0x1ae9   :  { %5550 = vmatpush3.msra.mxu0 %v4273_v25 }
0x1aea   :  { %5551 = vmatprep.subr.mxu0 %v4272_v18 }
0x1aeb   :  { %5552 = vmatpush3.msra.mxu0 %v4272_v18  ;;  %v4600_v18 = vld [vmem:[%s7193_s14] sm:$0xff] }
0x1aec   :  { %5553 = vmatprep.subr.mxu0 %v4271_v24 }
0x1aed   :  { %5554 = vmatpush3.msra.mxu0 %v4271_v24  ;;  %v4601_v24 = vld [vmem:[%s7193_s14 + $0x8] sm:$0xff] }
0x1aee   :  { %5555 = vmatprep.subr.mxu0 %v4270_v47 }
0x1aef   :  { %5556 = vmatpush3.msra.mxu0 %v4270_v47 }
0x1af0   :  { %5557 = vmatprep.subr.mxu0 %v4269_v1 }
0x1af1   :  { %5558 = vmatpush3.msra.mxu0 %v4269_v1 }
0x1af2   :  { %5559 = vmatprep.subr.mxu0 %v4268_v50 }
0x1af3   :  { %5560 = vmatpush3.msra.mxu0 %v4268_v50 }
0x1ba4   :  { %v5533_v10 = vpop.f32.mrf.mxu0 }
0x1ba5   :  { %v7078_v9 = vadd.f32 %v5533_v10, %v6929_v13  ;;  %v4267_v13 = vld [vmem:[%s6353_s17 + $0x18] sm:$0xff] }
0x1ba6   :  { %v4228_v12 = vpop.f32.mrf.mxu0  ;;  %5534 = vmatprep.subr.mxu1 %v4267_v13 }
0x1ba7   :  { %v7081_v59 = vadd.f32 %v4228_v12, %v6932_v15  ;;  %v4241_v14 = vmul.f32 %v7078_v9, %v7078_v9  ;;  %5535 = vmatpush3.msra.mxu1 %v4267_v13  ;;  %v4265_v15 = vld [vmem:[%s6353_s17 + $0x8] sm:$0xff]  ;;  %s7191_s17 = sld [smem:[#allocation49_spill]] }
0x1ba8   :  { %5536 = vmatprep.subr.mxu1 %v4266_v22 }
0x1ba9   :  { %v4245_v62 = vsel %vm486_vm2, %v4241_v14, 0.0  ;;  %v4240_v16 = vmul.f32 %v7081_v59, %v7081_v59  ;;  %5537 = vmatpush3.msra.mxu1 %v4266_v22 }
0x1baa   :  { %4246 = vadd.xlane.f32.xlu0 %v4245_v62  ;;  %5538 = vmatprep.subr.mxu1 %v4265_v15 }
0x1bab   :  { %v4242_v17 = vsel %vm486_vm2, %v4240_v16, 0.0  ;;  %5539 = vmatpush3.msra.mxu1 %v4265_v15 }
0x1bac   :  { %4243 = vadd.xlane.f32.xlu1 %v4242_v17  ;;  %5540 = vmatprep.subr.mxu1 %v4264_v6  ;;  %v4859_v17 = vld [vmem:[%s7192_s19] ss:$0 sm:$0xff] }
0x1bad   :  { %5541 = vmatpush3.msra.mxu1 %v4264_v6  ;;  %v4854_v42 = vld [vmem:[%s7191_s17] ss:$0 sm:$0xff] }
0x1bae   :  { %5564 = vmatprep.subr.msk.mxu1 %vm486_vm2, %v5787_v8 }
0x1c33   :  { %v4247_v49 = vpop.xlane.xlu0 %4246 }
0x1c34   :  { %v4249_v4 = vmul.f32 0.03125, %v4247_v49 }
0x1c35   :  { %v4244_v19 = vpop.xlane.xlu1 %4243 }
0x1c36   :  { %v4251_v58 = vadd.f32 1e-06, %v4249_v4  ;;  %v4248_v35 = vmul.f32 0.03125, %v4244_v19 }
0x1c38   :  { %5769 = vrsqrt.f32 %v4251_v58  ;;  %v4250_v55 = vadd.f32 1e-06, %v4248_v35 }
0x1c3a   :  { %5771 = vrsqrt.f32 %v4250_v55 }
0x1c45   :  { %v5770_v41 = vpop.eup %5769 }
0x1c46   :  { %v4255_v43 = vmul.f32 %v5770_v41, %v7078_v9 }
0x1c47   :  { %v5772_v2 = vpop.eup %5771 }
0x1c48   :  { %v4254_v29 = vmul.f32 %v5772_v2, %v7081_v59  ;;  %v4263_v26 = vmul.f32 %v4854_v42, %v4255_v43 }
0x1c4a   :  { %v4262_v52 = vmul.f32 %v4854_v42, %v4254_v29 }
0x1c4c   :  { %5542 = vmatprep.mubr.msk.f32.mxu1 %vm486_vm2, %v4262_v52 }
0x1c4d   :  { %5543 = vmatmul.mubr.msk.f32.vlgmr.msra.gmra.mxu1 %vm486_vm2, %v4263_v26 }
0x1c4e   :  { %5565 = vmatpush3.xpose.msk.msra.mxu1 %vm486_vm2, %v5787_v8 }
0x1c4f   :  { %5566 = vmatprep.subr.msk.mxu1 %vm486_vm2, %v5788_v46 }
0x1c52   :  { %5567 = vmatpush3.xpose.msk.msra.mxu1 %vm486_vm2, %v5788_v46 }
0x1c53   :  { %5568 = vmatprep.subr.msk.mxu1 %vm486_vm2, %v5789_v21 }
0x1c56   :  { %5569 = vmatpush3.xpose.msk.msra.mxu1 %vm486_vm2, %v5789_v21 }
0x1c57   :  { %5570 = vmatprep.subr.msk.mxu1 %vm486_vm2, %v5790_v3 }
0x1c5a   :  { %5571 = vmatpush3.xpose.msk.msra.mxu1 %vm486_vm2, %v5790_v3 }
0x1c5b   :  { %5572 = vmatprep.subr.msk.mxu1 %vm486_vm2, %v5791_v31 }
0x1c5e   :  { %5573 = vmatpush3.xpose.msk.msra.mxu1 %vm486_vm2, %v5791_v31 }
0x1c5f   :  { %5574 = vmatprep.subr.msk.mxu1 %vm486_vm2, %v5792_v27 }
0x1c62   :  { %5575 = vmatpush3.xpose.msk.msra.mxu1 %vm486_vm2, %v5792_v27 }
0x1c63   :  { %5576 = vmatprep.subr.msk.mxu1 %vm486_vm2, %v5793_v34 }
0x1c66   :  { %5577 = vmatpush3.xpose.msk.msra.mxu1 %vm486_vm2, %v5793_v34 }
0x1c67   :  { %5578 = vmatprep.subr.msk.mxu1 %vm486_vm2, %v5794_v5 }
0x1c6a   :  { %5579 = vmatpush3.xpose.msk.msra.mxu1 %vm486_vm2, %v5794_v5 }
0x1c6b   :  { %5580 = vmatprep.subr.msk.mxu1 %vm486_vm2, %v5795_v44 }
0x1c6e   :  { %5581 = vmatpush3.xpose.msk.msra.mxu1 %vm486_vm2, %v5795_v44 }
0x1c6f   :  { %5582 = vmatprep.subr.msk.mxu1 %vm486_vm2, %v5796_v38 }
0x1c72   :  { %5583 = vmatpush3.xpose.msk.msra.mxu1 %vm486_vm2, %v5796_v38 }
0x1c73   :  { %5584 = vmatprep.subr.msk.mxu1 %vm486_vm2, %v5797_v37 }
0x1c76   :  { %5585 = vmatpush3.xpose.msk.msra.mxu1 %vm486_vm2, %v5797_v37 }
0x1c77   :  { %5586 = vmatprep.subr.msk.mxu1 %vm486_vm2, %v5798_v39 }
0x1c7a   :  { %5587 = vmatpush3.xpose.msk.msra.mxu1 %vm486_vm2, %v5798_v39 }
0x1c7b   :  { %5588 = vmatprep.subr.msk.mxu1 %vm486_vm2, %v5799_v45 }
0x1c7e   :  { %5589 = vmatpush3.xpose.msk.msra.mxu1 %vm486_vm2, %v5799_v45 }
0x1c7f   :  { %5590 = vmatprep.subr.msk.mxu1 %vm486_vm2, %v5800_v61 }
0x1c82   :  { %5591 = vmatpush3.xpose.msk.msra.mxu1 %vm486_vm2, %v5800_v61 }
0x1c83   :  { %5592 = vmatprep.subr.msk.mxu1 %vm486_vm2, %v5801_v28 }
0x1c86   :  { %5593 = vmatpush3.xpose.msk.msra.mxu1 %vm486_vm2, %v5801_v28 }
0x1c87   :  { %5594 = vmatprep.subr.msk.mxu1 %vm486_vm2, %v5802_v63 }
0x1c8a   :  { %5595 = vmatpush3.xpose.msk.msra.mxu1 %vm486_vm2, %v5802_v63 }
0x1d0d   :  { %v5544_v54 = vpop.f32.mrf.mxu1 }
0x1d0e   :  { %v4358_v30 = vmax.f32 %v5544_v54, 0.0 }
0x1d0f   :  { %v4348_v11 = vpop.f32.mrf.mxu1 }
0x1d10   :  { %v4357_v0 = vmax.f32 %v4348_v11, 0.0 }
0x1d12   :  { %5561 = vmatprep.mubr.msk.f32.mxu0 %vm1749_vm0, %v4357_v0 }
0x1d13   :  { %5562 = vmatmul.mubr.msk.f32.vlgmr.msra.gmra.mxu0 %vm1749_vm0, %v4358_v30 }
0x1dd3   :  { %v5563_v32 = vpop.f32.mrf.mxu0 }
0x1dd4   :  { %v4441_v48 = vadd.f32 %v5563_v32, %v7078_v9 }
0x1dd5   :  { %v4431_v23 = vpop.f32.mrf.mxu0 }
0x1dd6   :  { %v4440_v57 = vadd.f32 %v4431_v23, %v7081_v59  ;;  %v4444_v51 = vmul.f32 %v4441_v48, %v4441_v48 }
0x1dd8   :  { %v4448_v33 = vsel %vm486_vm2, %v4444_v51, 0.0  ;;  %v4443_v53 = vmul.f32 %v4440_v57, %v4440_v57 }
0x1dd9   :  { %4449 = vadd.xlane.f32.xlu0 %v4448_v33 }
0x1dda   :  { %v4445_v60 = vsel %vm486_vm2, %v4443_v53, 0.0 }
0x1ddb   :  { %4446 = vadd.xlane.f32.xlu1 %v4445_v60 }
0x1e62   :  { %v4450_v7 = vpop.xlane.xlu0 %4449 }
0x1e63   :  { %v4452_v10 = vmul.f32 0.03125, %v4450_v7 }
0x1e64   :  { %v4447_v12 = vpop.xlane.xlu1 %4446 }
0x1e65   :  { %v4454_v14 = vadd.f32 1e-06, %v4452_v10  ;;  %v4451_v62 = vmul.f32 0.03125, %v4447_v12 }
0x1e67   :  { %5773 = vrsqrt.f32 %v4454_v14  ;;  %v4453_v16 = vadd.f32 1e-06, %v4451_v62 }
0x1e69   :  { %5775 = vrsqrt.f32 %v4453_v16 }
0x1e74   :  { %v5774_v9 = vpop.eup %5773 }
0x1e75   :  { %v4458_v59 = vmul.f32 %v5774_v9, %v4441_v48 }
0x1e76   :  { %v5776_v13 = vpop.eup %5775 }
0x1e77   :  { %v4457_v22 = vmul.f32 %v5776_v13, %v4440_v57  ;;  %v4466_v15 = vmul.f32 %v4859_v17, %v4458_v59 }
0x1e79   :  { %v4465_v6 = vmul.f32 %v4859_v17, %v4457_v22  ;;  %v4468_v36 = vmul.f32 0.17677669, %v4466_v15 }
0x1e7b   :  { %v4467_v8 = vmul.f32 0.17677669, %v4465_v6 }
0x1e7d   :  { %5596 = vmatprep.mubr.msk.f32.mxu1 %vm486_vm2, %v4467_v8 }
0x1e7e   :  { %5597 = vmatmul.mubr.msk.f32.vlgmr.msra.gmra.mxu1 %vm486_vm2, %v4468_v36 }
0x1f3e   :  { %v5598_v40 = vpop.f32.mrf.mxu1 }
0x1f3f   :  { %4599 = vst [vmem:[#allocation26 + $0x8] sm:$0xff] %v5598_v40  ;;  %4604 = vmax.xlane.f32.xlu0 %v5598_v40 }
0x1f40   :  { %v4589_v25 = vpop.f32.mrf.mxu1 }
0x1f41   :  { %4598 = vst [vmem:[#allocation26] sm:$0xff] %v4589_v25  ;;  %4602 = vmax.xlane.f32.xlu1 %v4589_v25 }
0x1f52   :  { %4623 = vperm.xlu1 %5652, %v4600_v18  }
0x1f55   :  { %4626 = vperm.xlu0 %5651, %v4601_v24  }
0x1fc8   :  { %v4605_v49 = vpop.xlane.xlu0 %4604 }
0x1fc9   :  { %v4607_v4 = vsub.f32 %v5598_v40, %v4605_v49 }
0x1fca   :  { %v4603_v19 = vpop.xlane.xlu1 %4602 }
0x1fcb   :  { %v4610_v58 = vmul.f32 1.442695, %v4607_v4  ;;  %v4606_v35 = vsub.f32 %v4589_v25, %v4603_v19 }
0x1fcd   :  { %5777 = vpow2.f32 %v4610_v58  ;;  %v4608_v55 = vmul.f32 1.442695, %v4606_v35 }
0x1fce   :  { %v4624_v43 = vpop.permute.xlu1 %4623 }
0x1fcf   :  { %5779 = vpow2.f32 %v4608_v55  ;;  %vm4628_vm8 = vcmp.eq.s32.totalorder %v6497_v20, %v4624_v43 }
0x1fd0   :  { %v4627_v41 = vpop.permute.xlu0 %4626  ;;  %v4630_v52 = vsel %vm4628_vm8, %v4589_v25, 0.0 }
0x1fd1   :  { %vm4629_vm2 = vcmp.eq.s32.totalorder %v6497_v20, %v4627_v41 }
0x1fd2   :  { %v4631_v29 = vsel %vm4629_vm2, %v5598_v40, 0.0 }
0x1fda   :  { %v5778_v2 = vpop.eup %5777 }
0x1fdb   :  { %4614 = vadd.xlane.f32.xlu0 %v5778_v2 }
0x1fdc   :  { %v5780_v42 = vpop.eup %5779 }
0x1fdd   :  { %4612 = vadd.xlane.f32.xlu1 %v5780_v42 }
0x1fdf   :  { %4634 = vadd.xlane.f32.xlu0 %v4631_v29 }
0x1fe1   :  { %4632 = vadd.xlane.f32.xlu1 %v4630_v52 }
0x1fe2   :  { %6114 = shalt.err (!%p6111_p9)
}
0x1fe3   :  { %4681 = dma.vmem_to_hbm [thread:$0]  %s4676_s3, 256, %s6363_s5, [#allocation4], %s6194_s0, %s6194_s0, %s6195_s18   ;;  %vm4636_vm9 = vcmp.ne.s32.totalorder %v4600_v18, 4294967196  ;;  %vm4637_vm10 = vcmp.ne.s32.totalorder %v4601_v24, 4294967196  ;;  %vm4646_vm11 = vcmask 7168   ;;  %vm4668_vm12 = vcmask 0  }
0x1fe4   :  { %v4879_v20 = vsel %vm4637_vm10, 1.0, %v6211_v56  ;;  %v4878_v26 = vsel %vm4636_vm9, 1.0, %v6211_v56  ;;  %s6214_s5 = smov [#allocation27]  }
0x1fe5   :  { %v4657_v46 = vsel %vm4646_vm11, %v4879_v20, 0.0  ;;  %v4656_v21 = vsel %vm4646_vm11, %v4878_v26, 0.0  ;;  %s4688_s0 = sshll.u32 %s6214_s5, 4  ;;  %s4689_s0 = int_to_ptr.vmem [resolvable:$true] %s4688_s0 }
0x1fe6   :  { %v4658_v3 = vadd.f32 %v4657_v46, %v4656_v21  ;;  %s6123_s18 = scalar_lea.vmem %s4689_s0, 16  ;;  %s6127_s10 = scalar_lea.vmem %s4689_s0, 32 }
0x1fe7   :  { %p6124_p10 = scmp.ne.s32.totalorder %s4689_s0, %s6123_s18  ;;  %p6128_p11 = scmp.lt.s32.totalorder %s4689_s0, %s4689_s0 }
0x1fe8   :  { %v4659_v31 = vrot.slane %v4658_v3, 4  ;;  %p6129_p12 = scmp.lt.s32.totalorder %s6127_s10, %s6123_s18 }
0x1fea   :  { %v4660_v34 = vadd.f32 %v4659_v31, %v4658_v3  ;;  %p6130_p13 = por %p6129_p12, %p6128_p11 }
0x1fec   :  { %v4661_v44 = vrot.slane %v4660_v34, 2  ;;  %p6131_p0 = pnand %p6130_p13, %p6124_p10 }
0x1fee   :  { %v4662_v38 = vadd.f32 %v4661_v44, %v4660_v34 }
0x1ff0   :  { %v4663_v37 = vrot.slane %v4662_v38, 1 }
0x1ff2   :  { %v4664_v28 = vadd.f32 %v4663_v37, %v4662_v38 }
0x1ff4   :  { %v4665_v54 = vmax.f32 %v4664_v28, 1.0 }
0x2064   :  { %v4615_v27 = vpop.xlane.xlu0 %4614 }
0x2065   :  { %5781 = vlog2.f32 %v4615_v27 }
0x2066   :  { %v4613_v5 = vpop.xlane.xlu1 %4612 }
0x2067   :  { %5783 = vlog2.f32 %v4613_v5 }
0x2068   :  { %v4635_v47 = vpop.xlane.xlu0 %4634  ;;  %5785 = vrcp.f32 %v4665_v54 }
0x206a   :  { %v4633_v11 = vpop.xlane.xlu1 %4632 }
0x2072   :  { %v5782_v39 = vpop.eup %5781 }
0x2073   :  { %v4619_v45 = vmul.f32 0.6931472, %v5782_v39 }
0x2074   :  { %v5784_v61 = vpop.eup %5783 }
0x2075   :  { %v4617_v63 = vmul.f32 0.6931472, %v5784_v61  ;;  %v4621_v56 = vadd.f32 %v4619_v45, %v4605_v49  ;;  %v5786_v10 = vpop.eup %5785 }
0x2077   :  { %v4643_v1 = vsub.f32 %v4621_v56, %v4635_v47  ;;  %v4620_v50 = vadd.f32 %v4617_v63, %v4603_v19 }
0x2079   :  { %v4645_v0 = vmul.f32 %v4879_v20, %v4643_v1  ;;  %v4642_v30 = vsub.f32 %v4620_v50, %v4633_v11 }
0x207b   :  { %v4644_v32 = vmul.f32 %v4878_v26, %v4642_v30  ;;  %v4648_v48 = vsel %vm4646_vm11, %v4645_v0, 0.0 }
0x207d   :  { %v4647_v23 = vsel %vm4646_vm11, %v4644_v32, 0.0 }
0x207e   :  { %v4649_v57 = vadd.f32 %v4648_v48, %v4647_v23 }
0x2080   :  { %v4650_v51 = vrot.slane %v4649_v57, 4 }
0x2082   :  { %v4651_v33 = vadd.f32 %v4650_v51, %v4649_v57 }
0x2084   :  { %v4652_v53 = vrot.slane %v4651_v33, 2 }
0x2086   :  { %v4653_v60 = vadd.f32 %v4652_v53, %v4651_v33 }
0x2088   :  { %v4654_v7 = vrot.slane %v4653_v60, 1 }
0x208a   :  { %v4655_v12 = vadd.f32 %v4654_v7, %v4653_v60 }
0x208c   :  { %v4667_v14 = vmul.f32 %v5786_v10, %v4655_v12 }
0x208e   :  { %4669 = vst.msk [vmem:[#allocation27] sm:$0x1] %vm4668_vm12, %v4667_v14 }
0x208f   :  { %6134 = shalt.err (!%p6131_p0)
}
0x2090   :  { %4691 = dma.vmem_to_hbm [thread:$0]  %s4689_s0, 16, %s6368_s9, [#allocation28]  }
0x2091   :  { %6159 = dma.done.wait [#allocation4], 256  }
0x2092   :  { %6160 = vsyncadd [#allocation4], 4294967040 }
0x2093   :  { %6161 = dma.done.wait [#allocation28], 16  }
0x2094   :  { %6162 = vsyncadd [#allocation28], 4294967280 }
0x2095   :  { %4698 = vsyncpa [#allocation3], 1 }
0x2096   :  { %4699 = vsyncpa [#allocation6], 1 }
0x2097   :  { %4700 = vsyncpa [#allocation9], 1 }
0x2098   :  { %4701 = vsyncpa [#allocation12], 1 }
0x2099   :  { %4702 = vsyncpa [#allocation15], 1 }
0x209a   :  { %4703 = vsyncpa [#allocation18], 1 }
0x209b   :  { %4704 = vsyncpa [#allocation21], 1 }
0x209c   :  { %4705 = vsyncpa [#allocation24], 1 }
0x209d   :  { %4706 = vsyncpa [#allocation4], 1 }
0x209e   :  { %4707 = vsyncpa [#allocation28], 1 }

</bundles_post_ra>
